<compile_context>
chip_gen: v7x
topology: tpu7x:2x2x1
jax: 0.10.0
libtpu: 0.0.40
codegen_flags: <defaults>
</compile_context>

<pallas_src>
import functools

import jax
import jax.numpy as jnp
from jax import lax
from jax.experimental import pallas as pl
from jax.experimental.pallas import tpu as pltpu

_VMEM = pl.BlockSpec(memory_space=pltpu.MemorySpace.VMEM)


# ----------------------------------------------------------------------------
# Fused Pallas kernel: shared 2-layer LSTM -> fused-heads 2-layer LSTM -> fused FC
# ----------------------------------------------------------------------------
def _fused_forward_kernel(x_ref,
                          ws1_ih_ref, ws1_hh_ref, bs1_ref,
                          ws2_ih_ref, ws2_hh_ref, bs2_ref,
                          wh1_ih_ref, wh1_hh_ref, bh1_ref,
                          wh2_ih_ref, wh2_hh_ref, bh2_ref,
                          wfc_ref, bfc_ref,
                          *rest,
                          out_dims, softmax_flags):
    n_out = len(out_dims)
    out_refs = rest[:n_out]
    xp_s_sc, y_s_sc, xp_h_sc, y_h_sc = rest[n_out:]

    T, B, Din = x_ref.shape
    H = ws1_hh_ref.shape[0]          # shared hidden width
    G = wh1_hh_ref.shape[0]          # fused-head hidden width (= num_heads * H)

    def run_layer(x_flat, wih, whh, b, g, xp_ref, y_ref):
        # Hoisted input projection for ALL timesteps: one big matmul, off the serial path.
        xp = jnp.dot(x_flat, wih, preferred_element_type=jnp.float32) + b
        xp_ref[...] = xp.reshape(T, B, 4 * g)

        # Lane mask selecting the 'g' (cell candidate) gate columns -> tanh; rest sigmoid.
        col = lax.broadcasted_iota(jnp.int32, (B, 4 * g), 1)
        g_mask = (col >= 2 * g) & (col < 3 * g)

        def step(t, carry):
            h, c = carry
            gates = xp_ref[t] + jnp.dot(h, whh, preferred_element_type=jnp.float32)
            act = jnp.where(g_mask, jnp.tanh(gates), jax.nn.sigmoid(gates))
            i_g = act[:, 0 * g:1 * g]
            f_g = act[:, 1 * g:2 * g]
            g_g = act[:, 2 * g:3 * g]
            o_g = act[:, 3 * g:4 * g]
            c_new = f_g * c + i_g * g_g
            h_new = o_g * jnp.tanh(c_new)
            if y_ref is not None:
                y_ref[t] = h_new
            return h_new, c_new

        init = (jnp.zeros((B, g), jnp.float32), jnp.zeros((B, g), jnp.float32))
        h_last, _ = lax.fori_loop(0, T, step, init, unroll=True)
        return h_last

    # ---- shared 2-layer LSTM (BN_shared is pre-folded into the head layer-1 weights) ----
    run_layer(x_ref[...].reshape(T * B, Din),
              ws1_ih_ref[...], ws1_hh_ref[...], bs1_ref[...], H, xp_s_sc, y_s_sc)
    run_layer(y_s_sc[...].reshape(T * B, H),
              ws2_ih_ref[...], ws2_hh_ref[...], bs2_ref[...], H, xp_s_sc, y_s_sc)

    # ---- fused head stacks: all requested heads in one recurrence ----
    run_layer(y_s_sc[...].reshape(T * B, H),
              wh1_ih_ref[...], wh1_hh_ref[...], bh1_ref[...], G, xp_h_sc, y_h_sc)
    # Final layer: only the last-timestep hidden state is needed -> no y writeback.
    h_last = run_layer(y_h_sc[...].reshape(T * B, G),
                       wh2_ih_ref[...], wh2_hh_ref[...], bh2_ref[...], G, xp_h_sc, None)

    # ---- fused FC epilogue (per-head BN folded into wfc/bfc, block-diagonal over heads) ----
    logits = jnp.dot(h_last, wfc_ref[...], preferred_element_type=jnp.float32) + bfc_ref[...]
    off = 0
    for idx, (dim, do_softmax) in enumerate(zip(out_dims, softmax_flags)):
        z = logits[:, off:off + dim]
        if do_softmax:
            m = jnp.max(z, axis=-1, keepdims=True)
            e = jnp.exp(z - m)
            z = e / jnp.sum(e, axis=-1, keepdims=True)
        out_refs[idx][...] = z
        off += dim


# ----------------------------------------------------------------------------
# Fused-parameter construction (BN folding, gate-major concat, block-diagonals)
# ----------------------------------------------------------------------------
def _bn_fold_params(gamma, beta, rmean, rvar, eps=1e-5):
    scale = gamma / jnp.sqrt(rvar + eps)
    shift = beta - rmean * scale
    return scale, shift


def _gate_major_concat(mats):
    """Column-concat per-head [rows, 4H] matrices into [rows, 4*nh*H], grouped by gate."""
    H = mats[0].shape[1] // 4
    blocks = [m[:, k * H:(k + 1) * H] for k in range(4) for m in mats]
    return jnp.concatenate(blocks, axis=1)


def _gate_major_block_diag(mats):
    """Per-head [H, 4H] -> block-diagonal [nh*H, 4*nh*H] with gate-major output columns."""
    nh = len(mats)
    H = mats[0].shape[0]
    G = nh * H
    out = jnp.zeros((G, 4 * G), jnp.float32)
    for j, m in enumerate(mats):
        for k in range(4):
            out = out.at[j * H:(j + 1) * H,
                         k * G + j * H:k * G + (j + 1) * H].set(m[:, k * H:(k + 1) * H])
    return out


def _build_fused_head_params(head_lstms, bn_shared, bn_heads, fc_params, eps=1e-5):
    s_scale, s_shift = _bn_fold_params(*bn_shared, eps=eps)

    wih1_l, b1_l, whh1_l, wih2_l, b2_l, whh2_l = [], [], [], [], [], []
    for (wih1, whh1, b1), (wih2, whh2, b2) in head_lstms:
        # Fold the shared BatchNorm affine into each head's layer-1 input projection.
        wih1_l.append(s_scale[:, None] * wih1)
        b1_l.append(b1 + (s_shift @ wih1)[None, :])
        whh1_l.append(whh1)
        wih2_l.append(wih2)
        b2_l.append(b2)
        whh2_l.append(whh2)

    wh1_ih = _gate_major_concat(wih1_l)          # [H, 4G]
    bh1 = _gate_major_concat(b1_l)               # [1, 4G]
    wh1_hh = _gate_major_block_diag(whh1_l)      # [G, 4G]
    wh2_ih = _gate_major_block_diag(wih2_l)      # [G, 4G]
    bh2 = _gate_major_concat(b2_l)               # [1, 4G]
    wh2_hh = _gate_major_block_diag(whh2_l)      # [G, 4G]

    nh = len(head_lstms)
    H = wih1_l[0].shape[0]
    G = nh * H
    dims = [w.shape[1] for (w, _) in fc_params]
    wfc = jnp.zeros((G, sum(dims)), jnp.float32)
    bfc_parts = []
    off = 0
    for j, ((w, b), bn) in enumerate(zip(fc_params, bn_heads)):
        h_scale, h_shift = _bn_fold_params(*bn, eps=eps)
        wfc = wfc.at[j * H:(j + 1) * H, off:off + dims[j]].set(h_scale[:, None] * w)
        bfc_parts.append(b + (h_shift @ w)[None, :])
        off += dims[j]
    bfc = jnp.concatenate(bfc_parts, axis=1)
    return wh1_ih, wh1_hh, bh1, wh2_ih, wh2_hh, bh2, wfc, bfc


# ----------------------------------------------------------------------------
# Parameter construction (deterministic, matches module shapes)
# ----------------------------------------------------------------------------
def init_lstm_params(key, in_dim, hidden, num_layers=2):
    layers = []
    bound = 1.0 / jnp.sqrt(jnp.float32(hidden))
    for l in range(num_layers):
        key, k1, k2, k3, k4 = jax.random.split(key, 5)
        d_in = in_dim if l == 0 else hidden
        wih = jax.random.uniform(k1, (d_in, 4 * hidden), jnp.float32, -bound, bound)
        whh = jax.random.uniform(k2, (hidden, 4 * hidden), jnp.float32, -bound, bound)
        b_ih = jax.random.uniform(k3, (4 * hidden,), jnp.float32, -bound, bound)
        b_hh = jax.random.uniform(k4, (4 * hidden,), jnp.float32, -bound, bound)
        layers.append((wih, whh, (b_ih + b_hh).reshape(1, 4 * hidden)))
    return key, layers


def init_bn_params(hidden):
    # PyTorch defaults: gamma=1, beta=0, running_mean=0, running_var=1
    return (jnp.ones((hidden,), jnp.float32), jnp.zeros((hidden,), jnp.float32),
            jnp.zeros((hidden,), jnp.float32), jnp.ones((hidden,), jnp.float32))


def init_linear_params(key, in_dim, out_dim):
    key, k1, k2 = jax.random.split(key, 3)
    bound = 1.0 / jnp.sqrt(jnp.float32(in_dim))
    w = jax.random.uniform(k1, (in_dim, out_dim), jnp.float32, -bound, bound)
    b = jax.random.uniform(k2, (1, out_dim), jnp.float32, -bound, bound)
    return key, (w, b)


def init_model_params(key, input_dim, lstm_hidden_dim, num_target_chars):
    p = {}
    key, p["shared_lstm"] = init_lstm_params(key, input_dim, lstm_hidden_dim)
    key, p["act_lstm"] = init_lstm_params(key, lstm_hidden_dim, lstm_hidden_dim)
    key, p["time_lstm"] = init_lstm_params(key, lstm_hidden_dim, lstm_hidden_dim)
    key, p["timeR_lstm"] = init_lstm_params(key, lstm_hidden_dim, lstm_hidden_dim)
    p["bn_shared"] = init_bn_params(lstm_hidden_dim)
    p["bn_act"] = init_bn_params(lstm_hidden_dim)
    p["bn_time"] = init_bn_params(lstm_hidden_dim)
    p["bn_timeR"] = init_bn_params(lstm_hidden_dim)
    key, p["fc_act"] = init_linear_params(key, lstm_hidden_dim, num_target_chars)
    key, p["fc_time"] = init_linear_params(key, lstm_hidden_dim, 1)
    key, p["fc_timeR"] = init_linear_params(key, lstm_hidden_dim, 1)
    return p


# ----------------------------------------------------------------------------
# Full forward (mirrors LSTMModel.forward; task_type is compile-time static)
# ----------------------------------------------------------------------------
@functools.partial(jax.jit, static_argnums=(2,))
def lstm_model_forward(params, lstm_input, task_type):
    need_act = task_type in ("classification", "next", "all")
    need_time = task_type in ("regression", "next", "all")
    need_timeR = task_type in ("regression", "remaining", "all")

    head_names = []
    if need_act:
        head_names.append("act")
    if need_time:
        head_names.append("time")
    if need_timeR:
        head_names.append("timeR")

    if not head_names:
        # All returned outputs are None for unrecognized task types.
        return None, None, None

    B, T, _ = lstm_input.shape
    H = params["shared_lstm"][0][1].shape[0]
    G = len(head_names) * H

    # Pad batch to a sublane multiple once at the boundary; single transpose to time-major.
    B8 = ((B + 7) // 8) * 8
    x = lstm_input.astype(jnp.float32)
    if B8 != B:
        x = jnp.pad(x, ((0, B8 - B), (0, 0), (0, 0)))
    x_tbd = jnp.transpose(x, (1, 0, 2))

    (ws1_ih, ws1_hh, bs1), (ws2_ih, ws2_hh, bs2) = params["shared_lstm"]

    head_lstms = [params[f"{n}_lstm"] for n in head_names]
    bn_heads = [params[f"bn_{n}"] for n in head_names]
    fcs = [params[f"fc_{n}"] for n in head_names]
    out_dims = tuple(int(w.shape[1]) for (w, _) in fcs)
    softmax_flags = tuple(n == "act" for n in head_names)

    (wh1_ih, wh1_hh, bh1, wh2_ih, wh2_hh, bh2, wfc, bfc) = _build_fused_head_params(
        head_lstms, params["bn_shared"], bn_heads, fcs)

    kern = functools.partial(_fused_forward_kernel,
                             out_dims=out_dims, softmax_flags=softmax_flags)
    outs = pl.pallas_call(
        kern,
        out_shape=tuple(jax.ShapeDtypeStruct((B8, d), jnp.float32) for d in out_dims),
        in_specs=[_VMEM] * 15,
        out_specs=tuple(_VMEM for _ in out_dims),
        scratch_shapes=[
            pltpu.VMEM((T, B8, 4 * H), jnp.float32),   # shared-layer x-projection
            pltpu.VMEM((T, B8, H), jnp.float32),       # shared inter-layer activations
            pltpu.VMEM((T, B8, 4 * G), jnp.float32),   # fused-head x-projection
            pltpu.VMEM((T, B8, G), jnp.float32),       # fused-head inter-layer activations
        ],
    )(x_tbd, ws1_ih, ws1_hh, bs1, ws2_ih, ws2_hh, bs2,
      wh1_ih, wh1_hh, bh1, wh2_ih, wh2_hh, bh2, wfc, bfc)

    results = {name: out[:B] for name, out in zip(head_names, outs)}
    return results.get("act"), results.get("time"), results.get("timeR")


# ----------------------------------------------------------------------------
if __name__ == "__main__":
    B, T = 8, 8
    input_dim, lstm_hidden_dim, num_target_chars = 8, 32, 10

    key = jax.random.PRNGKey(0)
    key, kx = jax.random.split(key)
    lstm_input = jax.random.normal(kx, (B, T, input_dim), dtype=jnp.float32)

    params = init_model_params(key, input_dim, lstm_hidden_dim, num_target_chars)

    act_out, time_out, timeR_out = lstm_model_forward(params, lstm_input, "all")
    act_out = jax.block_until_ready(act_out)
    time_out = jax.block_until_ready(time_out)
    timeR_out = jax.block_until_ready(timeR_out)

    assert act_out.shape == (B, num_target_chars)
    assert time_out.shape == (B, 1)
    assert timeR_out.shape == (B, 1)
    assert bool(jnp.all(jnp.isfinite(act_out)))
    assert bool(jnp.all(jnp.isfinite(time_out)))
    assert bool(jnp.all(jnp.isfinite(timeR_out)))
    # softmax rows must sum to 1
    assert bool(jnp.allclose(jnp.sum(act_out, axis=1), 1.0, atol=1e-5))

    print("KERNEL_OK")
</pallas_src>

<mosaic_0001>
module attributes {stable_mosaic.version = 11 : i64} {
  func.func @_fused_forward_kernel(%arg0: memref<8x8x8xf32, #tpu.memory_space<vmem>>, %arg1: memref<8x128xf32, #tpu.memory_space<vmem>>, %arg2: memref<32x128xf32, #tpu.memory_space<vmem>>, %arg3: memref<1x128xf32, #tpu.memory_space<vmem>>, %arg4: memref<32x128xf32, #tpu.memory_space<vmem>>, %arg5: memref<32x128xf32, #tpu.memory_space<vmem>>, %arg6: memref<1x128xf32, #tpu.memory_space<vmem>>, %arg7: memref<32x384xf32, #tpu.memory_space<vmem>>, %arg8: memref<96x384xf32, #tpu.memory_space<vmem>>, %arg9: memref<1x384xf32, #tpu.memory_space<vmem>>, %arg10: memref<96x384xf32, #tpu.memory_space<vmem>>, %arg11: memref<96x384xf32, #tpu.memory_space<vmem>>, %arg12: memref<1x384xf32, #tpu.memory_space<vmem>>, %arg13: memref<96x12xf32, #tpu.memory_space<vmem>>, %arg14: memref<1x12xf32, #tpu.memory_space<vmem>>, %arg15: memref<8x10xf32, #tpu.memory_space<vmem>>, %arg16: memref<8x1xf32, #tpu.memory_space<vmem>>, %arg17: memref<8x1xf32, #tpu.memory_space<vmem>>, %arg18: memref<8x8x128xf32, #tpu.memory_space<vmem>>, %arg19: memref<8x8x32xf32, #tpu.memory_space<vmem>>, %arg20: memref<8x8x384xf32, #tpu.memory_space<vmem>>, %arg21: memref<8x8x96xf32, #tpu.memory_space<vmem>>) attributes {dimension_semantics = [], scalar_prefetch = 0 : i64, scratch_operands = 4 : i64, tpu.core_type = #tpu.core_type<tc>} {
    %c0 = arith.constant 0 : index
    %c0_0 = arith.constant 0 : index
    %c0_1 = arith.constant 0 : index
    %0 = vector.load %arg0[%c0, %c0_0, %c0_1] : memref<8x8x8xf32, #tpu.memory_space<vmem>>, vector<8x8x8xf32>
    %1 = vector.shape_cast %0 : vector<8x8x8xf32> to vector<64x8xf32>
    %c0_2 = arith.constant 0 : index
    %c0_3 = arith.constant 0 : index
    %2 = vector.load %arg1[%c0_2, %c0_3] : memref<8x128xf32, #tpu.memory_space<vmem>>, vector<8x128xf32>
    %c0_4 = arith.constant 0 : index
    %c0_5 = arith.constant 0 : index
    %3 = vector.load %arg2[%c0_4, %c0_5] : memref<32x128xf32, #tpu.memory_space<vmem>>, vector<32x128xf32>
    %c0_6 = arith.constant 0 : index
    %c0_7 = arith.constant 0 : index
    %4 = vector.load %arg3[%c0_6, %c0_7] : memref<1x128xf32, #tpu.memory_space<vmem>>, vector<1x128xf32>
    %cst = arith.constant dense<0.000000e+00> : vector<64x128xf32>
    %5 = tpu.matmul %1, %2, %cst {dimension_numbers = #tpu.dot_dimension_numbers<[1], [0], [0], [1], [0, 0, 1, 1], [], []>} : vector<64x8xf32>, vector<8x128xf32>, vector<64x128xf32> -> vector<64x128xf32>
    %6 = vector.broadcast %4 : vector<1x128xf32> to vector<64x128xf32>
    %7 = arith.addf %5, %6 : vector<64x128xf32>
    %8 = vector.shape_cast %7 : vector<64x128xf32> to vector<8x8x128xf32>
    %c0_8 = arith.constant 0 : index
    %c0_9 = arith.constant 0 : index
    %c0_10 = arith.constant 0 : index
    %9 = vector.load %arg18[%c0_8, %c0_9, %c0_10] : memref<8x8x128xf32, #tpu.memory_space<vmem>>, vector<8x8x128xf32>
    tpu.vector_store %arg18[%c0_8, %c0_9, %c0_10], %8 {strides = array<i32>} : memref<8x8x128xf32, #tpu.memory_space<vmem>>, vector<8x8x128xf32>,
    %10 = tpu.iota {dimensions = array<i32: 1>} : vector<8x128xi32>
    %c64_i32 = arith.constant 64 : i32
    %11 = vector.broadcast %c64_i32 : i32 to vector<8x128xi32>
    %12 = arith.cmpi sge, %10, %11 : vector<8x128xi32>
    %c96_i32 = arith.constant 96 : i32
    %13 = vector.broadcast %c96_i32 : i32 to vector<8x128xi32>
    %14 = arith.cmpi slt, %10, %13 : vector<8x128xi32>
    %15 = arith.andi %12, %14 : vector<8x128xi1>
    %cst_11 = arith.constant 0.000000e+00 : f32
    %16 = vector.broadcast %cst_11 : f32 to vector<8x32xf32>
    %cst_12 = arith.constant 0.000000e+00 : f32
    %17 = vector.broadcast %cst_12 : f32 to vector<8x32xf32>
    %c0_i32 = arith.constant 0 : i32
    %18 = arith.index_cast %c0_i32 : i32 to index
    %c0_13 = arith.constant 0 : index
    %c0_14 = arith.constant 0 : index
    %19 = vector.load %arg18[%18, %c0_13, %c0_14] : memref<8x8x128xf32, #tpu.memory_space<vmem>>, vector<1x8x128xf32>
    %20 = vector.shape_cast %19 : vector<1x8x128xf32> to vector<8x128xf32>
    %cst_15 = arith.constant dense<0.000000e+00> : vector<8x128xf32>
    %21 = tpu.matmul %16, %3, %cst_15 {dimension_numbers = #tpu.dot_dimension_numbers<[1], [0], [0], [1], [0, 0, 1, 1], [], []>} : vector<8x32xf32>, vector<32x128xf32>, vector<8x128xf32> -> vector<8x128xf32>
    %22 = arith.addf %20, %21 : vector<8x128xf32>
    %23 = math.tanh %22 : vector<8x128xf32>
    %24 = arith.negf %22 : vector<8x128xf32>
    %25 = math.exp %24 : vector<8x128xf32>
    %cst_16 = arith.constant 1.000000e+00 : f32
    %26 = vector.broadcast %cst_16 : f32 to vector<8x128xf32>
    %27 = arith.addf %26, %25 : vector<8x128xf32>
    %28 = arith.divf %26, %27 : vector<8x128xf32>
    %29 = arith.select %15, %23, %28 : vector<8x128xi1>, vector<8x128xf32>
    %30 = vector.extract_strided_slice %29 {offsets = [0, 0], sizes = [8, 32], strides = [1, 1]} : vector<8x128xf32> to vector<8x32xf32>
    %31 = vector.extract_strided_slice %29 {offsets = [0, 32], sizes = [8, 32], strides = [1, 1]} : vector<8x128xf32> to vector<8x32xf32>
    %32 = vector.extract_strided_slice %29 {offsets = [0, 64], sizes = [8, 32], strides = [1, 1]} : vector<8x128xf32> to vector<8x32xf32>
    %33 = vector.extract_strided_slice %29 {offsets = [0, 96], sizes = [8, 32], strides = [1, 1]} : vector<8x128xf32> to vector<8x32xf32>
    %34 = arith.mulf %31, %17 : vector<8x32xf32>
    %35 = arith.mulf %30, %32 : vector<8x32xf32>
    %36 = arith.addf %34, %35 : vector<8x32xf32>
    %37 = math.tanh %36 : vector<8x32xf32>
    %38 = arith.mulf %33, %37 : vector<8x32xf32>
    %39 = arith.index_cast %c0_i32 : i32 to index
    %c0_17 = arith.constant 0 : index
    %c0_18 = arith.constant 0 : index
    %40 = vector.load %arg19[%39, %c0_17, %c0_18] : memref<8x8x32xf32, #tpu.memory_space<vmem>>, vector<1x8x32xf32>
    %41 = vector.shape_cast %40 : vector<1x8x32xf32> to vector<8x32xf32>
    %42 = vector.shape_cast %38 : vector<8x32xf32> to vector<1x8x32xf32>
    tpu.vector_store %arg19[%39, %c0_17, %c0_18], %42 {strides = array<i32>} : memref<8x8x32xf32, #tpu.memory_space<vmem>>, vector<1x8x32xf32>,
    %c1_i32 = arith.constant 1 : i32
    %43 = arith.index_cast %c1_i32 : i32 to index
    %c0_19 = arith.constant 0 : index
    %c0_20 = arith.constant 0 : index
    %44 = vector.load %arg18[%43, %c0_19, %c0_20] : memref<8x8x128xf32, #tpu.memory_space<vmem>>, vector<1x8x128xf32>
    %45 = vector.shape_cast %44 : vector<1x8x128xf32> to vector<8x128xf32>
    %cst_21 = arith.constant dense<0.000000e+00> : vector<8x128xf32>
    %46 = tpu.matmul %38, %3, %cst_21 {dimension_numbers = #tpu.dot_dimension_numbers<[1], [0], [0], [1], [0, 0, 1, 1], [], []>} : vector<8x32xf32>, vector<32x128xf32>, vector<8x128xf32> -> vector<8x128xf32>
    %47 = arith.addf %45, %46 : vector<8x128xf32>
    %48 = math.tanh %47 : vector<8x128xf32>
    %49 = arith.negf %47 : vector<8x128xf32>
    %50 = math.exp %49 : vector<8x128xf32>
    %cst_22 = arith.constant 1.000000e+00 : f32
    %51 = vector.broadcast %cst_22 : f32 to vector<8x128xf32>
    %52 = arith.addf %51, %50 : vector<8x128xf32>
    %53 = arith.divf %51, %52 : vector<8x128xf32>
    %54 = arith.select %15, %48, %53 : vector<8x128xi1>, vector<8x128xf32>
    %55 = vector.extract_strided_slice %54 {offsets = [0, 0], sizes = [8, 32], strides = [1, 1]} : vector<8x128xf32> to vector<8x32xf32>
    %56 = vector.extract_strided_slice %54 {offsets = [0, 32], sizes = [8, 32], strides = [1, 1]} : vector<8x128xf32> to vector<8x32xf32>
    %57 = vector.extract_strided_slice %54 {offsets = [0, 64], sizes = [8, 32], strides = [1, 1]} : vector<8x128xf32> to vector<8x32xf32>
    %58 = vector.extract_strided_slice %54 {offsets = [0, 96], sizes = [8, 32], strides = [1, 1]} : vector<8x128xf32> to vector<8x32xf32>
    %59 = arith.mulf %56, %36 : vector<8x32xf32>
    %60 = arith.mulf %55, %57 : vector<8x32xf32>
    %61 = arith.addf %59, %60 : vector<8x32xf32>
    %62 = math.tanh %61 : vector<8x32xf32>
    %63 = arith.mulf %58, %62 : vector<8x32xf32>
    %64 = arith.index_cast %c1_i32 : i32 to index
    %c0_23 = arith.constant 0 : index
    %c0_24 = arith.constant 0 : index
    %65 = vector.load %arg19[%64, %c0_23, %c0_24] : memref<8x8x32xf32, #tpu.memory_space<vmem>>, vector<1x8x32xf32>
    %66 = vector.shape_cast %65 : vector<1x8x32xf32> to vector<8x32xf32>
    %67 = vector.shape_cast %63 : vector<8x32xf32> to vector<1x8x32xf32>
    tpu.vector_store %arg19[%64, %c0_23, %c0_24], %67 {strides = array<i32>} : memref<8x8x32xf32, #tpu.memory_space<vmem>>, vector<1x8x32xf32>,
    %c2_i32 = arith.constant 2 : i32
    %68 = arith.index_cast %c2_i32 : i32 to index
    %c0_25 = arith.constant 0 : index
    %c0_26 = arith.constant 0 : index
    %69 = vector.load %arg18[%68, %c0_25, %c0_26] : memref<8x8x128xf32, #tpu.memory_space<vmem>>, vector<1x8x128xf32>
    %70 = vector.shape_cast %69 : vector<1x8x128xf32> to vector<8x128xf32>
    %cst_27 = arith.constant dense<0.000000e+00> : vector<8x128xf32>
    %71 = tpu.matmul %63, %3, %cst_27 {dimension_numbers = #tpu.dot_dimension_numbers<[1], [0], [0], [1], [0, 0, 1, 1], [], []>} : vector<8x32xf32>, vector<32x128xf32>, vector<8x128xf32> -> vector<8x128xf32>
    %72 = arith.addf %70, %71 : vector<8x128xf32>
    %73 = math.tanh %72 : vector<8x128xf32>
    %74 = arith.negf %72 : vector<8x128xf32>
    %75 = math.exp %74 : vector<8x128xf32>
    %cst_28 = arith.constant 1.000000e+00 : f32
    %76 = vector.broadcast %cst_28 : f32 to vector<8x128xf32>
    %77 = arith.addf %76, %75 : vector<8x128xf32>
    %78 = arith.divf %76, %77 : vector<8x128xf32>
    %79 = arith.select %15, %73, %78 : vector<8x128xi1>, vector<8x128xf32>
    %80 = vector.extract_strided_slice %79 {offsets = [0, 0], sizes = [8, 32], strides = [1, 1]} : vector<8x128xf32> to vector<8x32xf32>
    %81 = vector.extract_strided_slice %79 {offsets = [0, 32], sizes = [8, 32], strides = [1, 1]} : vector<8x128xf32> to vector<8x32xf32>
    %82 = vector.extract_strided_slice %79 {offsets = [0, 64], sizes = [8, 32], strides = [1, 1]} : vector<8x128xf32> to vector<8x32xf32>
    %83 = vector.extract_strided_slice %79 {offsets = [0, 96], sizes = [8, 32], strides = [1, 1]} : vector<8x128xf32> to vector<8x32xf32>
    %84 = arith.mulf %81, %61 : vector<8x32xf32>
    %85 = arith.mulf %80, %82 : vector<8x32xf32>
    %86 = arith.addf %84, %85 : vector<8x32xf32>
    %87 = math.tanh %86 : vector<8x32xf32>
    %88 = arith.mulf %83, %87 : vector<8x32xf32>
    %89 = arith.index_cast %c2_i32 : i32 to index
    %c0_29 = arith.constant 0 : index
    %c0_30 = arith.constant 0 : index
    %90 = vector.load %arg19[%89, %c0_29, %c0_30] : memref<8x8x32xf32, #tpu.memory_space<vmem>>, vector<1x8x32xf32>
    %91 = vector.shape_cast %90 : vector<1x8x32xf32> to vector<8x32xf32>
    %92 = vector.shape_cast %88 : vector<8x32xf32> to vector<1x8x32xf32>
    tpu.vector_store %arg19[%89, %c0_29, %c0_30], %92 {strides = array<i32>} : memref<8x8x32xf32, #tpu.memory_space<vmem>>, vector<1x8x32xf32>,
    %c3_i32 = arith.constant 3 : i32
    %93 = arith.index_cast %c3_i32 : i32 to index
    %c0_31 = arith.constant 0 : index
    %c0_32 = arith.constant 0 : index
    %94 = vector.load %arg18[%93, %c0_31, %c0_32] : memref<8x8x128xf32, #tpu.memory_space<vmem>>, vector<1x8x128xf32>
    %95 = vector.shape_cast %94 : vector<1x8x128xf32> to vector<8x128xf32>
    %cst_33 = arith.constant dense<0.000000e+00> : vector<8x128xf32>
    %96 = tpu.matmul %88, %3, %cst_33 {dimension_numbers = #tpu.dot_dimension_numbers<[1], [0], [0], [1], [0, 0, 1, 1], [], []>} : vector<8x32xf32>, vector<32x128xf32>, vector<8x128xf32> -> vector<8x128xf32>
    %97 = arith.addf %95, %96 : vector<8x128xf32>
    %98 = math.tanh %97 : vector<8x128xf32>
    %99 = arith.negf %97 : vector<8x128xf32>
    %100 = math.exp %99 : vector<8x128xf32>
    %cst_34 = arith.constant 1.000000e+00 : f32
    %101 = vector.broadcast %cst_34 : f32 to vector<8x128xf32>
    %102 = arith.addf %101, %100 : vector<8x128xf32>
    %103 = arith.divf %101, %102 : vector<8x128xf32>
    %104 = arith.select %15, %98, %103 : vector<8x128xi1>, vector<8x128xf32>
    %105 = vector.extract_strided_slice %104 {offsets = [0, 0], sizes = [8, 32], strides = [1, 1]} : vector<8x128xf32> to vector<8x32xf32>
    %106 = vector.extract_strided_slice %104 {offsets = [0, 32], sizes = [8, 32], strides = [1, 1]} : vector<8x128xf32> to vector<8x32xf32>
    %107 = vector.extract_strided_slice %104 {offsets = [0, 64], sizes = [8, 32], strides = [1, 1]} : vector<8x128xf32> to vector<8x32xf32>
    %108 = vector.extract_strided_slice %104 {offsets = [0, 96], sizes = [8, 32], strides = [1, 1]} : vector<8x128xf32> to vector<8x32xf32>
    %109 = arith.mulf %106, %86 : vector<8x32xf32>
    %110 = arith.mulf %105, %107 : vector<8x32xf32>
    %111 = arith.addf %109, %110 : vector<8x32xf32>
    %112 = math.tanh %111 : vector<8x32xf32>
    %113 = arith.mulf %108, %112 : vector<8x32xf32>
    %114 = arith.index_cast %c3_i32 : i32 to index
    %c0_35 = arith.constant 0 : index
    %c0_36 = arith.constant 0 : index
    %115 = vector.load %arg19[%114, %c0_35, %c0_36] : memref<8x8x32xf32, #tpu.memory_space<vmem>>, vector<1x8x32xf32>
    %116 = vector.shape_cast %115 : vector<1x8x32xf32> to vector<8x32xf32>
    %117 = vector.shape_cast %113 : vector<8x32xf32> to vector<1x8x32xf32>
    tpu.vector_store %arg19[%114, %c0_35, %c0_36], %117 {strides = array<i32>} : memref<8x8x32xf32, #tpu.memory_space<vmem>>, vector<1x8x32xf32>,
    %c4_i32 = arith.constant 4 : i32
    %118 = arith.index_cast %c4_i32 : i32 to index
    %c0_37 = arith.constant 0 : index
    %c0_38 = arith.constant 0 : index
    %119 = vector.load %arg18[%118, %c0_37, %c0_38] : memref<8x8x128xf32, #tpu.memory_space<vmem>>, vector<1x8x128xf32>
    %120 = vector.shape_cast %119 : vector<1x8x128xf32> to vector<8x128xf32>
    %cst_39 = arith.constant dense<0.000000e+00> : vector<8x128xf32>
    %121 = tpu.matmul %113, %3, %cst_39 {dimension_numbers = #tpu.dot_dimension_numbers<[1], [0], [0], [1], [0, 0, 1, 1], [], []>} : vector<8x32xf32>, vector<32x128xf32>, vector<8x128xf32> -> vector<8x128xf32>
    %122 = arith.addf %120, %121 : vector<8x128xf32>
    %123 = math.tanh %122 : vector<8x128xf32>
    %124 = arith.negf %122 : vector<8x128xf32>
    %125 = math.exp %124 : vector<8x128xf32>
    %cst_40 = arith.constant 1.000000e+00 : f32
    %126 = vector.broadcast %cst_40 : f32 to vector<8x128xf32>
    %127 = arith.addf %126, %125 : vector<8x128xf32>
    %128 = arith.divf %126, %127 : vector<8x128xf32>
    %129 = arith.select %15, %123, %128 : vector<8x128xi1>, vector<8x128xf32>
    %130 = vector.extract_strided_slice %129 {offsets = [0, 0], sizes = [8, 32], strides = [1, 1]} : vector<8x128xf32> to vector<8x32xf32>
    %131 = vector.extract_strided_slice %129 {offsets = [0, 32], sizes = [8, 32], strides = [1, 1]} : vector<8x128xf32> to vector<8x32xf32>
    %132 = vector.extract_strided_slice %129 {offsets = [0, 64], sizes = [8, 32], strides = [1, 1]} : vector<8x128xf32> to vector<8x32xf32>
    %133 = vector.extract_strided_slice %129 {offsets = [0, 96], sizes = [8, 32], strides = [1, 1]} : vector<8x128xf32> to vector<8x32xf32>
    %134 = arith.mulf %131, %111 : vector<8x32xf32>
    %135 = arith.mulf %130, %132 : vector<8x32xf32>
    %136 = arith.addf %134, %135 : vector<8x32xf32>
    %137 = math.tanh %136 : vector<8x32xf32>
    %138 = arith.mulf %133, %137 : vector<8x32xf32>
    %139 = arith.index_cast %c4_i32 : i32 to index
    %c0_41 = arith.constant 0 : index
    %c0_42 = arith.constant 0 : index
    %140 = vector.load %arg19[%139, %c0_41, %c0_42] : memref<8x8x32xf32, #tpu.memory_space<vmem>>, vector<1x8x32xf32>
    %141 = vector.shape_cast %140 : vector<1x8x32xf32> to vector<8x32xf32>
    %142 = vector.shape_cast %138 : vector<8x32xf32> to vector<1x8x32xf32>
    tpu.vector_store %arg19[%139, %c0_41, %c0_42], %142 {strides = array<i32>} : memref<8x8x32xf32, #tpu.memory_space<vmem>>, vector<1x8x32xf32>,
    %c5_i32 = arith.constant 5 : i32
    %143 = arith.index_cast %c5_i32 : i32 to index
    %c0_43 = arith.constant 0 : index
    %c0_44 = arith.constant 0 : index
    %144 = vector.load %arg18[%143, %c0_43, %c0_44] : memref<8x8x128xf32, #tpu.memory_space<vmem>>, vector<1x8x128xf32>
    %145 = vector.shape_cast %144 : vector<1x8x128xf32> to vector<8x128xf32>
    %cst_45 = arith.constant dense<0.000000e+00> : vector<8x128xf32>
    %146 = tpu.matmul %138, %3, %cst_45 {dimension_numbers = #tpu.dot_dimension_numbers<[1], [0], [0], [1], [0, 0, 1, 1], [], []>} : vector<8x32xf32>, vector<32x128xf32>, vector<8x128xf32> -> vector<8x128xf32>
    %147 = arith.addf %145, %146 : vector<8x128xf32>
    %148 = math.tanh %147 : vector<8x128xf32>
    %149 = arith.negf %147 : vector<8x128xf32>
    %150 = math.exp %149 : vector<8x128xf32>
    %cst_46 = arith.constant 1.000000e+00 : f32
    %151 = vector.broadcast %cst_46 : f32 to vector<8x128xf32>
    %152 = arith.addf %151, %150 : vector<8x128xf32>
    %153 = arith.divf %151, %152 : vector<8x128xf32>
    %154 = arith.select %15, %148, %153 : vector<8x128xi1>, vector<8x128xf32>
    %155 = vector.extract_strided_slice %154 {offsets = [0, 0], sizes = [8, 32], strides = [1, 1]} : vector<8x128xf32> to vector<8x32xf32>
    %156 = vector.extract_strided_slice %154 {offsets = [0, 32], sizes = [8, 32], strides = [1, 1]} : vector<8x128xf32> to vector<8x32xf32>
    %157 = vector.extract_strided_slice %154 {offsets = [0, 64], sizes = [8, 32], strides = [1, 1]} : vector<8x128xf32> to vector<8x32xf32>
    %158 = vector.extract_strided_slice %154 {offsets = [0, 96], sizes = [8, 32], strides = [1, 1]} : vector<8x128xf32> to vector<8x32xf32>
    %159 = arith.mulf %156, %136 : vector<8x32xf32>
    %160 = arith.mulf %155, %157 : vector<8x32xf32>
    %161 = arith.addf %159, %160 : vector<8x32xf32>
    %162 = math.tanh %161 : vector<8x32xf32>
    %163 = arith.mulf %158, %162 : vector<8x32xf32>
    %164 = arith.index_cast %c5_i32 : i32 to index
    %c0_47 = arith.constant 0 : index
    %c0_48 = arith.constant 0 : index
    %165 = vector.load %arg19[%164, %c0_47, %c0_48] : memref<8x8x32xf32, #tpu.memory_space<vmem>>, vector<1x8x32xf32>
    %166 = vector.shape_cast %165 : vector<1x8x32xf32> to vector<8x32xf32>
    %167 = vector.shape_cast %163 : vector<8x32xf32> to vector<1x8x32xf32>
    tpu.vector_store %arg19[%164, %c0_47, %c0_48], %167 {strides = array<i32>} : memref<8x8x32xf32, #tpu.memory_space<vmem>>, vector<1x8x32xf32>,
    %c6_i32 = arith.constant 6 : i32
    %168 = arith.index_cast %c6_i32 : i32 to index
    %c0_49 = arith.constant 0 : index
    %c0_50 = arith.constant 0 : index
    %169 = vector.load %arg18[%168, %c0_49, %c0_50] : memref<8x8x128xf32, #tpu.memory_space<vmem>>, vector<1x8x128xf32>
    %170 = vector.shape_cast %169 : vector<1x8x128xf32> to vector<8x128xf32>
    %cst_51 = arith.constant dense<0.000000e+00> : vector<8x128xf32>
    %171 = tpu.matmul %163, %3, %cst_51 {dimension_numbers = #tpu.dot_dimension_numbers<[1], [0], [0], [1], [0, 0, 1, 1], [], []>} : vector<8x32xf32>, vector<32x128xf32>, vector<8x128xf32> -> vector<8x128xf32>
    %172 = arith.addf %170, %171 : vector<8x128xf32>
    %173 = math.tanh %172 : vector<8x128xf32>
    %174 = arith.negf %172 : vector<8x128xf32>
    %175 = math.exp %174 : vector<8x128xf32>
    %cst_52 = arith.constant 1.000000e+00 : f32
    %176 = vector.broadcast %cst_52 : f32 to vector<8x128xf32>
    %177 = arith.addf %176, %175 : vector<8x128xf32>
    %178 = arith.divf %176, %177 : vector<8x128xf32>
    %179 = arith.select %15, %173, %178 : vector<8x128xi1>, vector<8x128xf32>
    %180 = vector.extract_strided_slice %179 {offsets = [0, 0], sizes = [8, 32], strides = [1, 1]} : vector<8x128xf32> to vector<8x32xf32>
    %181 = vector.extract_strided_slice %179 {offsets = [0, 32], sizes = [8, 32], strides = [1, 1]} : vector<8x128xf32> to vector<8x32xf32>
    %182 = vector.extract_strided_slice %179 {offsets = [0, 64], sizes = [8, 32], strides = [1, 1]} : vector<8x128xf32> to vector<8x32xf32>
    %183 = vector.extract_strided_slice %179 {offsets = [0, 96], sizes = [8, 32], strides = [1, 1]} : vector<8x128xf32> to vector<8x32xf32>
    %184 = arith.mulf %181, %161 : vector<8x32xf32>
    %185 = arith.mulf %180, %182 : vector<8x32xf32>
    %186 = arith.addf %184, %185 : vector<8x32xf32>
    %187 = math.tanh %186 : vector<8x32xf32>
    %188 = arith.mulf %183, %187 : vector<8x32xf32>
    %189 = arith.index_cast %c6_i32 : i32 to index
    %c0_53 = arith.constant 0 : index
    %c0_54 = arith.constant 0 : index
    %190 = vector.load %arg19[%189, %c0_53, %c0_54] : memref<8x8x32xf32, #tpu.memory_space<vmem>>, vector<1x8x32xf32>
    %191 = vector.shape_cast %190 : vector<1x8x32xf32> to vector<8x32xf32>
    %192 = vector.shape_cast %188 : vector<8x32xf32> to vector<1x8x32xf32>
    tpu.vector_store %arg19[%189, %c0_53, %c0_54], %192 {strides = array<i32>} : memref<8x8x32xf32, #tpu.memory_space<vmem>>, vector<1x8x32xf32>,
    %c7_i32 = arith.constant 7 : i32
    %193 = arith.index_cast %c7_i32 : i32 to index
    %c0_55 = arith.constant 0 : index
    %c0_56 = arith.constant 0 : index
    %194 = vector.load %arg18[%193, %c0_55, %c0_56] : memref<8x8x128xf32, #tpu.memory_space<vmem>>, vector<1x8x128xf32>
    %195 = vector.shape_cast %194 : vector<1x8x128xf32> to vector<8x128xf32>
    %cst_57 = arith.constant dense<0.000000e+00> : vector<8x128xf32>
    %196 = tpu.matmul %188, %3, %cst_57 {dimension_numbers = #tpu.dot_dimension_numbers<[1], [0], [0], [1], [0, 0, 1, 1], [], []>} : vector<8x32xf32>, vector<32x128xf32>, vector<8x128xf32> -> vector<8x128xf32>
    %197 = arith.addf %195, %196 : vector<8x128xf32>
    %198 = math.tanh %197 : vector<8x128xf32>
    %199 = arith.negf %197 : vector<8x128xf32>
    %200 = math.exp %199 : vector<8x128xf32>
    %cst_58 = arith.constant 1.000000e+00 : f32
    %201 = vector.broadcast %cst_58 : f32 to vector<8x128xf32>
    %202 = arith.addf %201, %200 : vector<8x128xf32>
    %203 = arith.divf %201, %202 : vector<8x128xf32>
    %204 = arith.select %15, %198, %203 : vector<8x128xi1>, vector<8x128xf32>
    %205 = vector.extract_strided_slice %204 {offsets = [0, 0], sizes = [8, 32], strides = [1, 1]} : vector<8x128xf32> to vector<8x32xf32>
    %206 = vector.extract_strided_slice %204 {offsets = [0, 32], sizes = [8, 32], strides = [1, 1]} : vector<8x128xf32> to vector<8x32xf32>
    %207 = vector.extract_strided_slice %204 {offsets = [0, 64], sizes = [8, 32], strides = [1, 1]} : vector<8x128xf32> to vector<8x32xf32>
    %208 = vector.extract_strided_slice %204 {offsets = [0, 96], sizes = [8, 32], strides = [1, 1]} : vector<8x128xf32> to vector<8x32xf32>
    %209 = arith.mulf %206, %186 : vector<8x32xf32>
    %210 = arith.mulf %205, %207 : vector<8x32xf32>
    %211 = arith.addf %209, %210 : vector<8x32xf32>
    %212 = math.tanh %211 : vector<8x32xf32>
    %213 = arith.mulf %208, %212 : vector<8x32xf32>
    %214 = arith.index_cast %c7_i32 : i32 to index
    %c0_59 = arith.constant 0 : index
    %c0_60 = arith.constant 0 : index
    %215 = vector.load %arg19[%214, %c0_59, %c0_60] : memref<8x8x32xf32, #tpu.memory_space<vmem>>, vector<1x8x32xf32>
    %216 = vector.shape_cast %215 : vector<1x8x32xf32> to vector<8x32xf32>
    %217 = vector.shape_cast %213 : vector<8x32xf32> to vector<1x8x32xf32>
    tpu.vector_store %arg19[%214, %c0_59, %c0_60], %217 {strides = array<i32>} : memref<8x8x32xf32, #tpu.memory_space<vmem>>, vector<1x8x32xf32>,
    %c8_i32 = arith.constant 8 : i32
    %c0_61 = arith.constant 0 : index
    %c0_62 = arith.constant 0 : index
    %c0_63 = arith.constant 0 : index
    %218 = vector.load %arg19[%c0_61, %c0_62, %c0_63] : memref<8x8x32xf32, #tpu.memory_space<vmem>>, vector<8x8x32xf32>
    %219 = vector.shape_cast %218 : vector<8x8x32xf32> to vector<64x32xf32>
    %c0_64 = arith.constant 0 : index
    %c0_65 = arith.constant 0 : index
    %220 = vector.load %arg4[%c0_64, %c0_65] : memref<32x128xf32, #tpu.memory_space<vmem>>, vector<32x128xf32>
    %c0_66 = arith.constant 0 : index
    %c0_67 = arith.constant 0 : index
    %221 = vector.load %arg5[%c0_66, %c0_67] : memref<32x128xf32, #tpu.memory_space<vmem>>, vector<32x128xf32>
    %c0_68 = arith.constant 0 : index
    %c0_69 = arith.constant 0 : index
    %222 = vector.load %arg6[%c0_68, %c0_69] : memref<1x128xf32, #tpu.memory_space<vmem>>, vector<1x128xf32>
    %cst_70 = arith.constant dense<0.000000e+00> : vector<64x128xf32>
    %223 = tpu.matmul %219, %220, %cst_70 {dimension_numbers = #tpu.dot_dimension_numbers<[1], [0], [0], [1], [0, 0, 1, 1], [], []>} : vector<64x32xf32>, vector<32x128xf32>, vector<64x128xf32> -> vector<64x128xf32>
    %224 = vector.broadcast %222 : vector<1x128xf32> to vector<64x128xf32>
    %225 = arith.addf %223, %224 : vector<64x128xf32>
    %226 = vector.shape_cast %225 : vector<64x128xf32> to vector<8x8x128xf32>
    %c0_71 = arith.constant 0 : index
    %c0_72 = arith.constant 0 : index
    %c0_73 = arith.constant 0 : index
    %227 = vector.load %arg18[%c0_71, %c0_72, %c0_73] : memref<8x8x128xf32, #tpu.memory_space<vmem>>, vector<8x8x128xf32>
    tpu.vector_store %arg18[%c0_71, %c0_72, %c0_73], %226 {strides = array<i32>} : memref<8x8x128xf32, #tpu.memory_space<vmem>>, vector<8x8x128xf32>,
    %228 = tpu.iota {dimensions = array<i32: 1>} : vector<8x128xi32>
    %c64_i32_74 = arith.constant 64 : i32
    %229 = vector.broadcast %c64_i32_74 : i32 to vector<8x128xi32>
    %230 = arith.cmpi sge, %228, %229 : vector<8x128xi32>
    %c96_i32_75 = arith.constant 96 : i32
    %231 = vector.broadcast %c96_i32_75 : i32 to vector<8x128xi32>
    %232 = arith.cmpi slt, %228, %231 : vector<8x128xi32>
    %233 = arith.andi %230, %232 : vector<8x128xi1>
    %cst_76 = arith.constant 0.000000e+00 : f32
    %234 = vector.broadcast %cst_76 : f32 to vector<8x32xf32>
    %cst_77 = arith.constant 0.000000e+00 : f32
    %235 = vector.broadcast %cst_77 : f32 to vector<8x32xf32>
    %c0_i32_78 = arith.constant 0 : i32
    %236 = arith.index_cast %c0_i32_78 : i32 to index
    %c0_79 = arith.constant 0 : index
    %c0_80 = arith.constant 0 : index
    %237 = vector.load %arg18[%236, %c0_79, %c0_80] : memref<8x8x128xf32, #tpu.memory_space<vmem>>, vector<1x8x128xf32>
    %238 = vector.shape_cast %237 : vector<1x8x128xf32> to vector<8x128xf32>
    %cst_81 = arith.constant dense<0.000000e+00> : vector<8x128xf32>
    %239 = tpu.matmul %234, %221, %cst_81 {dimension_numbers = #tpu.dot_dimension_numbers<[1], [0], [0], [1], [0, 0, 1, 1], [], []>} : vector<8x32xf32>, vector<32x128xf32>, vector<8x128xf32> -> vector<8x128xf32>
    %240 = arith.addf %238, %239 : vector<8x128xf32>
    %241 = math.tanh %240 : vector<8x128xf32>
    %242 = arith.negf %240 : vector<8x128xf32>
    %243 = math.exp %242 : vector<8x128xf32>
    %cst_82 = arith.constant 1.000000e+00 : f32
    %244 = vector.broadcast %cst_82 : f32 to vector<8x128xf32>
    %245 = arith.addf %244, %243 : vector<8x128xf32>
    %246 = arith.divf %244, %245 : vector<8x128xf32>
    %247 = arith.select %233, %241, %246 : vector<8x128xi1>, vector<8x128xf32>
    %248 = vector.extract_strided_slice %247 {offsets = [0, 0], sizes = [8, 32], strides = [1, 1]} : vector<8x128xf32> to vector<8x32xf32>
    %249 = vector.extract_strided_slice %247 {offsets = [0, 32], sizes = [8, 32], strides = [1, 1]} : vector<8x128xf32> to vector<8x32xf32>
    %250 = vector.extract_strided_slice %247 {offsets = [0, 64], sizes = [8, 32], strides = [1, 1]} : vector<8x128xf32> to vector<8x32xf32>
    %251 = vector.extract_strided_slice %247 {offsets = [0, 96], sizes = [8, 32], strides = [1, 1]} : vector<8x128xf32> to vector<8x32xf32>
    %252 = arith.mulf %249, %235 : vector<8x32xf32>
    %253 = arith.mulf %248, %250 : vector<8x32xf32>
    %254 = arith.addf %252, %253 : vector<8x32xf32>
    %255 = math.tanh %254 : vector<8x32xf32>
    %256 = arith.mulf %251, %255 : vector<8x32xf32>
    %257 = arith.index_cast %c0_i32_78 : i32 to index
    %c0_83 = arith.constant 0 : index
    %c0_84 = arith.constant 0 : index
    %258 = vector.load %arg19[%257, %c0_83, %c0_84] : memref<8x8x32xf32, #tpu.memory_space<vmem>>, vector<1x8x32xf32>
    %259 = vector.shape_cast %258 : vector<1x8x32xf32> to vector<8x32xf32>
    %260 = vector.shape_cast %256 : vector<8x32xf32> to vector<1x8x32xf32>
    tpu.vector_store %arg19[%257, %c0_83, %c0_84], %260 {strides = array<i32>} : memref<8x8x32xf32, #tpu.memory_space<vmem>>, vector<1x8x32xf32>,
    %c1_i32_85 = arith.constant 1 : i32
    %261 = arith.index_cast %c1_i32_85 : i32 to index
    %c0_86 = arith.constant 0 : index
    %c0_87 = arith.constant 0 : index
    %262 = vector.load %arg18[%261, %c0_86, %c0_87] : memref<8x8x128xf32, #tpu.memory_space<vmem>>, vector<1x8x128xf32>
    %263 = vector.shape_cast %262 : vector<1x8x128xf32> to vector<8x128xf32>
    %cst_88 = arith.constant dense<0.000000e+00> : vector<8x128xf32>
    %264 = tpu.matmul %256, %221, %cst_88 {dimension_numbers = #tpu.dot_dimension_numbers<[1], [0], [0], [1], [0, 0, 1, 1], [], []>} : vector<8x32xf32>, vector<32x128xf32>, vector<8x128xf32> -> vector<8x128xf32>
    %265 = arith.addf %263, %264 : vector<8x128xf32>
    %266 = math.tanh %265 : vector<8x128xf32>
    %267 = arith.negf %265 : vector<8x128xf32>
    %268 = math.exp %267 : vector<8x128xf32>
    %cst_89 = arith.constant 1.000000e+00 : f32
    %269 = vector.broadcast %cst_89 : f32 to vector<8x128xf32>
    %270 = arith.addf %269, %268 : vector<8x128xf32>
    %271 = arith.divf %269, %270 : vector<8x128xf32>
    %272 = arith.select %233, %266, %271 : vector<8x128xi1>, vector<8x128xf32>
    %273 = vector.extract_strided_slice %272 {offsets = [0, 0], sizes = [8, 32], strides = [1, 1]} : vector<8x128xf32> to vector<8x32xf32>
    %274 = vector.extract_strided_slice %272 {offsets = [0, 32], sizes = [8, 32], strides = [1, 1]} : vector<8x128xf32> to vector<8x32xf32>
    %275 = vector.extract_strided_slice %272 {offsets = [0, 64], sizes = [8, 32], strides = [1, 1]} : vector<8x128xf32> to vector<8x32xf32>
    %276 = vector.extract_strided_slice %272 {offsets = [0, 96], sizes = [8, 32], strides = [1, 1]} : vector<8x128xf32> to vector<8x32xf32>
    %277 = arith.mulf %274, %254 : vector<8x32xf32>
    %278 = arith.mulf %273, %275 : vector<8x32xf32>
    %279 = arith.addf %277, %278 : vector<8x32xf32>
    %280 = math.tanh %279 : vector<8x32xf32>
    %281 = arith.mulf %276, %280 : vector<8x32xf32>
    %282 = arith.index_cast %c1_i32_85 : i32 to index
    %c0_90 = arith.constant 0 : index
    %c0_91 = arith.constant 0 : index
    %283 = vector.load %arg19[%282, %c0_90, %c0_91] : memref<8x8x32xf32, #tpu.memory_space<vmem>>, vector<1x8x32xf32>
    %284 = vector.shape_cast %283 : vector<1x8x32xf32> to vector<8x32xf32>
    %285 = vector.shape_cast %281 : vector<8x32xf32> to vector<1x8x32xf32>
    tpu.vector_store %arg19[%282, %c0_90, %c0_91], %285 {strides = array<i32>} : memref<8x8x32xf32, #tpu.memory_space<vmem>>, vector<1x8x32xf32>,
    %c2_i32_92 = arith.constant 2 : i32
    %286 = arith.index_cast %c2_i32_92 : i32 to index
    %c0_93 = arith.constant 0 : index
    %c0_94 = arith.constant 0 : index
    %287 = vector.load %arg18[%286, %c0_93, %c0_94] : memref<8x8x128xf32, #tpu.memory_space<vmem>>, vector<1x8x128xf32>
    %288 = vector.shape_cast %287 : vector<1x8x128xf32> to vector<8x128xf32>
    %cst_95 = arith.constant dense<0.000000e+00> : vector<8x128xf32>
    %289 = tpu.matmul %281, %221, %cst_95 {dimension_numbers = #tpu.dot_dimension_numbers<[1], [0], [0], [1], [0, 0, 1, 1], [], []>} : vector<8x32xf32>, vector<32x128xf32>, vector<8x128xf32> -> vector<8x128xf32>
    %290 = arith.addf %288, %289 : vector<8x128xf32>
    %291 = math.tanh %290 : vector<8x128xf32>
    %292 = arith.negf %290 : vector<8x128xf32>
    %293 = math.exp %292 : vector<8x128xf32>
    %cst_96 = arith.constant 1.000000e+00 : f32
    %294 = vector.broadcast %cst_96 : f32 to vector<8x128xf32>
    %295 = arith.addf %294, %293 : vector<8x128xf32>
    %296 = arith.divf %294, %295 : vector<8x128xf32>
    %297 = arith.select %233, %291, %296 : vector<8x128xi1>, vector<8x128xf32>
    %298 = vector.extract_strided_slice %297 {offsets = [0, 0], sizes = [8, 32], strides = [1, 1]} : vector<8x128xf32> to vector<8x32xf32>
    %299 = vector.extract_strided_slice %297 {offsets = [0, 32], sizes = [8, 32], strides = [1, 1]} : vector<8x128xf32> to vector<8x32xf32>
    %300 = vector.extract_strided_slice %297 {offsets = [0, 64], sizes = [8, 32], strides = [1, 1]} : vector<8x128xf32> to vector<8x32xf32>
    %301 = vector.extract_strided_slice %297 {offsets = [0, 96], sizes = [8, 32], strides = [1, 1]} : vector<8x128xf32> to vector<8x32xf32>
    %302 = arith.mulf %299, %279 : vector<8x32xf32>
    %303 = arith.mulf %298, %300 : vector<8x32xf32>
    %304 = arith.addf %302, %303 : vector<8x32xf32>
    %305 = math.tanh %304 : vector<8x32xf32>
    %306 = arith.mulf %301, %305 : vector<8x32xf32>
    %307 = arith.index_cast %c2_i32_92 : i32 to index
    %c0_97 = arith.constant 0 : index
    %c0_98 = arith.constant 0 : index
    %308 = vector.load %arg19[%307, %c0_97, %c0_98] : memref<8x8x32xf32, #tpu.memory_space<vmem>>, vector<1x8x32xf32>
    %309 = vector.shape_cast %308 : vector<1x8x32xf32> to vector<8x32xf32>
    %310 = vector.shape_cast %306 : vector<8x32xf32> to vector<1x8x32xf32>
    tpu.vector_store %arg19[%307, %c0_97, %c0_98], %310 {strides = array<i32>} : memref<8x8x32xf32, #tpu.memory_space<vmem>>, vector<1x8x32xf32>,
    %c3_i32_99 = arith.constant 3 : i32
    %311 = arith.index_cast %c3_i32_99 : i32 to index
    %c0_100 = arith.constant 0 : index
    %c0_101 = arith.constant 0 : index
    %312 = vector.load %arg18[%311, %c0_100, %c0_101] : memref<8x8x128xf32, #tpu.memory_space<vmem>>, vector<1x8x128xf32>
    %313 = vector.shape_cast %312 : vector<1x8x128xf32> to vector<8x128xf32>
    %cst_102 = arith.constant dense<0.000000e+00> : vector<8x128xf32>
    %314 = tpu.matmul %306, %221, %cst_102 {dimension_numbers = #tpu.dot_dimension_numbers<[1], [0], [0], [1], [0, 0, 1, 1], [], []>} : vector<8x32xf32>, vector<32x128xf32>, vector<8x128xf32> -> vector<8x128xf32>
    %315 = arith.addf %313, %314 : vector<8x128xf32>
    %316 = math.tanh %315 : vector<8x128xf32>
    %317 = arith.negf %315 : vector<8x128xf32>
    %318 = math.exp %317 : vector<8x128xf32>
    %cst_103 = arith.constant 1.000000e+00 : f32
    %319 = vector.broadcast %cst_103 : f32 to vector<8x128xf32>
    %320 = arith.addf %319, %318 : vector<8x128xf32>
    %321 = arith.divf %319, %320 : vector<8x128xf32>
    %322 = arith.select %233, %316, %321 : vector<8x128xi1>, vector<8x128xf32>
    %323 = vector.extract_strided_slice %322 {offsets = [0, 0], sizes = [8, 32], strides = [1, 1]} : vector<8x128xf32> to vector<8x32xf32>
    %324 = vector.extract_strided_slice %322 {offsets = [0, 32], sizes = [8, 32], strides = [1, 1]} : vector<8x128xf32> to vector<8x32xf32>
    %325 = vector.extract_strided_slice %322 {offsets = [0, 64], sizes = [8, 32], strides = [1, 1]} : vector<8x128xf32> to vector<8x32xf32>
    %326 = vector.extract_strided_slice %322 {offsets = [0, 96], sizes = [8, 32], strides = [1, 1]} : vector<8x128xf32> to vector<8x32xf32>
    %327 = arith.mulf %324, %304 : vector<8x32xf32>
    %328 = arith.mulf %323, %325 : vector<8x32xf32>
    %329 = arith.addf %327, %328 : vector<8x32xf32>
    %330 = math.tanh %329 : vector<8x32xf32>
    %331 = arith.mulf %326, %330 : vector<8x32xf32>
    %332 = arith.index_cast %c3_i32_99 : i32 to index
    %c0_104 = arith.constant 0 : index
    %c0_105 = arith.constant 0 : index
    %333 = vector.load %arg19[%332, %c0_104, %c0_105] : memref<8x8x32xf32, #tpu.memory_space<vmem>>, vector<1x8x32xf32>
    %334 = vector.shape_cast %333 : vector<1x8x32xf32> to vector<8x32xf32>
    %335 = vector.shape_cast %331 : vector<8x32xf32> to vector<1x8x32xf32>
    tpu.vector_store %arg19[%332, %c0_104, %c0_105], %335 {strides = array<i32>} : memref<8x8x32xf32, #tpu.memory_space<vmem>>, vector<1x8x32xf32>,
    %c4_i32_106 = arith.constant 4 : i32
    %336 = arith.index_cast %c4_i32_106 : i32 to index
    %c0_107 = arith.constant 0 : index
    %c0_108 = arith.constant 0 : index
    %337 = vector.load %arg18[%336, %c0_107, %c0_108] : memref<8x8x128xf32, #tpu.memory_space<vmem>>, vector<1x8x128xf32>
    %338 = vector.shape_cast %337 : vector<1x8x128xf32> to vector<8x128xf32>
    %cst_109 = arith.constant dense<0.000000e+00> : vector<8x128xf32>
    %339 = tpu.matmul %331, %221, %cst_109 {dimension_numbers = #tpu.dot_dimension_numbers<[1], [0], [0], [1], [0, 0, 1, 1], [], []>} : vector<8x32xf32>, vector<32x128xf32>, vector<8x128xf32> -> vector<8x128xf32>
    %340 = arith.addf %338, %339 : vector<8x128xf32>
    %341 = math.tanh %340 : vector<8x128xf32>
    %342 = arith.negf %340 : vector<8x128xf32>
    %343 = math.exp %342 : vector<8x128xf32>
    %cst_110 = arith.constant 1.000000e+00 : f32
    %344 = vector.broadcast %cst_110 : f32 to vector<8x128xf32>
    %345 = arith.addf %344, %343 : vector<8x128xf32>
    %346 = arith.divf %344, %345 : vector<8x128xf32>
    %347 = arith.select %233, %341, %346 : vector<8x128xi1>, vector<8x128xf32>
    %348 = vector.extract_strided_slice %347 {offsets = [0, 0], sizes = [8, 32], strides = [1, 1]} : vector<8x128xf32> to vector<8x32xf32>
    %349 = vector.extract_strided_slice %347 {offsets = [0, 32], sizes = [8, 32], strides = [1, 1]} : vector<8x128xf32> to vector<8x32xf32>
    %350 = vector.extract_strided_slice %347 {offsets = [0, 64], sizes = [8, 32], strides = [1, 1]} : vector<8x128xf32> to vector<8x32xf32>
    %351 = vector.extract_strided_slice %347 {offsets = [0, 96], sizes = [8, 32], strides = [1, 1]} : vector<8x128xf32> to vector<8x32xf32>
    %352 = arith.mulf %349, %329 : vector<8x32xf32>
    %353 = arith.mulf %348, %350 : vector<8x32xf32>
    %354 = arith.addf %352, %353 : vector<8x32xf32>
    %355 = math.tanh %354 : vector<8x32xf32>
    %356 = arith.mulf %351, %355 : vector<8x32xf32>
    %357 = arith.index_cast %c4_i32_106 : i32 to index
    %c0_111 = arith.constant 0 : index
    %c0_112 = arith.constant 0 : index
    %358 = vector.load %arg19[%357, %c0_111, %c0_112] : memref<8x8x32xf32, #tpu.memory_space<vmem>>, vector<1x8x32xf32>
    %359 = vector.shape_cast %358 : vector<1x8x32xf32> to vector<8x32xf32>
    %360 = vector.shape_cast %356 : vector<8x32xf32> to vector<1x8x32xf32>
    tpu.vector_store %arg19[%357, %c0_111, %c0_112], %360 {strides = array<i32>} : memref<8x8x32xf32, #tpu.memory_space<vmem>>, vector<1x8x32xf32>,
    %c5_i32_113 = arith.constant 5 : i32
    %361 = arith.index_cast %c5_i32_113 : i32 to index
    %c0_114 = arith.constant 0 : index
    %c0_115 = arith.constant 0 : index
    %362 = vector.load %arg18[%361, %c0_114, %c0_115] : memref<8x8x128xf32, #tpu.memory_space<vmem>>, vector<1x8x128xf32>
    %363 = vector.shape_cast %362 : vector<1x8x128xf32> to vector<8x128xf32>
    %cst_116 = arith.constant dense<0.000000e+00> : vector<8x128xf32>
    %364 = tpu.matmul %356, %221, %cst_116 {dimension_numbers = #tpu.dot_dimension_numbers<[1], [0], [0], [1], [0, 0, 1, 1], [], []>} : vector<8x32xf32>, vector<32x128xf32>, vector<8x128xf32> -> vector<8x128xf32>
    %365 = arith.addf %363, %364 : vector<8x128xf32>
    %366 = math.tanh %365 : vector<8x128xf32>
    %367 = arith.negf %365 : vector<8x128xf32>
    %368 = math.exp %367 : vector<8x128xf32>
    %cst_117 = arith.constant 1.000000e+00 : f32
    %369 = vector.broadcast %cst_117 : f32 to vector<8x128xf32>
    %370 = arith.addf %369, %368 : vector<8x128xf32>
    %371 = arith.divf %369, %370 : vector<8x128xf32>
    %372 = arith.select %233, %366, %371 : vector<8x128xi1>, vector<8x128xf32>
    %373 = vector.extract_strided_slice %372 {offsets = [0, 0], sizes = [8, 32], strides = [1, 1]} : vector<8x128xf32> to vector<8x32xf32>
    %374 = vector.extract_strided_slice %372 {offsets = [0, 32], sizes = [8, 32], strides = [1, 1]} : vector<8x128xf32> to vector<8x32xf32>
    %375 = vector.extract_strided_slice %372 {offsets = [0, 64], sizes = [8, 32], strides = [1, 1]} : vector<8x128xf32> to vector<8x32xf32>
    %376 = vector.extract_strided_slice %372 {offsets = [0, 96], sizes = [8, 32], strides = [1, 1]} : vector<8x128xf32> to vector<8x32xf32>
    %377 = arith.mulf %374, %354 : vector<8x32xf32>
    %378 = arith.mulf %373, %375 : vector<8x32xf32>
    %379 = arith.addf %377, %378 : vector<8x32xf32>
    %380 = math.tanh %379 : vector<8x32xf32>
    %381 = arith.mulf %376, %380 : vector<8x32xf32>
    %382 = arith.index_cast %c5_i32_113 : i32 to index
    %c0_118 = arith.constant 0 : index
    %c0_119 = arith.constant 0 : index
    %383 = vector.load %arg19[%382, %c0_118, %c0_119] : memref<8x8x32xf32, #tpu.memory_space<vmem>>, vector<1x8x32xf32>
    %384 = vector.shape_cast %383 : vector<1x8x32xf32> to vector<8x32xf32>
    %385 = vector.shape_cast %381 : vector<8x32xf32> to vector<1x8x32xf32>
    tpu.vector_store %arg19[%382, %c0_118, %c0_119], %385 {strides = array<i32>} : memref<8x8x32xf32, #tpu.memory_space<vmem>>, vector<1x8x32xf32>,
    %c6_i32_120 = arith.constant 6 : i32
    %386 = arith.index_cast %c6_i32_120 : i32 to index
    %c0_121 = arith.constant 0 : index
    %c0_122 = arith.constant 0 : index
    %387 = vector.load %arg18[%386, %c0_121, %c0_122] : memref<8x8x128xf32, #tpu.memory_space<vmem>>, vector<1x8x128xf32>
    %388 = vector.shape_cast %387 : vector<1x8x128xf32> to vector<8x128xf32>
    %cst_123 = arith.constant dense<0.000000e+00> : vector<8x128xf32>
    %389 = tpu.matmul %381, %221, %cst_123 {dimension_numbers = #tpu.dot_dimension_numbers<[1], [0], [0], [1], [0, 0, 1, 1], [], []>} : vector<8x32xf32>, vector<32x128xf32>, vector<8x128xf32> -> vector<8x128xf32>
    %390 = arith.addf %388, %389 : vector<8x128xf32>
    %391 = math.tanh %390 : vector<8x128xf32>
    %392 = arith.negf %390 : vector<8x128xf32>
    %393 = math.exp %392 : vector<8x128xf32>
    %cst_124 = arith.constant 1.000000e+00 : f32
    %394 = vector.broadcast %cst_124 : f32 to vector<8x128xf32>
    %395 = arith.addf %394, %393 : vector<8x128xf32>
    %396 = arith.divf %394, %395 : vector<8x128xf32>
    %397 = arith.select %233, %391, %396 : vector<8x128xi1>, vector<8x128xf32>
    %398 = vector.extract_strided_slice %397 {offsets = [0, 0], sizes = [8, 32], strides = [1, 1]} : vector<8x128xf32> to vector<8x32xf32>
    %399 = vector.extract_strided_slice %397 {offsets = [0, 32], sizes = [8, 32], strides = [1, 1]} : vector<8x128xf32> to vector<8x32xf32>
    %400 = vector.extract_strided_slice %397 {offsets = [0, 64], sizes = [8, 32], strides = [1, 1]} : vector<8x128xf32> to vector<8x32xf32>
    %401 = vector.extract_strided_slice %397 {offsets = [0, 96], sizes = [8, 32], strides = [1, 1]} : vector<8x128xf32> to vector<8x32xf32>
    %402 = arith.mulf %399, %379 : vector<8x32xf32>
    %403 = arith.mulf %398, %400 : vector<8x32xf32>
    %404 = arith.addf %402, %403 : vector<8x32xf32>
    %405 = math.tanh %404 : vector<8x32xf32>
    %406 = arith.mulf %401, %405 : vector<8x32xf32>
    %407 = arith.index_cast %c6_i32_120 : i32 to index
    %c0_125 = arith.constant 0 : index
    %c0_126 = arith.constant 0 : index
    %408 = vector.load %arg19[%407, %c0_125, %c0_126] : memref<8x8x32xf32, #tpu.memory_space<vmem>>, vector<1x8x32xf32>
    %409 = vector.shape_cast %408 : vector<1x8x32xf32> to vector<8x32xf32>
    %410 = vector.shape_cast %406 : vector<8x32xf32> to vector<1x8x32xf32>
    tpu.vector_store %arg19[%407, %c0_125, %c0_126], %410 {strides = array<i32>} : memref<8x8x32xf32, #tpu.memory_space<vmem>>, vector<1x8x32xf32>,
    %c7_i32_127 = arith.constant 7 : i32
    %411 = arith.index_cast %c7_i32_127 : i32 to index
    %c0_128 = arith.constant 0 : index
    %c0_129 = arith.constant 0 : index
    %412 = vector.load %arg18[%411, %c0_128, %c0_129] : memref<8x8x128xf32, #tpu.memory_space<vmem>>, vector<1x8x128xf32>
    %413 = vector.shape_cast %412 : vector<1x8x128xf32> to vector<8x128xf32>
    %cst_130 = arith.constant dense<0.000000e+00> : vector<8x128xf32>
    %414 = tpu.matmul %406, %221, %cst_130 {dimension_numbers = #tpu.dot_dimension_numbers<[1], [0], [0], [1], [0, 0, 1, 1], [], []>} : vector<8x32xf32>, vector<32x128xf32>, vector<8x128xf32> -> vector<8x128xf32>
    %415 = arith.addf %413, %414 : vector<8x128xf32>
    %416 = math.tanh %415 : vector<8x128xf32>
    %417 = arith.negf %415 : vector<8x128xf32>
    %418 = math.exp %417 : vector<8x128xf32>
    %cst_131 = arith.constant 1.000000e+00 : f32
    %419 = vector.broadcast %cst_131 : f32 to vector<8x128xf32>
    %420 = arith.addf %419, %418 : vector<8x128xf32>
    %421 = arith.divf %419, %420 : vector<8x128xf32>
    %422 = arith.select %233, %416, %421 : vector<8x128xi1>, vector<8x128xf32>
    %423 = vector.extract_strided_slice %422 {offsets = [0, 0], sizes = [8, 32], strides = [1, 1]} : vector<8x128xf32> to vector<8x32xf32>
    %424 = vector.extract_strided_slice %422 {offsets = [0, 32], sizes = [8, 32], strides = [1, 1]} : vector<8x128xf32> to vector<8x32xf32>
    %425 = vector.extract_strided_slice %422 {offsets = [0, 64], sizes = [8, 32], strides = [1, 1]} : vector<8x128xf32> to vector<8x32xf32>
    %426 = vector.extract_strided_slice %422 {offsets = [0, 96], sizes = [8, 32], strides = [1, 1]} : vector<8x128xf32> to vector<8x32xf32>
    %427 = arith.mulf %424, %404 : vector<8x32xf32>
    %428 = arith.mulf %423, %425 : vector<8x32xf32>
    %429 = arith.addf %427, %428 : vector<8x32xf32>
    %430 = math.tanh %429 : vector<8x32xf32>
    %431 = arith.mulf %426, %430 : vector<8x32xf32>
    %432 = arith.index_cast %c7_i32_127 : i32 to index
    %c0_132 = arith.constant 0 : index
    %c0_133 = arith.constant 0 : index
    %433 = vector.load %arg19[%432, %c0_132, %c0_133] : memref<8x8x32xf32, #tpu.memory_space<vmem>>, vector<1x8x32xf32>
    %434 = vector.shape_cast %433 : vector<1x8x32xf32> to vector<8x32xf32>
    %435 = vector.shape_cast %431 : vector<8x32xf32> to vector<1x8x32xf32>
    tpu.vector_store %arg19[%432, %c0_132, %c0_133], %435 {strides = array<i32>} : memref<8x8x32xf32, #tpu.memory_space<vmem>>, vector<1x8x32xf32>,
    %c8_i32_134 = arith.constant 8 : i32
    %c0_135 = arith.constant 0 : index
    %c0_136 = arith.constant 0 : index
    %c0_137 = arith.constant 0 : index
    %436 = vector.load %arg19[%c0_135, %c0_136, %c0_137] : memref<8x8x32xf32, #tpu.memory_space<vmem>>, vector<8x8x32xf32>
    %437 = vector.shape_cast %436 : vector<8x8x32xf32> to vector<64x32xf32>
    %c0_138 = arith.constant 0 : index
    %c0_139 = arith.constant 0 : index
    %438 = vector.load %arg7[%c0_138, %c0_139] : memref<32x384xf32, #tpu.memory_space<vmem>>, vector<32x384xf32>
    %c0_140 = arith.constant 0 : index
    %c0_141 = arith.constant 0 : index
    %439 = vector.load %arg8[%c0_140, %c0_141] : memref<96x384xf32, #tpu.memory_space<vmem>>, vector<96x384xf32>
    %c0_142 = arith.constant 0 : index
    %c0_143 = arith.constant 0 : index
    %440 = vector.load %arg9[%c0_142, %c0_143] : memref<1x384xf32, #tpu.memory_space<vmem>>, vector<1x384xf32>
    %cst_144 = arith.constant dense<0.000000e+00> : vector<64x384xf32>
    %441 = tpu.matmul %437, %438, %cst_144 {dimension_numbers = #tpu.dot_dimension_numbers<[1], [0], [0], [1], [0, 0, 1, 1], [], []>} : vector<64x32xf32>, vector<32x384xf32>, vector<64x384xf32> -> vector<64x384xf32>
    %442 = vector.broadcast %440 : vector<1x384xf32> to vector<64x384xf32>
    %443 = arith.addf %441, %442 : vector<64x384xf32>
    %444 = vector.shape_cast %443 : vector<64x384xf32> to vector<8x8x384xf32>
    %c0_145 = arith.constant 0 : index
    %c0_146 = arith.constant 0 : index
    %c0_147 = arith.constant 0 : index
    %445 = vector.load %arg20[%c0_145, %c0_146, %c0_147] : memref<8x8x384xf32, #tpu.memory_space<vmem>>, vector<8x8x384xf32>
    tpu.vector_store %arg20[%c0_145, %c0_146, %c0_147], %444 {strides = array<i32>} : memref<8x8x384xf32, #tpu.memory_space<vmem>>, vector<8x8x384xf32>,
    %446 = tpu.iota {dimensions = array<i32: 1>} : vector<8x384xi32>
    %c192_i32 = arith.constant 192 : i32
    %447 = vector.broadcast %c192_i32 : i32 to vector<8x384xi32>
    %448 = arith.cmpi sge, %446, %447 : vector<8x384xi32>
    %c288_i32 = arith.constant 288 : i32
    %449 = vector.broadcast %c288_i32 : i32 to vector<8x384xi32>
    %450 = arith.cmpi slt, %446, %449 : vector<8x384xi32>
    %451 = arith.andi %448, %450 : vector<8x384xi1>
    %cst_148 = arith.constant 0.000000e+00 : f32
    %452 = vector.broadcast %cst_148 : f32 to vector<8x96xf32>
    %cst_149 = arith.constant 0.000000e+00 : f32
    %453 = vector.broadcast %cst_149 : f32 to vector<8x96xf32>
    %c0_i32_150 = arith.constant 0 : i32
    %454 = arith.index_cast %c0_i32_150 : i32 to index
    %c0_151 = arith.constant 0 : index
    %c0_152 = arith.constant 0 : index
    %455 = vector.load %arg20[%454, %c0_151, %c0_152] : memref<8x8x384xf32, #tpu.memory_space<vmem>>, vector<1x8x384xf32>
    %456 = vector.shape_cast %455 : vector<1x8x384xf32> to vector<8x384xf32>
    %cst_153 = arith.constant dense<0.000000e+00> : vector<8x384xf32>
    %457 = tpu.matmul %452, %439, %cst_153 {dimension_numbers = #tpu.dot_dimension_numbers<[1], [0], [0], [1], [0, 0, 1, 1], [], []>} : vector<8x96xf32>, vector<96x384xf32>, vector<8x384xf32> -> vector<8x384xf32>
    %458 = arith.addf %456, %457 : vector<8x384xf32>
    %459 = math.tanh %458 : vector<8x384xf32>
    %460 = arith.negf %458 : vector<8x384xf32>
    %461 = math.exp %460 : vector<8x384xf32>
    %cst_154 = arith.constant 1.000000e+00 : f32
    %462 = vector.broadcast %cst_154 : f32 to vector<8x384xf32>
    %463 = arith.addf %462, %461 : vector<8x384xf32>
    %464 = arith.divf %462, %463 : vector<8x384xf32>
    %465 = arith.select %451, %459, %464 : vector<8x384xi1>, vector<8x384xf32>
    %466 = vector.extract_strided_slice %465 {offsets = [0, 0], sizes = [8, 96], strides = [1, 1]} : vector<8x384xf32> to vector<8x96xf32>
    %467 = vector.extract_strided_slice %465 {offsets = [0, 96], sizes = [8, 96], strides = [1, 1]} : vector<8x384xf32> to vector<8x96xf32>
    %468 = vector.extract_strided_slice %465 {offsets = [0, 192], sizes = [8, 96], strides = [1, 1]} : vector<8x384xf32> to vector<8x96xf32>
    %469 = vector.extract_strided_slice %465 {offsets = [0, 288], sizes = [8, 96], strides = [1, 1]} : vector<8x384xf32> to vector<8x96xf32>
    %470 = arith.mulf %467, %453 : vector<8x96xf32>
    %471 = arith.mulf %466, %468 : vector<8x96xf32>
    %472 = arith.addf %470, %471 : vector<8x96xf32>
    %473 = math.tanh %472 : vector<8x96xf32>
    %474 = arith.mulf %469, %473 : vector<8x96xf32>
    %475 = arith.index_cast %c0_i32_150 : i32 to index
    %c0_155 = arith.constant 0 : index
    %c0_156 = arith.constant 0 : index
    %476 = vector.load %arg21[%475, %c0_155, %c0_156] : memref<8x8x96xf32, #tpu.memory_space<vmem>>, vector<1x8x96xf32>
    %477 = vector.shape_cast %476 : vector<1x8x96xf32> to vector<8x96xf32>
    %478 = vector.shape_cast %474 : vector<8x96xf32> to vector<1x8x96xf32>
    tpu.vector_store %arg21[%475, %c0_155, %c0_156], %478 {strides = array<i32>} : memref<8x8x96xf32, #tpu.memory_space<vmem>>, vector<1x8x96xf32>,
    %c1_i32_157 = arith.constant 1 : i32
    %479 = arith.index_cast %c1_i32_157 : i32 to index
    %c0_158 = arith.constant 0 : index
    %c0_159 = arith.constant 0 : index
    %480 = vector.load %arg20[%479, %c0_158, %c0_159] : memref<8x8x384xf32, #tpu.memory_space<vmem>>, vector<1x8x384xf32>
    %481 = vector.shape_cast %480 : vector<1x8x384xf32> to vector<8x384xf32>
    %cst_160 = arith.constant dense<0.000000e+00> : vector<8x384xf32>
    %482 = tpu.matmul %474, %439, %cst_160 {dimension_numbers = #tpu.dot_dimension_numbers<[1], [0], [0], [1], [0, 0, 1, 1], [], []>} : vector<8x96xf32>, vector<96x384xf32>, vector<8x384xf32> -> vector<8x384xf32>
    %483 = arith.addf %481, %482 : vector<8x384xf32>
    %484 = math.tanh %483 : vector<8x384xf32>
    %485 = arith.negf %483 : vector<8x384xf32>
    %486 = math.exp %485 : vector<8x384xf32>
    %cst_161 = arith.constant 1.000000e+00 : f32
    %487 = vector.broadcast %cst_161 : f32 to vector<8x384xf32>
    %488 = arith.addf %487, %486 : vector<8x384xf32>
    %489 = arith.divf %487, %488 : vector<8x384xf32>
    %490 = arith.select %451, %484, %489 : vector<8x384xi1>, vector<8x384xf32>
    %491 = vector.extract_strided_slice %490 {offsets = [0, 0], sizes = [8, 96], strides = [1, 1]} : vector<8x384xf32> to vector<8x96xf32>
    %492 = vector.extract_strided_slice %490 {offsets = [0, 96], sizes = [8, 96], strides = [1, 1]} : vector<8x384xf32> to vector<8x96xf32>
    %493 = vector.extract_strided_slice %490 {offsets = [0, 192], sizes = [8, 96], strides = [1, 1]} : vector<8x384xf32> to vector<8x96xf32>
    %494 = vector.extract_strided_slice %490 {offsets = [0, 288], sizes = [8, 96], strides = [1, 1]} : vector<8x384xf32> to vector<8x96xf32>
    %495 = arith.mulf %492, %472 : vector<8x96xf32>
    %496 = arith.mulf %491, %493 : vector<8x96xf32>
    %497 = arith.addf %495, %496 : vector<8x96xf32>
    %498 = math.tanh %497 : vector<8x96xf32>
    %499 = arith.mulf %494, %498 : vector<8x96xf32>
    %500 = arith.index_cast %c1_i32_157 : i32 to index
    %c0_162 = arith.constant 0 : index
    %c0_163 = arith.constant 0 : index
    %501 = vector.load %arg21[%500, %c0_162, %c0_163] : memref<8x8x96xf32, #tpu.memory_space<vmem>>, vector<1x8x96xf32>
    %502 = vector.shape_cast %501 : vector<1x8x96xf32> to vector<8x96xf32>
    %503 = vector.shape_cast %499 : vector<8x96xf32> to vector<1x8x96xf32>
    tpu.vector_store %arg21[%500, %c0_162, %c0_163], %503 {strides = array<i32>} : memref<8x8x96xf32, #tpu.memory_space<vmem>>, vector<1x8x96xf32>,
    %c2_i32_164 = arith.constant 2 : i32
    %504 = arith.index_cast %c2_i32_164 : i32 to index
    %c0_165 = arith.constant 0 : index
    %c0_166 = arith.constant 0 : index
    %505 = vector.load %arg20[%504, %c0_165, %c0_166] : memref<8x8x384xf32, #tpu.memory_space<vmem>>, vector<1x8x384xf32>
    %506 = vector.shape_cast %505 : vector<1x8x384xf32> to vector<8x384xf32>
    %cst_167 = arith.constant dense<0.000000e+00> : vector<8x384xf32>
    %507 = tpu.matmul %499, %439, %cst_167 {dimension_numbers = #tpu.dot_dimension_numbers<[1], [0], [0], [1], [0, 0, 1, 1], [], []>} : vector<8x96xf32>, vector<96x384xf32>, vector<8x384xf32> -> vector<8x384xf32>
    %508 = arith.addf %506, %507 : vector<8x384xf32>
    %509 = math.tanh %508 : vector<8x384xf32>
    %510 = arith.negf %508 : vector<8x384xf32>
    %511 = math.exp %510 : vector<8x384xf32>
    %cst_168 = arith.constant 1.000000e+00 : f32
    %512 = vector.broadcast %cst_168 : f32 to vector<8x384xf32>
    %513 = arith.addf %512, %511 : vector<8x384xf32>
    %514 = arith.divf %512, %513 : vector<8x384xf32>
    %515 = arith.select %451, %509, %514 : vector<8x384xi1>, vector<8x384xf32>
    %516 = vector.extract_strided_slice %515 {offsets = [0, 0], sizes = [8, 96], strides = [1, 1]} : vector<8x384xf32> to vector<8x96xf32>
    %517 = vector.extract_strided_slice %515 {offsets = [0, 96], sizes = [8, 96], strides = [1, 1]} : vector<8x384xf32> to vector<8x96xf32>
    %518 = vector.extract_strided_slice %515 {offsets = [0, 192], sizes = [8, 96], strides = [1, 1]} : vector<8x384xf32> to vector<8x96xf32>
    %519 = vector.extract_strided_slice %515 {offsets = [0, 288], sizes = [8, 96], strides = [1, 1]} : vector<8x384xf32> to vector<8x96xf32>
    %520 = arith.mulf %517, %497 : vector<8x96xf32>
    %521 = arith.mulf %516, %518 : vector<8x96xf32>
    %522 = arith.addf %520, %521 : vector<8x96xf32>
    %523 = math.tanh %522 : vector<8x96xf32>
    %524 = arith.mulf %519, %523 : vector<8x96xf32>
    %525 = arith.index_cast %c2_i32_164 : i32 to index
    %c0_169 = arith.constant 0 : index
    %c0_170 = arith.constant 0 : index
    %526 = vector.load %arg21[%525, %c0_169, %c0_170] : memref<8x8x96xf32, #tpu.memory_space<vmem>>, vector<1x8x96xf32>
    %527 = vector.shape_cast %526 : vector<1x8x96xf32> to vector<8x96xf32>
    %528 = vector.shape_cast %524 : vector<8x96xf32> to vector<1x8x96xf32>
    tpu.vector_store %arg21[%525, %c0_169, %c0_170], %528 {strides = array<i32>} : memref<8x8x96xf32, #tpu.memory_space<vmem>>, vector<1x8x96xf32>,
    %c3_i32_171 = arith.constant 3 : i32
    %529 = arith.index_cast %c3_i32_171 : i32 to index
    %c0_172 = arith.constant 0 : index
    %c0_173 = arith.constant 0 : index
    %530 = vector.load %arg20[%529, %c0_172, %c0_173] : memref<8x8x384xf32, #tpu.memory_space<vmem>>, vector<1x8x384xf32>
    %531 = vector.shape_cast %530 : vector<1x8x384xf32> to vector<8x384xf32>
    %cst_174 = arith.constant dense<0.000000e+00> : vector<8x384xf32>
    %532 = tpu.matmul %524, %439, %cst_174 {dimension_numbers = #tpu.dot_dimension_numbers<[1], [0], [0], [1], [0, 0, 1, 1], [], []>} : vector<8x96xf32>, vector<96x384xf32>, vector<8x384xf32> -> vector<8x384xf32>
    %533 = arith.addf %531, %532 : vector<8x384xf32>
    %534 = math.tanh %533 : vector<8x384xf32>
    %535 = arith.negf %533 : vector<8x384xf32>
    %536 = math.exp %535 : vector<8x384xf32>
    %cst_175 = arith.constant 1.000000e+00 : f32
    %537 = vector.broadcast %cst_175 : f32 to vector<8x384xf32>
    %538 = arith.addf %537, %536 : vector<8x384xf32>
    %539 = arith.divf %537, %538 : vector<8x384xf32>
    %540 = arith.select %451, %534, %539 : vector<8x384xi1>, vector<8x384xf32>
    %541 = vector.extract_strided_slice %540 {offsets = [0, 0], sizes = [8, 96], strides = [1, 1]} : vector<8x384xf32> to vector<8x96xf32>
    %542 = vector.extract_strided_slice %540 {offsets = [0, 96], sizes = [8, 96], strides = [1, 1]} : vector<8x384xf32> to vector<8x96xf32>
    %543 = vector.extract_strided_slice %540 {offsets = [0, 192], sizes = [8, 96], strides = [1, 1]} : vector<8x384xf32> to vector<8x96xf32>
    %544 = vector.extract_strided_slice %540 {offsets = [0, 288], sizes = [8, 96], strides = [1, 1]} : vector<8x384xf32> to vector<8x96xf32>
    %545 = arith.mulf %542, %522 : vector<8x96xf32>
    %546 = arith.mulf %541, %543 : vector<8x96xf32>
    %547 = arith.addf %545, %546 : vector<8x96xf32>
    %548 = math.tanh %547 : vector<8x96xf32>
    %549 = arith.mulf %544, %548 : vector<8x96xf32>
    %550 = arith.index_cast %c3_i32_171 : i32 to index
    %c0_176 = arith.constant 0 : index
    %c0_177 = arith.constant 0 : index
    %551 = vector.load %arg21[%550, %c0_176, %c0_177] : memref<8x8x96xf32, #tpu.memory_space<vmem>>, vector<1x8x96xf32>
    %552 = vector.shape_cast %551 : vector<1x8x96xf32> to vector<8x96xf32>
    %553 = vector.shape_cast %549 : vector<8x96xf32> to vector<1x8x96xf32>
    tpu.vector_store %arg21[%550, %c0_176, %c0_177], %553 {strides = array<i32>} : memref<8x8x96xf32, #tpu.memory_space<vmem>>, vector<1x8x96xf32>,
    %c4_i32_178 = arith.constant 4 : i32
    %554 = arith.index_cast %c4_i32_178 : i32 to index
    %c0_179 = arith.constant 0 : index
    %c0_180 = arith.constant 0 : index
    %555 = vector.load %arg20[%554, %c0_179, %c0_180] : memref<8x8x384xf32, #tpu.memory_space<vmem>>, vector<1x8x384xf32>
    %556 = vector.shape_cast %555 : vector<1x8x384xf32> to vector<8x384xf32>
    %cst_181 = arith.constant dense<0.000000e+00> : vector<8x384xf32>
    %557 = tpu.matmul %549, %439, %cst_181 {dimension_numbers = #tpu.dot_dimension_numbers<[1], [0], [0], [1], [0, 0, 1, 1], [], []>} : vector<8x96xf32>, vector<96x384xf32>, vector<8x384xf32> -> vector<8x384xf32>
    %558 = arith.addf %556, %557 : vector<8x384xf32>
    %559 = math.tanh %558 : vector<8x384xf32>
    %560 = arith.negf %558 : vector<8x384xf32>
    %561 = math.exp %560 : vector<8x384xf32>
    %cst_182 = arith.constant 1.000000e+00 : f32
    %562 = vector.broadcast %cst_182 : f32 to vector<8x384xf32>
    %563 = arith.addf %562, %561 : vector<8x384xf32>
    %564 = arith.divf %562, %563 : vector<8x384xf32>
    %565 = arith.select %451, %559, %564 : vector<8x384xi1>, vector<8x384xf32>
    %566 = vector.extract_strided_slice %565 {offsets = [0, 0], sizes = [8, 96], strides = [1, 1]} : vector<8x384xf32> to vector<8x96xf32>
    %567 = vector.extract_strided_slice %565 {offsets = [0, 96], sizes = [8, 96], strides = [1, 1]} : vector<8x384xf32> to vector<8x96xf32>
    %568 = vector.extract_strided_slice %565 {offsets = [0, 192], sizes = [8, 96], strides = [1, 1]} : vector<8x384xf32> to vector<8x96xf32>
    %569 = vector.extract_strided_slice %565 {offsets = [0, 288], sizes = [8, 96], strides = [1, 1]} : vector<8x384xf32> to vector<8x96xf32>
    %570 = arith.mulf %567, %547 : vector<8x96xf32>
    %571 = arith.mulf %566, %568 : vector<8x96xf32>
    %572 = arith.addf %570, %571 : vector<8x96xf32>
    %573 = math.tanh %572 : vector<8x96xf32>
    %574 = arith.mulf %569, %573 : vector<8x96xf32>
    %575 = arith.index_cast %c4_i32_178 : i32 to index
    %c0_183 = arith.constant 0 : index
    %c0_184 = arith.constant 0 : index
    %576 = vector.load %arg21[%575, %c0_183, %c0_184] : memref<8x8x96xf32, #tpu.memory_space<vmem>>, vector<1x8x96xf32>
    %577 = vector.shape_cast %576 : vector<1x8x96xf32> to vector<8x96xf32>
    %578 = vector.shape_cast %574 : vector<8x96xf32> to vector<1x8x96xf32>
    tpu.vector_store %arg21[%575, %c0_183, %c0_184], %578 {strides = array<i32>} : memref<8x8x96xf32, #tpu.memory_space<vmem>>, vector<1x8x96xf32>,
    %c5_i32_185 = arith.constant 5 : i32
    %579 = arith.index_cast %c5_i32_185 : i32 to index
    %c0_186 = arith.constant 0 : index
    %c0_187 = arith.constant 0 : index
    %580 = vector.load %arg20[%579, %c0_186, %c0_187] : memref<8x8x384xf32, #tpu.memory_space<vmem>>, vector<1x8x384xf32>
    %581 = vector.shape_cast %580 : vector<1x8x384xf32> to vector<8x384xf32>
    %cst_188 = arith.constant dense<0.000000e+00> : vector<8x384xf32>
    %582 = tpu.matmul %574, %439, %cst_188 {dimension_numbers = #tpu.dot_dimension_numbers<[1], [0], [0], [1], [0, 0, 1, 1], [], []>} : vector<8x96xf32>, vector<96x384xf32>, vector<8x384xf32> -> vector<8x384xf32>
    %583 = arith.addf %581, %582 : vector<8x384xf32>
    %584 = math.tanh %583 : vector<8x384xf32>
    %585 = arith.negf %583 : vector<8x384xf32>
    %586 = math.exp %585 : vector<8x384xf32>
    %cst_189 = arith.constant 1.000000e+00 : f32
    %587 = vector.broadcast %cst_189 : f32 to vector<8x384xf32>
    %588 = arith.addf %587, %586 : vector<8x384xf32>
    %589 = arith.divf %587, %588 : vector<8x384xf32>
    %590 = arith.select %451, %584, %589 : vector<8x384xi1>, vector<8x384xf32>
    %591 = vector.extract_strided_slice %590 {offsets = [0, 0], sizes = [8, 96], strides = [1, 1]} : vector<8x384xf32> to vector<8x96xf32>
    %592 = vector.extract_strided_slice %590 {offsets = [0, 96], sizes = [8, 96], strides = [1, 1]} : vector<8x384xf32> to vector<8x96xf32>
    %593 = vector.extract_strided_slice %590 {offsets = [0, 192], sizes = [8, 96], strides = [1, 1]} : vector<8x384xf32> to vector<8x96xf32>
    %594 = vector.extract_strided_slice %590 {offsets = [0, 288], sizes = [8, 96], strides = [1, 1]} : vector<8x384xf32> to vector<8x96xf32>
    %595 = arith.mulf %592, %572 : vector<8x96xf32>
    %596 = arith.mulf %591, %593 : vector<8x96xf32>
    %597 = arith.addf %595, %596 : vector<8x96xf32>
    %598 = math.tanh %597 : vector<8x96xf32>
    %599 = arith.mulf %594, %598 : vector<8x96xf32>
    %600 = arith.index_cast %c5_i32_185 : i32 to index
    %c0_190 = arith.constant 0 : index
    %c0_191 = arith.constant 0 : index
    %601 = vector.load %arg21[%600, %c0_190, %c0_191] : memref<8x8x96xf32, #tpu.memory_space<vmem>>, vector<1x8x96xf32>
    %602 = vector.shape_cast %601 : vector<1x8x96xf32> to vector<8x96xf32>
    %603 = vector.shape_cast %599 : vector<8x96xf32> to vector<1x8x96xf32>
    tpu.vector_store %arg21[%600, %c0_190, %c0_191], %603 {strides = array<i32>} : memref<8x8x96xf32, #tpu.memory_space<vmem>>, vector<1x8x96xf32>,
    %c6_i32_192 = arith.constant 6 : i32
    %604 = arith.index_cast %c6_i32_192 : i32 to index
    %c0_193 = arith.constant 0 : index
    %c0_194 = arith.constant 0 : index
    %605 = vector.load %arg20[%604, %c0_193, %c0_194] : memref<8x8x384xf32, #tpu.memory_space<vmem>>, vector<1x8x384xf32>
    %606 = vector.shape_cast %605 : vector<1x8x384xf32> to vector<8x384xf32>
    %cst_195 = arith.constant dense<0.000000e+00> : vector<8x384xf32>
    %607 = tpu.matmul %599, %439, %cst_195 {dimension_numbers = #tpu.dot_dimension_numbers<[1], [0], [0], [1], [0, 0, 1, 1], [], []>} : vector<8x96xf32>, vector<96x384xf32>, vector<8x384xf32> -> vector<8x384xf32>
    %608 = arith.addf %606, %607 : vector<8x384xf32>
    %609 = math.tanh %608 : vector<8x384xf32>
    %610 = arith.negf %608 : vector<8x384xf32>
    %611 = math.exp %610 : vector<8x384xf32>
    %cst_196 = arith.constant 1.000000e+00 : f32
    %612 = vector.broadcast %cst_196 : f32 to vector<8x384xf32>
    %613 = arith.addf %612, %611 : vector<8x384xf32>
    %614 = arith.divf %612, %613 : vector<8x384xf32>
    %615 = arith.select %451, %609, %614 : vector<8x384xi1>, vector<8x384xf32>
    %616 = vector.extract_strided_slice %615 {offsets = [0, 0], sizes = [8, 96], strides = [1, 1]} : vector<8x384xf32> to vector<8x96xf32>
    %617 = vector.extract_strided_slice %615 {offsets = [0, 96], sizes = [8, 96], strides = [1, 1]} : vector<8x384xf32> to vector<8x96xf32>
    %618 = vector.extract_strided_slice %615 {offsets = [0, 192], sizes = [8, 96], strides = [1, 1]} : vector<8x384xf32> to vector<8x96xf32>
    %619 = vector.extract_strided_slice %615 {offsets = [0, 288], sizes = [8, 96], strides = [1, 1]} : vector<8x384xf32> to vector<8x96xf32>
    %620 = arith.mulf %617, %597 : vector<8x96xf32>
    %621 = arith.mulf %616, %618 : vector<8x96xf32>
    %622 = arith.addf %620, %621 : vector<8x96xf32>
    %623 = math.tanh %622 : vector<8x96xf32>
    %624 = arith.mulf %619, %623 : vector<8x96xf32>
    %625 = arith.index_cast %c6_i32_192 : i32 to index
    %c0_197 = arith.constant 0 : index
    %c0_198 = arith.constant 0 : index
    %626 = vector.load %arg21[%625, %c0_197, %c0_198] : memref<8x8x96xf32, #tpu.memory_space<vmem>>, vector<1x8x96xf32>
    %627 = vector.shape_cast %626 : vector<1x8x96xf32> to vector<8x96xf32>
    %628 = vector.shape_cast %624 : vector<8x96xf32> to vector<1x8x96xf32>
    tpu.vector_store %arg21[%625, %c0_197, %c0_198], %628 {strides = array<i32>} : memref<8x8x96xf32, #tpu.memory_space<vmem>>, vector<1x8x96xf32>,
    %c7_i32_199 = arith.constant 7 : i32
    %629 = arith.index_cast %c7_i32_199 : i32 to index
    %c0_200 = arith.constant 0 : index
    %c0_201 = arith.constant 0 : index
    %630 = vector.load %arg20[%629, %c0_200, %c0_201] : memref<8x8x384xf32, #tpu.memory_space<vmem>>, vector<1x8x384xf32>
    %631 = vector.shape_cast %630 : vector<1x8x384xf32> to vector<8x384xf32>
    %cst_202 = arith.constant dense<0.000000e+00> : vector<8x384xf32>
    %632 = tpu.matmul %624, %439, %cst_202 {dimension_numbers = #tpu.dot_dimension_numbers<[1], [0], [0], [1], [0, 0, 1, 1], [], []>} : vector<8x96xf32>, vector<96x384xf32>, vector<8x384xf32> -> vector<8x384xf32>
    %633 = arith.addf %631, %632 : vector<8x384xf32>
    %634 = math.tanh %633 : vector<8x384xf32>
    %635 = arith.negf %633 : vector<8x384xf32>
    %636 = math.exp %635 : vector<8x384xf32>
    %cst_203 = arith.constant 1.000000e+00 : f32
    %637 = vector.broadcast %cst_203 : f32 to vector<8x384xf32>
    %638 = arith.addf %637, %636 : vector<8x384xf32>
    %639 = arith.divf %637, %638 : vector<8x384xf32>
    %640 = arith.select %451, %634, %639 : vector<8x384xi1>, vector<8x384xf32>
    %641 = vector.extract_strided_slice %640 {offsets = [0, 0], sizes = [8, 96], strides = [1, 1]} : vector<8x384xf32> to vector<8x96xf32>
    %642 = vector.extract_strided_slice %640 {offsets = [0, 96], sizes = [8, 96], strides = [1, 1]} : vector<8x384xf32> to vector<8x96xf32>
    %643 = vector.extract_strided_slice %640 {offsets = [0, 192], sizes = [8, 96], strides = [1, 1]} : vector<8x384xf32> to vector<8x96xf32>
    %644 = vector.extract_strided_slice %640 {offsets = [0, 288], sizes = [8, 96], strides = [1, 1]} : vector<8x384xf32> to vector<8x96xf32>
    %645 = arith.mulf %642, %622 : vector<8x96xf32>
    %646 = arith.mulf %641, %643 : vector<8x96xf32>
    %647 = arith.addf %645, %646 : vector<8x96xf32>
    %648 = math.tanh %647 : vector<8x96xf32>
    %649 = arith.mulf %644, %648 : vector<8x96xf32>
    %650 = arith.index_cast %c7_i32_199 : i32 to index
    %c0_204 = arith.constant 0 : index
    %c0_205 = arith.constant 0 : index
    %651 = vector.load %arg21[%650, %c0_204, %c0_205] : memref<8x8x96xf32, #tpu.memory_space<vmem>>, vector<1x8x96xf32>
    %652 = vector.shape_cast %651 : vector<1x8x96xf32> to vector<8x96xf32>
    %653 = vector.shape_cast %649 : vector<8x96xf32> to vector<1x8x96xf32>
    tpu.vector_store %arg21[%650, %c0_204, %c0_205], %653 {strides = array<i32>} : memref<8x8x96xf32, #tpu.memory_space<vmem>>, vector<1x8x96xf32>,
    %c8_i32_206 = arith.constant 8 : i32
    %c0_207 = arith.constant 0 : index
    %c0_208 = arith.constant 0 : index
    %c0_209 = arith.constant 0 : index
    %654 = vector.load %arg21[%c0_207, %c0_208, %c0_209] : memref<8x8x96xf32, #tpu.memory_space<vmem>>, vector<8x8x96xf32>
    %655 = vector.shape_cast %654 : vector<8x8x96xf32> to vector<64x96xf32>
    %c0_210 = arith.constant 0 : index
    %c0_211 = arith.constant 0 : index
    %656 = vector.load %arg10[%c0_210, %c0_211] : memref<96x384xf32, #tpu.memory_space<vmem>>, vector<96x384xf32>
    %c0_212 = arith.constant 0 : index
    %c0_213 = arith.constant 0 : index
    %657 = vector.load %arg11[%c0_212, %c0_213] : memref<96x384xf32, #tpu.memory_space<vmem>>, vector<96x384xf32>
    %c0_214 = arith.constant 0 : index
    %c0_215 = arith.constant 0 : index
    %658 = vector.load %arg12[%c0_214, %c0_215] : memref<1x384xf32, #tpu.memory_space<vmem>>, vector<1x384xf32>
    %cst_216 = arith.constant dense<0.000000e+00> : vector<64x384xf32>
    %659 = tpu.matmul %655, %656, %cst_216 {dimension_numbers = #tpu.dot_dimension_numbers<[1], [0], [0], [1], [0, 0, 1, 1], [], []>} : vector<64x96xf32>, vector<96x384xf32>, vector<64x384xf32> -> vector<64x384xf32>
    %660 = vector.broadcast %658 : vector<1x384xf32> to vector<64x384xf32>
    %661 = arith.addf %659, %660 : vector<64x384xf32>
    %662 = vector.shape_cast %661 : vector<64x384xf32> to vector<8x8x384xf32>
    %c0_217 = arith.constant 0 : index
    %c0_218 = arith.constant 0 : index
    %c0_219 = arith.constant 0 : index
    %663 = vector.load %arg20[%c0_217, %c0_218, %c0_219] : memref<8x8x384xf32, #tpu.memory_space<vmem>>, vector<8x8x384xf32>
    tpu.vector_store %arg20[%c0_217, %c0_218, %c0_219], %662 {strides = array<i32>} : memref<8x8x384xf32, #tpu.memory_space<vmem>>, vector<8x8x384xf32>,
    %664 = tpu.iota {dimensions = array<i32: 1>} : vector<8x384xi32>
    %c192_i32_220 = arith.constant 192 : i32
    %665 = vector.broadcast %c192_i32_220 : i32 to vector<8x384xi32>
    %666 = arith.cmpi sge, %664, %665 : vector<8x384xi32>
    %c288_i32_221 = arith.constant 288 : i32
    %667 = vector.broadcast %c288_i32_221 : i32 to vector<8x384xi32>
    %668 = arith.cmpi slt, %664, %667 : vector<8x384xi32>
    %669 = arith.andi %666, %668 : vector<8x384xi1>
    %cst_222 = arith.constant 0.000000e+00 : f32
    %670 = vector.broadcast %cst_222 : f32 to vector<8x96xf32>
    %cst_223 = arith.constant 0.000000e+00 : f32
    %671 = vector.broadcast %cst_223 : f32 to vector<8x96xf32>
    %c0_i32_224 = arith.constant 0 : i32
    %672 = arith.index_cast %c0_i32_224 : i32 to index
    %c0_225 = arith.constant 0 : index
    %c0_226 = arith.constant 0 : index
    %673 = vector.load %arg20[%672, %c0_225, %c0_226] : memref<8x8x384xf32, #tpu.memory_space<vmem>>, vector<1x8x384xf32>
    %674 = vector.shape_cast %673 : vector<1x8x384xf32> to vector<8x384xf32>
    %cst_227 = arith.constant dense<0.000000e+00> : vector<8x384xf32>
    %675 = tpu.matmul %670, %657, %cst_227 {dimension_numbers = #tpu.dot_dimension_numbers<[1], [0], [0], [1], [0, 0, 1, 1], [], []>} : vector<8x96xf32>, vector<96x384xf32>, vector<8x384xf32> -> vector<8x384xf32>
    %676 = arith.addf %674, %675 : vector<8x384xf32>
    %677 = math.tanh %676 : vector<8x384xf32>
    %678 = arith.negf %676 : vector<8x384xf32>
    %679 = math.exp %678 : vector<8x384xf32>
    %cst_228 = arith.constant 1.000000e+00 : f32
    %680 = vector.broadcast %cst_228 : f32 to vector<8x384xf32>
    %681 = arith.addf %680, %679 : vector<8x384xf32>
    %682 = arith.divf %680, %681 : vector<8x384xf32>
    %683 = arith.select %669, %677, %682 : vector<8x384xi1>, vector<8x384xf32>
    %684 = vector.extract_strided_slice %683 {offsets = [0, 0], sizes = [8, 96], strides = [1, 1]} : vector<8x384xf32> to vector<8x96xf32>
    %685 = vector.extract_strided_slice %683 {offsets = [0, 96], sizes = [8, 96], strides = [1, 1]} : vector<8x384xf32> to vector<8x96xf32>
    %686 = vector.extract_strided_slice %683 {offsets = [0, 192], sizes = [8, 96], strides = [1, 1]} : vector<8x384xf32> to vector<8x96xf32>
    %687 = vector.extract_strided_slice %683 {offsets = [0, 288], sizes = [8, 96], strides = [1, 1]} : vector<8x384xf32> to vector<8x96xf32>
    %688 = arith.mulf %685, %671 : vector<8x96xf32>
    %689 = arith.mulf %684, %686 : vector<8x96xf32>
    %690 = arith.addf %688, %689 : vector<8x96xf32>
    %691 = math.tanh %690 : vector<8x96xf32>
    %692 = arith.mulf %687, %691 : vector<8x96xf32>
    %c1_i32_229 = arith.constant 1 : i32
    %693 = arith.index_cast %c1_i32_229 : i32 to index
    %c0_230 = arith.constant 0 : index
    %c0_231 = arith.constant 0 : index
    %694 = vector.load %arg20[%693, %c0_230, %c0_231] : memref<8x8x384xf32, #tpu.memory_space<vmem>>, vector<1x8x384xf32>
    %695 = vector.shape_cast %694 : vector<1x8x384xf32> to vector<8x384xf32>
    %cst_232 = arith.constant dense<0.000000e+00> : vector<8x384xf32>
    %696 = tpu.matmul %692, %657, %cst_232 {dimension_numbers = #tpu.dot_dimension_numbers<[1], [0], [0], [1], [0, 0, 1, 1], [], []>} : vector<8x96xf32>, vector<96x384xf32>, vector<8x384xf32> -> vector<8x384xf32>
    %697 = arith.addf %695, %696 : vector<8x384xf32>
    %698 = math.tanh %697 : vector<8x384xf32>
    %699 = arith.negf %697 : vector<8x384xf32>
    %700 = math.exp %699 : vector<8x384xf32>
    %cst_233 = arith.constant 1.000000e+00 : f32
    %701 = vector.broadcast %cst_233 : f32 to vector<8x384xf32>
    %702 = arith.addf %701, %700 : vector<8x384xf32>
    %703 = arith.divf %701, %702 : vector<8x384xf32>
    %704 = arith.select %669, %698, %703 : vector<8x384xi1>, vector<8x384xf32>
    %705 = vector.extract_strided_slice %704 {offsets = [0, 0], sizes = [8, 96], strides = [1, 1]} : vector<8x384xf32> to vector<8x96xf32>
    %706 = vector.extract_strided_slice %704 {offsets = [0, 96], sizes = [8, 96], strides = [1, 1]} : vector<8x384xf32> to vector<8x96xf32>
    %707 = vector.extract_strided_slice %704 {offsets = [0, 192], sizes = [8, 96], strides = [1, 1]} : vector<8x384xf32> to vector<8x96xf32>
    %708 = vector.extract_strided_slice %704 {offsets = [0, 288], sizes = [8, 96], strides = [1, 1]} : vector<8x384xf32> to vector<8x96xf32>
    %709 = arith.mulf %706, %690 : vector<8x96xf32>
    %710 = arith.mulf %705, %707 : vector<8x96xf32>
    %711 = arith.addf %709, %710 : vector<8x96xf32>
    %712 = math.tanh %711 : vector<8x96xf32>
    %713 = arith.mulf %708, %712 : vector<8x96xf32>
    %c2_i32_234 = arith.constant 2 : i32
    %714 = arith.index_cast %c2_i32_234 : i32 to index
    %c0_235 = arith.constant 0 : index
    %c0_236 = arith.constant 0 : index
    %715 = vector.load %arg20[%714, %c0_235, %c0_236] : memref<8x8x384xf32, #tpu.memory_space<vmem>>, vector<1x8x384xf32>
    %716 = vector.shape_cast %715 : vector<1x8x384xf32> to vector<8x384xf32>
    %cst_237 = arith.constant dense<0.000000e+00> : vector<8x384xf32>
    %717 = tpu.matmul %713, %657, %cst_237 {dimension_numbers = #tpu.dot_dimension_numbers<[1], [0], [0], [1], [0, 0, 1, 1], [], []>} : vector<8x96xf32>, vector<96x384xf32>, vector<8x384xf32> -> vector<8x384xf32>
    %718 = arith.addf %716, %717 : vector<8x384xf32>
    %719 = math.tanh %718 : vector<8x384xf32>
    %720 = arith.negf %718 : vector<8x384xf32>
    %721 = math.exp %720 : vector<8x384xf32>
    %cst_238 = arith.constant 1.000000e+00 : f32
    %722 = vector.broadcast %cst_238 : f32 to vector<8x384xf32>
    %723 = arith.addf %722, %721 : vector<8x384xf32>
    %724 = arith.divf %722, %723 : vector<8x384xf32>
    %725 = arith.select %669, %719, %724 : vector<8x384xi1>, vector<8x384xf32>
    %726 = vector.extract_strided_slice %725 {offsets = [0, 0], sizes = [8, 96], strides = [1, 1]} : vector<8x384xf32> to vector<8x96xf32>
    %727 = vector.extract_strided_slice %725 {offsets = [0, 96], sizes = [8, 96], strides = [1, 1]} : vector<8x384xf32> to vector<8x96xf32>
    %728 = vector.extract_strided_slice %725 {offsets = [0, 192], sizes = [8, 96], strides = [1, 1]} : vector<8x384xf32> to vector<8x96xf32>
    %729 = vector.extract_strided_slice %725 {offsets = [0, 288], sizes = [8, 96], strides = [1, 1]} : vector<8x384xf32> to vector<8x96xf32>
    %730 = arith.mulf %727, %711 : vector<8x96xf32>
    %731 = arith.mulf %726, %728 : vector<8x96xf32>
    %732 = arith.addf %730, %731 : vector<8x96xf32>
    %733 = math.tanh %732 : vector<8x96xf32>
    %734 = arith.mulf %729, %733 : vector<8x96xf32>
    %c3_i32_239 = arith.constant 3 : i32
    %735 = arith.index_cast %c3_i32_239 : i32 to index
    %c0_240 = arith.constant 0 : index
    %c0_241 = arith.constant 0 : index
    %736 = vector.load %arg20[%735, %c0_240, %c0_241] : memref<8x8x384xf32, #tpu.memory_space<vmem>>, vector<1x8x384xf32>
    %737 = vector.shape_cast %736 : vector<1x8x384xf32> to vector<8x384xf32>
    %cst_242 = arith.constant dense<0.000000e+00> : vector<8x384xf32>
    %738 = tpu.matmul %734, %657, %cst_242 {dimension_numbers = #tpu.dot_dimension_numbers<[1], [0], [0], [1], [0, 0, 1, 1], [], []>} : vector<8x96xf32>, vector<96x384xf32>, vector<8x384xf32> -> vector<8x384xf32>
    %739 = arith.addf %737, %738 : vector<8x384xf32>
    %740 = math.tanh %739 : vector<8x384xf32>
    %741 = arith.negf %739 : vector<8x384xf32>
    %742 = math.exp %741 : vector<8x384xf32>
    %cst_243 = arith.constant 1.000000e+00 : f32
    %743 = vector.broadcast %cst_243 : f32 to vector<8x384xf32>
    %744 = arith.addf %743, %742 : vector<8x384xf32>
    %745 = arith.divf %743, %744 : vector<8x384xf32>
    %746 = arith.select %669, %740, %745 : vector<8x384xi1>, vector<8x384xf32>
    %747 = vector.extract_strided_slice %746 {offsets = [0, 0], sizes = [8, 96], strides = [1, 1]} : vector<8x384xf32> to vector<8x96xf32>
    %748 = vector.extract_strided_slice %746 {offsets = [0, 96], sizes = [8, 96], strides = [1, 1]} : vector<8x384xf32> to vector<8x96xf32>
    %749 = vector.extract_strided_slice %746 {offsets = [0, 192], sizes = [8, 96], strides = [1, 1]} : vector<8x384xf32> to vector<8x96xf32>
    %750 = vector.extract_strided_slice %746 {offsets = [0, 288], sizes = [8, 96], strides = [1, 1]} : vector<8x384xf32> to vector<8x96xf32>
    %751 = arith.mulf %748, %732 : vector<8x96xf32>
    %752 = arith.mulf %747, %749 : vector<8x96xf32>
    %753 = arith.addf %751, %752 : vector<8x96xf32>
    %754 = math.tanh %753 : vector<8x96xf32>
    %755 = arith.mulf %750, %754 : vector<8x96xf32>
    %c4_i32_244 = arith.constant 4 : i32
    %756 = arith.index_cast %c4_i32_244 : i32 to index
    %c0_245 = arith.constant 0 : index
    %c0_246 = arith.constant 0 : index
    %757 = vector.load %arg20[%756, %c0_245, %c0_246] : memref<8x8x384xf32, #tpu.memory_space<vmem>>, vector<1x8x384xf32>
    %758 = vector.shape_cast %757 : vector<1x8x384xf32> to vector<8x384xf32>
    %cst_247 = arith.constant dense<0.000000e+00> : vector<8x384xf32>
    %759 = tpu.matmul %755, %657, %cst_247 {dimension_numbers = #tpu.dot_dimension_numbers<[1], [0], [0], [1], [0, 0, 1, 1], [], []>} : vector<8x96xf32>, vector<96x384xf32>, vector<8x384xf32> -> vector<8x384xf32>
    %760 = arith.addf %758, %759 : vector<8x384xf32>
    %761 = math.tanh %760 : vector<8x384xf32>
    %762 = arith.negf %760 : vector<8x384xf32>
    %763 = math.exp %762 : vector<8x384xf32>
    %cst_248 = arith.constant 1.000000e+00 : f32
    %764 = vector.broadcast %cst_248 : f32 to vector<8x384xf32>
    %765 = arith.addf %764, %763 : vector<8x384xf32>
    %766 = arith.divf %764, %765 : vector<8x384xf32>
    %767 = arith.select %669, %761, %766 : vector<8x384xi1>, vector<8x384xf32>
    %768 = vector.extract_strided_slice %767 {offsets = [0, 0], sizes = [8, 96], strides = [1, 1]} : vector<8x384xf32> to vector<8x96xf32>
    %769 = vector.extract_strided_slice %767 {offsets = [0, 96], sizes = [8, 96], strides = [1, 1]} : vector<8x384xf32> to vector<8x96xf32>
    %770 = vector.extract_strided_slice %767 {offsets = [0, 192], sizes = [8, 96], strides = [1, 1]} : vector<8x384xf32> to vector<8x96xf32>
    %771 = vector.extract_strided_slice %767 {offsets = [0, 288], sizes = [8, 96], strides = [1, 1]} : vector<8x384xf32> to vector<8x96xf32>
    %772 = arith.mulf %769, %753 : vector<8x96xf32>
    %773 = arith.mulf %768, %770 : vector<8x96xf32>
    %774 = arith.addf %772, %773 : vector<8x96xf32>
    %775 = math.tanh %774 : vector<8x96xf32>
    %776 = arith.mulf %771, %775 : vector<8x96xf32>
    %c5_i32_249 = arith.constant 5 : i32
    %777 = arith.index_cast %c5_i32_249 : i32 to index
    %c0_250 = arith.constant 0 : index
    %c0_251 = arith.constant 0 : index
    %778 = vector.load %arg20[%777, %c0_250, %c0_251] : memref<8x8x384xf32, #tpu.memory_space<vmem>>, vector<1x8x384xf32>
    %779 = vector.shape_cast %778 : vector<1x8x384xf32> to vector<8x384xf32>
    %cst_252 = arith.constant dense<0.000000e+00> : vector<8x384xf32>
    %780 = tpu.matmul %776, %657, %cst_252 {dimension_numbers = #tpu.dot_dimension_numbers<[1], [0], [0], [1], [0, 0, 1, 1], [], []>} : vector<8x96xf32>, vector<96x384xf32>, vector<8x384xf32> -> vector<8x384xf32>
    %781 = arith.addf %779, %780 : vector<8x384xf32>
    %782 = math.tanh %781 : vector<8x384xf32>
    %783 = arith.negf %781 : vector<8x384xf32>
    %784 = math.exp %783 : vector<8x384xf32>
    %cst_253 = arith.constant 1.000000e+00 : f32
    %785 = vector.broadcast %cst_253 : f32 to vector<8x384xf32>
    %786 = arith.addf %785, %784 : vector<8x384xf32>
    %787 = arith.divf %785, %786 : vector<8x384xf32>
    %788 = arith.select %669, %782, %787 : vector<8x384xi1>, vector<8x384xf32>
    %789 = vector.extract_strided_slice %788 {offsets = [0, 0], sizes = [8, 96], strides = [1, 1]} : vector<8x384xf32> to vector<8x96xf32>
    %790 = vector.extract_strided_slice %788 {offsets = [0, 96], sizes = [8, 96], strides = [1, 1]} : vector<8x384xf32> to vector<8x96xf32>
    %791 = vector.extract_strided_slice %788 {offsets = [0, 192], sizes = [8, 96], strides = [1, 1]} : vector<8x384xf32> to vector<8x96xf32>
    %792 = vector.extract_strided_slice %788 {offsets = [0, 288], sizes = [8, 96], strides = [1, 1]} : vector<8x384xf32> to vector<8x96xf32>
    %793 = arith.mulf %790, %774 : vector<8x96xf32>
    %794 = arith.mulf %789, %791 : vector<8x96xf32>
    %795 = arith.addf %793, %794 : vector<8x96xf32>
    %796 = math.tanh %795 : vector<8x96xf32>
    %797 = arith.mulf %792, %796 : vector<8x96xf32>
    %c6_i32_254 = arith.constant 6 : i32
    %798 = arith.index_cast %c6_i32_254 : i32 to index
    %c0_255 = arith.constant 0 : index
    %c0_256 = arith.constant 0 : index
    %799 = vector.load %arg20[%798, %c0_255, %c0_256] : memref<8x8x384xf32, #tpu.memory_space<vmem>>, vector<1x8x384xf32>
    %800 = vector.shape_cast %799 : vector<1x8x384xf32> to vector<8x384xf32>
    %cst_257 = arith.constant dense<0.000000e+00> : vector<8x384xf32>
    %801 = tpu.matmul %797, %657, %cst_257 {dimension_numbers = #tpu.dot_dimension_numbers<[1], [0], [0], [1], [0, 0, 1, 1], [], []>} : vector<8x96xf32>, vector<96x384xf32>, vector<8x384xf32> -> vector<8x384xf32>
    %802 = arith.addf %800, %801 : vector<8x384xf32>
    %803 = math.tanh %802 : vector<8x384xf32>
    %804 = arith.negf %802 : vector<8x384xf32>
    %805 = math.exp %804 : vector<8x384xf32>
    %cst_258 = arith.constant 1.000000e+00 : f32
    %806 = vector.broadcast %cst_258 : f32 to vector<8x384xf32>
    %807 = arith.addf %806, %805 : vector<8x384xf32>
    %808 = arith.divf %806, %807 : vector<8x384xf32>
    %809 = arith.select %669, %803, %808 : vector<8x384xi1>, vector<8x384xf32>
    %810 = vector.extract_strided_slice %809 {offsets = [0, 0], sizes = [8, 96], strides = [1, 1]} : vector<8x384xf32> to vector<8x96xf32>
    %811 = vector.extract_strided_slice %809 {offsets = [0, 96], sizes = [8, 96], strides = [1, 1]} : vector<8x384xf32> to vector<8x96xf32>
    %812 = vector.extract_strided_slice %809 {offsets = [0, 192], sizes = [8, 96], strides = [1, 1]} : vector<8x384xf32> to vector<8x96xf32>
    %813 = vector.extract_strided_slice %809 {offsets = [0, 288], sizes = [8, 96], strides = [1, 1]} : vector<8x384xf32> to vector<8x96xf32>
    %814 = arith.mulf %811, %795 : vector<8x96xf32>
    %815 = arith.mulf %810, %812 : vector<8x96xf32>
    %816 = arith.addf %814, %815 : vector<8x96xf32>
    %817 = math.tanh %816 : vector<8x96xf32>
    %818 = arith.mulf %813, %817 : vector<8x96xf32>
    %c7_i32_259 = arith.constant 7 : i32
    %819 = arith.index_cast %c7_i32_259 : i32 to index
    %c0_260 = arith.constant 0 : index
    %c0_261 = arith.constant 0 : index
    %820 = vector.load %arg20[%819, %c0_260, %c0_261] : memref<8x8x384xf32, #tpu.memory_space<vmem>>, vector<1x8x384xf32>
    %821 = vector.shape_cast %820 : vector<1x8x384xf32> to vector<8x384xf32>
    %cst_262 = arith.constant dense<0.000000e+00> : vector<8x384xf32>
    %822 = tpu.matmul %818, %657, %cst_262 {dimension_numbers = #tpu.dot_dimension_numbers<[1], [0], [0], [1], [0, 0, 1, 1], [], []>} : vector<8x96xf32>, vector<96x384xf32>, vector<8x384xf32> -> vector<8x384xf32>
    %823 = arith.addf %821, %822 : vector<8x384xf32>
    %824 = math.tanh %823 : vector<8x384xf32>
    %825 = arith.negf %823 : vector<8x384xf32>
    %826 = math.exp %825 : vector<8x384xf32>
    %cst_263 = arith.constant 1.000000e+00 : f32
    %827 = vector.broadcast %cst_263 : f32 to vector<8x384xf32>
    %828 = arith.addf %827, %826 : vector<8x384xf32>
    %829 = arith.divf %827, %828 : vector<8x384xf32>
    %830 = arith.select %669, %824, %829 : vector<8x384xi1>, vector<8x384xf32>
    %831 = vector.extract_strided_slice %830 {offsets = [0, 0], sizes = [8, 96], strides = [1, 1]} : vector<8x384xf32> to vector<8x96xf32>
    %832 = vector.extract_strided_slice %830 {offsets = [0, 96], sizes = [8, 96], strides = [1, 1]} : vector<8x384xf32> to vector<8x96xf32>
    %833 = vector.extract_strided_slice %830 {offsets = [0, 192], sizes = [8, 96], strides = [1, 1]} : vector<8x384xf32> to vector<8x96xf32>
    %834 = vector.extract_strided_slice %830 {offsets = [0, 288], sizes = [8, 96], strides = [1, 1]} : vector<8x384xf32> to vector<8x96xf32>
    %835 = arith.mulf %832, %816 : vector<8x96xf32>
    %836 = arith.mulf %831, %833 : vector<8x96xf32>
    %837 = arith.addf %835, %836 : vector<8x96xf32>
    %838 = math.tanh %837 : vector<8x96xf32>
    %839 = arith.mulf %834, %838 : vector<8x96xf32>
    %c8_i32_264 = arith.constant 8 : i32
    %c0_265 = arith.constant 0 : index
    %c0_266 = arith.constant 0 : index
    %840 = vector.load %arg13[%c0_265, %c0_266] : memref<96x12xf32, #tpu.memory_space<vmem>>, vector<96x12xf32>
    %cst_267 = arith.constant dense<0.000000e+00> : vector<8x12xf32>
    %841 = tpu.matmul %839, %840, %cst_267 {dimension_numbers = #tpu.dot_dimension_numbers<[1], [0], [0], [1], [0, 0, 1, 1], [], []>} : vector<8x96xf32>, vector<96x12xf32>, vector<8x12xf32> -> vector<8x12xf32>
    %c0_268 = arith.constant 0 : index
    %c0_269 = arith.constant 0 : index
    %842 = vector.load %arg14[%c0_268, %c0_269] : memref<1x12xf32, #tpu.memory_space<vmem>>, vector<1x12xf32>
    %843 = vector.broadcast %842 : vector<1x12xf32> to vector<8x12xf32>
    %844 = arith.addf %841, %843 : vector<8x12xf32>
    %845 = vector.extract_strided_slice %844 {offsets = [0, 0], sizes = [8, 10], strides = [1, 1]} : vector<8x12xf32> to vector<8x10xf32>
    %cst_270 = arith.constant dense<0xFF800000> : vector<8xf32>
    %846 = vector.multi_reduction <maximumf>, %845, %cst_270 [1] : vector<8x10xf32> to vector<8xf32>
    %847 = vector.shape_cast %846 : vector<8xf32> to vector<8x1xf32>
    %848 = vector.broadcast %847 : vector<8x1xf32> to vector<8x10xf32>
    %849 = arith.subf %845, %848 : vector<8x10xf32>
    %850 = math.exp %849 : vector<8x10xf32>
    %cst_271 = arith.constant dense<0.000000e+00> : vector<8xf32>
    %851 = vector.multi_reduction <add>, %850, %cst_271 [1] : vector<8x10xf32> to vector<8xf32>
    %852 = vector.shape_cast %851 : vector<8xf32> to vector<8x1xf32>
    %853 = vector.broadcast %852 : vector<8x1xf32> to vector<8x10xf32>
    %854 = arith.divf %850, %853 : vector<8x10xf32>
    %c0_272 = arith.constant 0 : index
    %c0_273 = arith.constant 0 : index
    %855 = vector.load %arg15[%c0_272, %c0_273] : memref<8x10xf32, #tpu.memory_space<vmem>>, vector<8x10xf32>
    tpu.vector_store %arg15[%c0_272, %c0_273], %854 {strides = array<i32>} : memref<8x10xf32, #tpu.memory_space<vmem>>, vector<8x10xf32>,
    %856 = vector.extract_strided_slice %844 {offsets = [0, 10], sizes = [8, 1], strides = [1, 1]} : vector<8x12xf32> to vector<8x1xf32>
    %c0_274 = arith.constant 0 : index
    %c0_275 = arith.constant 0 : index
    %857 = vector.load %arg16[%c0_274, %c0_275] : memref<8x1xf32, #tpu.memory_space<vmem>>, vector<8x1xf32>
    tpu.vector_store %arg16[%c0_274, %c0_275], %856 {strides = array<i32>} : memref<8x1xf32, #tpu.memory_space<vmem>>, vector<8x1xf32>,
    %858 = vector.extract_strided_slice %844 {offsets = [0, 11], sizes = [8, 1], strides = [1, 1]} : vector<8x12xf32> to vector<8x1xf32>
    %c0_276 = arith.constant 0 : index
    %c0_277 = arith.constant 0 : index
    %859 = vector.load %arg17[%c0_276, %c0_277] : memref<8x1xf32, #tpu.memory_space<vmem>>, vector<8x1xf32>
    tpu.vector_store %arg17[%c0_276, %c0_277], %858 {strides = array<i32>} : memref<8x1xf32, #tpu.memory_space<vmem>>, vector<8x1xf32>,
    return
  }
}

</mosaic_0001>

<bundles_post_ra>
// kernel: lstm_model_forward.1
= control target key start
LH: loop header
LB: loop body
LE: loop exit
PB: predicated region body
PF: predicated region fallthrough
CT: control target
= control target key end

     0   :  { %s10787_s0 = inlined_call_operand.vmem [shape: f32[8,8,8], index: 0, kind: input, shape index: {}]   ;;  %s10788_s1 = inlined_call_operand.vmem [shape: f32[8,128], index: 1, kind: input, shape index: {}]   ;;  %s10789_s2 = inlined_call_operand.vmem [shape: f32[32,128], index: 2, kind: input, shape index: {}]   ;;  %s10790_s3 = inlined_call_operand.vmem [shape: f32[1,128], index: 3, kind: input, shape index: {}]   ;;  %s10791_s4 = inlined_call_operand.vmem [shape: f32[32,128], index: 4, kind: input, shape index: {}]   ;;  %s10792_s5 = inlined_call_operand.vmem [shape: f32[32,128], index: 5, kind: input, shape index: {}]   ;;  %s10793_s6 = inlined_call_operand.vmem [shape: f32[1,128], index: 6, kind: input, shape index: {}]   ;;  %s10794_s7 = inlined_call_operand.vmem [shape: f32[32,384], index: 7, kind: input, shape index: {}]   ;;  %s10795_s8 = inlined_call_operand.vmem [shape: f32[96,384], index: 8, kind: input, shape index: {}]   ;;  %s10796_s9 = inlined_call_operand.vmem [shape: f32[1,384], index: 9, kind: input, shape index: {}]   ;;  %s10797_s10 = inlined_call_operand.vmem [shape: f32[96,384], index: 10, kind: input, shape index: {}]   ;;  %s10798_s11 = inlined_call_operand.vmem [shape: f32[96,384], index: 11, kind: input, shape index: {}]   ;;  %s10799_s12 = inlined_call_operand.vmem [shape: f32[1,384], index: 12, kind: input, shape index: {}]   ;;  %s10800_s13 = inlined_call_operand.vmem [shape: f32[96,12], index: 13, kind: input, shape index: {}]   ;;  %s10801_s14 = inlined_call_operand.vmem [shape: f32[1,12], index: 14, kind: input, shape index: {}]   ;;  %s10802_s15 = inlined_call_operand.hbm [shape: f32[8,10], index: 15, kind: output, shape index: {0}]   ;;  %s10803_s16 = inlined_call_operand.vmem [shape: f32[8,1], index: 16, kind: output, shape index: {1}]   ;;  %s10804_s17 = inlined_call_operand.vmem [shape: f32[8,1], index: 17, kind: output, shape index: {2}]  }
   0x1   :  { %10806 = sst [smem:[#allocation9_spill]] %s10787_s0 }
   0x2   :  { %10807 = sst [smem:[#allocation10_spill]] %s10788_s1 }
   0x3   :  { %10808 = sst [smem:[#allocation11_spill]] %s10799_s12 }
   0x4   :  { %s10809_s26 = sld [smem:[#allocation10_spill]]  ;;  %s10810_s12 = sld [smem:[#allocation9_spill]]  ;;  %vm74_vm0 = vcmask 64512   ;;  %v63_v3 = vld [vmem:[%s10789_s2] sm:$0xff]  ;;  %v64_v4 = vld [vmem:[%s10789_s2 + $0x8] sm:$0xff]  ;;  %v8842_v7 = vmov 0.0|0.0  }
   0x5   :  { %v8960_v6 = vpack.c.bf16 %v64_v4, %v63_v3  ;;  %7447 = vmatprep.subr.bf16.mxu0 %v8842_v7  ;;  %v65_v8 = vld [vmem:[%s10789_s2 + $0x10] sm:$0xff]  ;;  %v66_v9 = vld [vmem:[%s10789_s2 + $0x18] sm:$0xff] }
   0x6   :  { %v8976_v11 = vpack.c.bf16 %v66_v9, %v65_v8 }
   0xa   :  { %v62_v0 = vld [vmem:[%s10809_s26] sm:$0xff]  ;;  %v55_v2 = vld [vmem:[%s10810_s12 + $0x8] sm:$0xff]  ;;  %v56_v5 = vld [vmem:[%s10810_s12 + $0x10] sm:$0xff] }
   0xb   :  { %v54_v1 = vld [vmem:[%s10810_s12] sm:$0xff]  ;;  %6710 = vmatprep.subr.mxu1 %v62_v0  ;;  %v57_v10 = vld [vmem:[%s10810_s12 + $0x18] sm:$0xff] }
   0xc   :  { %6712 = vmatprep.mubr.msk.f32.mxu1 %vm74_vm0, %v54_v1  ;;  %6711 = vmatpush3.msra.mxu1 %v62_v0 }
   0xd   :  { %6713 = vmatmul.mubr.msk.f32.vlgmr.msra.gmra.mrb[0].mxu1 %vm74_vm0, %v55_v2  ;;  %7435 = vmatprep.subr.bf16.mxu1 %v8842_v7 }
   0xe   :  { %7437 = vmatpush3.bf16.msra.mxu1 %v8960_v6  ;;  %6715 = vmatprep.mubr.msk.f32.mxu1 %vm74_vm0, %v56_v5 }
   0xf   :  { %23 = vsyncpa [#allocation7], 0  ;;  %v58_v12 = vld [vmem:[%s10810_s12 + $0x20] sm:$0xff]  ;;  %7438 = vmatprep.subr.bf16.mxu1 %v8842_v7  ;;  %7449 = vmatpush3.bf16.msra.mxu0 %v8960_v6  ;;  %vm8843_vm1 = vmmov 0   ;;  %v8844_v13 = vmov 0.0   ;;  %v59_v14 = vld [vmem:[%s10810_s12 + $0x28] sm:$0xff]  ;;  %v212_v39 = vlaneseq }
  0x10   :  { %7450 = vmatprep.subr.bf16.mxu0 %v8842_v7  ;;  %6754 = vmatprep.mubr.msk.f32.mxu0 %vm8843_vm1, %v8844_v13  ;;  %v60_v15 = vld [vmem:[%s10810_s12 + $0x30] sm:$0xff]  ;;  %v61_v16 = vld [vmem:[%s10810_s12 + $0x38] sm:$0xff]  ;;  %v6198_v17 = vld [vmem:[%s10790_s3] ss:$0 sm:$0xff]  ;;  %s8845_s3 = smov 64   ;;  %s8846_s21 = smov 32  }
  0x11   :  { %6716 = vmatmul.mubr.msk.f32.gmra.mrb[2].mxu1 %vm74_vm0, %v57_v10  ;;  %v9029_v41 = vand.u32 127, %v212_v39  ;;  %vm218_vm5 = vcmask 261120   ;;  %v2079_v42 = vld [vmem:[%s10795_s8 + $0x20] sm:$0xff]  ;;  %vm2587_vm8 = vcmask 523264   ;;  %vm2408_vm9 = vcmask 785408   ;;  %s10813_s26 = sld [smem:[#allocation11_spill]] }
  0x12   :  { %6718 = vmatprep.mubr.msk.f32.mxu1 %vm74_vm0, %v58_v12  ;;  %7440 = vmatpush3.bf16.msra.mxu1 %v8976_v11  ;;  %vm6153_vm10 = vcmask 80896   ;;  %vm6170_vm11 = vcmask 7168   ;;  %s8850_s2 = smov [#allocation6]  }
  0x13   :  { %7441 = vmatprep.subr.bf16.mxu1 %v8842_v7  ;;  %7452 = vmatpush3.bf16.msra.mxu0 %v8976_v11  ;;  %vm214_vm2 = vcmp.ge.s32.totalorder %v9029_v41, 64  ;;  %vm215_vm3 = vcmp.lt.s32.totalorder %v9029_v41, 96  ;;  %s6182_s0 = sshll.u32 %s8850_s2, 4  ;;  %s6183_s0 = int_to_ptr.vmem [resolvable:$true] %s6182_s0 }
  0x14   :  { %7459 = vmatprep.subr.bf16.mxu0 %v8842_v7  ;;  %vm9033_vm4 = vmand %vm214_vm2, %vm215_vm3  ;;  %p8823_p1 = scmp.lt.s32.totalorder %s6183_s0, %s6183_s0 }
  0x15   :  { %6719 = vmatmul.mubr.msk.f32.gmra.mrb[4].mxu1 %vm74_vm0, %v59_v14 }
  0x16   :  { %6721 = vmatprep.mubr.msk.f32.mxu1 %vm74_vm0, %v60_v15 }
  0x19   :  { %6722 = vmatmul.mubr.msk.f32.gmra.mrb[6].mxu1 %vm74_vm0, %v61_v16 }
  0x1a   :  { %6732 = vmatprep.mubr.msk.f32.mxu1 %vm8843_vm1, %v8844_v13 }
  0x1d   :  { %6733 = vmatmul.mubr.f32.vlgmr.msra.gmra.mrb[8].mxu1 %v8844_v13 }
  0x1e   :  { %7443 = vmatpush3.bf16.msra.mxu1 %v8960_v6  ;;  %6743 = vmatprep.mubr.msk.f32.mxu1 %vm8843_vm1, %v8844_v13 }
  0x1f   :  { %7444 = vmatprep.subr.bf16.mxu1 %v8842_v7 }
  0x22   :  { %7446 = vmatpush3.bf16.msra.mxu1 %v8976_v11 }
  0x23   :  { %7453 = vmatprep.subr.bf16.mxu1 %v8842_v7 }
  0xe0   :  { %v6714_v18 = vpop.f32.mrb[0].mxu1 }
  0xe1   :  { %v171_v19 = vadd.f32 %v6714_v18, %v6198_v17  ;;  %v165_v20 = vpop.f32.mrb[1].mxu1 }
  0xe2   :  { %v166_v33 = vadd.f32 %v6198_v17, %v165_v20 }
  0xe4   :  { %v6717_v21 = vpop.f32.mrb[2].mxu1 }
  0xe5   :  { %v9016_v22 = vadd.f32 %v6717_v21, %v6198_v17  ;;  %v175_v23 = vpop.f32.mrb[3].mxu1 }
  0xe6   :  { %v9018_v24 = vadd.f32 %v6198_v17, %v175_v23 }
  0xe8   :  { %v6720_v25 = vpop.f32.mrb[4].mxu1 }
  0xe9   :  { %v9020_v26 = vadd.f32 %v6720_v25, %v6198_v17  ;;  %v185_v27 = vpop.f32.mrb[5].mxu1 }
  0xea   :  { %v9022_v28 = vadd.f32 %v6198_v17, %v185_v27 }
  0xec   :  { %v6723_v29 = vpop.f32.mrb[6].mxu1 }
  0xed   :  { %v9024_v30 = vadd.f32 %v6723_v29, %v6198_v17  ;;  %v195_v31 = vpop.f32.mrb[7].mxu1 }
  0xee   :  { %v9026_v32 = vadd.f32 %v6198_v17, %v195_v31 }
  0xf0   :  { %v288_v34 = vpop.f32.mrb[8].mxu1 }
  0xf1   :  { %v292_v35 = vadd.f32 %v288_v34, %v166_v33  ;;  %v6734_v36 = vpop.f32.mrb[9].mxu1 }
  0xf3   :  { %v6207_v37 = vmul.f32 -1.442695, %v292_v35 }
  0xf5   :  { %8366 = vpow2.f32 %v6207_v37 }
  0xf6   :  { %8368 = vtanh.f32 %v292_v35 }
  0xff   :  { %v8367_v38 = vpop.eup %8366 }
 0x100   :  { %v297_v40 = vadd.f32 1.0, %v8367_v38  ;;  %v8369_v43 = vpop.eup %8368 }
 0x102   :  { %8370 = vrcp.f32 %v297_v40 }
 0x10c   :  { %v8371_v44 = vpop.eup %8370 }
 0x10d   :  { %v300_v45 = vsel %vm9033_vm4, %v8369_v43, %v8371_v44 }
 0x10e   :  { %303 = vrot.lane.b32.xlu0 %v300_v45, %s8845_s3  ;;  %v301_v48 = vmul.f32 0.0, %v300_v45 }
 0x180   :  { %v304_v46 = vpop.permute.xlu0 %303 }
 0x181   :  { %v306_v47 = vmul.f32 %v304_v46, %v300_v45 }
 0x183   :  { %308 = vrot.lane.b32.xlu0 %v306_v47, %s8846_s21 }
 0x1f5   :  { %v309_v49 = vpop.permute.xlu0 %308 }
 0x1f6   :  { %v311_v50 = vadd.f32 %v309_v49, %v301_v48 }
 0x1f8   :  { %8372 = vtanh.f32 %v311_v50 }
 0x202   :  { %v8373_v51 = vpop.eup %8372 }
 0x203   :  { %314 = vrot.lane.b32.xlu1 %v8373_v51, %s8845_s3 }
 0x275   :  { %v315_v52 = vpop.permute.xlu1 %314 }
 0x276   :  { %v317_v53 = vmul.f32 %v315_v52, %v300_v45 }
 0x278   :  { %319 = vrot.lane.b32.xlu1 %v317_v53, %s8846_s21 }
 0x2ea   :  { %v320_v54 = vpop.permute.xlu1 %319 }
 0x2eb   :  { %322 = vst.msk [vmem:[#allocation3] sm:$0xff] %vm218_vm5, %v320_v54  ;;  %6744 = vmatmul.mubr.msk.f32.vlgmr.msra.gmra.mrb[10].mxu1 %vm218_vm5, %v320_v54 }
 0x2ec   :  { %7455 = vmatpush3.bf16.msra.mxu1 %v8960_v6  ;;  %6765 = vmatprep.mubr.msk.f32.mxu1 %vm8843_vm1, %v8844_v13 }
 0x2ed   :  { %7456 = vmatprep.subr.bf16.mxu1 %v8842_v7 }
 0x2f0   :  { %7458 = vmatpush3.bf16.msra.mxu1 %v8976_v11 }
 0x2f1   :  { %7465 = vmatprep.subr.bf16.mxu1 %v8842_v7 }
 0x3be   :  { %v393_v55 = vpop.f32.mrb[10].mxu1 }
 0x3bf   :  { %v397_v56 = vadd.f32 %v393_v55, %v171_v19  ;;  %v6745_v57 = vpop.f32.mrb[11].mxu1 }
 0x3c1   :  { %v6209_v58 = vmul.f32 -1.442695, %v397_v56 }
 0x3c3   :  { %8374 = vpow2.f32 %v6209_v58 }
 0x3c4   :  { %8376 = vtanh.f32 %v397_v56 }
 0x3cd   :  { %v8375_v59 = vpop.eup %8374 }
 0x3ce   :  { %v402_v60 = vadd.f32 1.0, %v8375_v59  ;;  %v8377_v61 = vpop.eup %8376 }
 0x3d0   :  { %8378 = vrcp.f32 %v402_v60 }
 0x3da   :  { %v8379_v62 = vpop.eup %8378 }
 0x3db   :  { %v405_v63 = vsel %vm9033_vm4, %v8377_v61, %v8379_v62 }
 0x3dc   :  { %408 = vrot.lane.b32.xlu0 %v405_v63, %s8845_s3  ;;  %v406_v2 = vmul.f32 %v405_v63, %v311_v50 }
 0x44e   :  { %v409_v0 = vpop.permute.xlu0 %408 }
 0x44f   :  { %v411_v1 = vmul.f32 %v409_v0, %v405_v63 }
 0x451   :  { %413 = vrot.lane.b32.xlu1 %v411_v1, %s8846_s21 }
 0x4c3   :  { %v414_v3 = vpop.permute.xlu1 %413 }
 0x4c4   :  { %v416_v4 = vadd.f32 %v414_v3, %v406_v2 }
 0x4c6   :  { %8380 = vtanh.f32 %v416_v4 }
 0x4d0   :  { %v8381_v5 = vpop.eup %8380 }
 0x4d1   :  { %419 = vrot.lane.b32.xlu0 %v8381_v5, %s8845_s3 }
 0x543   :  { %v420_v8 = vpop.permute.xlu0 %419 }
 0x544   :  { %v422_v9 = vmul.f32 %v420_v8, %v405_v63 }
 0x546   :  { %424 = vrot.lane.b32.xlu1 %v422_v9, %s8846_s21 }
 0x5b8   :  { %v425_v10 = vpop.permute.xlu1 %424 }
 0x5b9   :  { %428 = vst.msk [vmem:[#allocation3 + $0x8] sm:$0xff] %vm218_vm5, %v425_v10  ;;  %6755 = vmatmul.mubr.msk.f32.vlgmr.msra.gmra.mrb[0].mxu0 %vm218_vm5, %v425_v10 }
 0x5ba   :  { %7461 = vmatpush3.bf16.msra.mxu0 %v8960_v6  ;;  %6776 = vmatprep.mubr.msk.f32.mxu0 %vm8843_vm1, %v8844_v13 }
 0x5bb   :  { %7462 = vmatprep.subr.bf16.mxu0 %v8842_v7 }
 0x5be   :  { %7464 = vmatpush3.bf16.msra.mxu0 %v8976_v11 }
 0x5bf   :  { %7471 = vmatprep.subr.bf16.mxu0 %v8842_v7 }
 0x68c   :  { %v499_v12 = vpop.f32.mrb[0].mxu0 }
 0x68d   :  { %v503_v14 = vadd.f32 %v499_v12, %v9018_v24  ;;  %v6756_v15 = vpop.f32.mrb[1].mxu0 }
 0x68f   :  { %v6211_v16 = vmul.f32 -1.442695, %v503_v14 }
 0x691   :  { %8382 = vpow2.f32 %v6211_v16 }
 0x692   :  { %8384 = vtanh.f32 %v503_v14 }
 0x69b   :  { %v8383_v17 = vpop.eup %8382 }
 0x69c   :  { %v508_v18 = vadd.f32 1.0, %v8383_v17  ;;  %v8385_v19 = vpop.eup %8384 }
 0x69e   :  { %8386 = vrcp.f32 %v508_v18 }
 0x6a8   :  { %v8387_v20 = vpop.eup %8386 }
 0x6a9   :  { %v511_v21 = vsel %vm9033_vm4, %v8385_v19, %v8387_v20 }
 0x6aa   :  { %514 = vrot.lane.b32.xlu0 %v511_v21, %s8845_s3  ;;  %v512_v27 = vmul.f32 %v511_v21, %v416_v4 }
 0x71c   :  { %v515_v23 = vpop.permute.xlu0 %514 }
 0x71d   :  { %v517_v25 = vmul.f32 %v515_v23, %v511_v21 }
 0x71f   :  { %519 = vrot.lane.b32.xlu1 %v517_v25, %s8846_s21 }
 0x791   :  { %v520_v24 = vpop.permute.xlu1 %519 }
 0x792   :  { %v522_v29 = vadd.f32 %v520_v24, %v512_v27  ;;  %v1073_v27 = vld [vmem:[%s10791_s4] sm:$0xff]  ;;  %v1074_v24 = vld [vmem:[%s10791_s4 + $0x8] sm:$0xff] }
 0x794   :  { %8388 = vtanh.f32 %v522_v29 }
 0x79e   :  { %v8389_v31 = vpop.eup %8388 }
 0x79f   :  { %525 = vrot.lane.b32.xlu0 %v8389_v31, %s8845_s3 }
 0x811   :  { %v526_v33 = vpop.permute.xlu0 %525 }
 0x812   :  { %v528_v34 = vmul.f32 %v526_v33, %v511_v21 }
 0x814   :  { %530 = vrot.lane.b32.xlu1 %v528_v34, %s8846_s21 }
 0x886   :  { %v531_v35 = vpop.permute.xlu1 %530 }
 0x887   :  { %534 = vst.msk [vmem:[#allocation3 + $0x10] sm:$0xff] %vm218_vm5, %v531_v35  ;;  %6766 = vmatmul.mubr.msk.f32.vlgmr.msra.gmra.mrb[12].mxu1 %vm218_vm5, %v531_v35  ;;  %v1075_v35 = vld [vmem:[%s10791_s4 + $0x10] sm:$0xff] }
 0x888   :  { %7467 = vmatpush3.bf16.msra.mxu1 %v8960_v6  ;;  %6787 = vmatprep.mubr.msk.f32.mxu1 %vm8843_vm1, %v8844_v13 }
 0x889   :  { %7468 = vmatprep.subr.bf16.mxu1 %v8842_v7 }
 0x88c   :  { %7470 = vmatpush3.bf16.msra.mxu1 %v8976_v11 }
 0x88d   :  { %7477 = vmatprep.subr.bf16.mxu1 %v8842_v7 }
 0x95a   :  { %v605_v36 = vpop.f32.mrb[12].mxu1 }
 0x95b   :  { %v609_v37 = vadd.f32 %v605_v36, %v9016_v22  ;;  %v6767_v38 = vpop.f32.mrb[13].mxu1  ;;  %v1076_v36 = vld [vmem:[%s10791_s4 + $0x18] sm:$0xff] }
 0x95d   :  { %v6213_v40 = vmul.f32 -1.442695, %v609_v37 }
 0x95f   :  { %8390 = vpow2.f32 %v6213_v40  ;;  %v1065_v40 = vld [vmem:[#allocation3] sm:$0xff] }
 0x960   :  { %8392 = vtanh.f32 %v609_v37  ;;  %v7487_v37 = vpack.c.bf16 %v1076_v36, %v1075_v35 }
 0x969   :  { %v8391_v43 = vpop.eup %8390 }
 0x96a   :  { %v614_v44 = vadd.f32 1.0, %v8391_v43  ;;  %v8393_v45 = vpop.eup %8392  ;;  %v1066_v43 = vld [vmem:[#allocation3 + $0x8] sm:$0xff] }
 0x96c   :  { %8394 = vrcp.f32 %v614_v44  ;;  %v1067_v44 = vld [vmem:[#allocation3 + $0x10] sm:$0xff] }
 0x976   :  { %v8395_v46 = vpop.eup %8394 }
 0x977   :  { %v617_v47 = vsel %vm9033_vm4, %v8393_v45, %v8395_v46 }
 0x978   :  { %620 = vrot.lane.b32.xlu0 %v617_v47, %s8845_s3  ;;  %v618_v50 = vmul.f32 %v617_v47, %v522_v29  ;;  %v7483_v29 = vpack.c.bf16 %v1074_v24, %v1073_v27 }
 0x9ea   :  { %v621_v48 = vpop.permute.xlu0 %620 }
 0x9eb   :  { %v623_v49 = vmul.f32 %v621_v48, %v617_v47 }
 0x9ed   :  { %625 = vrot.lane.b32.xlu1 %v623_v49, %s8846_s21 }
 0xa5f   :  { %v626_v22 = vpop.permute.xlu1 %625 }
 0xa60   :  { %v628_v51 = vadd.f32 %v626_v22, %v618_v50 }
 0xa62   :  { %8396 = vtanh.f32 %v628_v51 }
 0xa6c   :  { %v8397_v52 = vpop.eup %8396 }
 0xa6d   :  { %631 = vrot.lane.b32.xlu0 %v8397_v52, %s8845_s3 }
 0xadf   :  { %v632_v53 = vpop.permute.xlu0 %631 }
 0xae0   :  { %v634_v54 = vmul.f32 %v632_v53, %v617_v47 }
 0xae2   :  { %636 = vrot.lane.b32.xlu1 %v634_v54, %s8846_s21 }
 0xb54   :  { %v637_v55 = vpop.permute.xlu1 %636 }
 0xb55   :  { %640 = vst.msk [vmem:[#allocation3 + $0x18] sm:$0xff] %vm218_vm5, %v637_v55  ;;  %6777 = vmatmul.mubr.msk.f32.vlgmr.msra.gmra.mrb[2].mxu0 %vm218_vm5, %v637_v55 }
 0xb56   :  { %7473 = vmatpush3.bf16.msra.mxu0 %v8960_v6  ;;  %6798 = vmatprep.mubr.msk.f32.mxu0 %vm8843_vm1, %v8844_v13 }
 0xb57   :  { %7474 = vmatprep.subr.bf16.mxu0 %v8842_v7 }
 0xb5a   :  { %7476 = vmatpush3.bf16.msra.mxu0 %v8976_v11 }
 0xb5b   :  { %7484 = vmatprep.subr.bf16.mxu0 %v7483_v29 }
 0xb5c   :  { %v1068_v45 = vld [vmem:[#allocation3 + $0x18] sm:$0xff] }
 0xc28   :  { %v711_v56 = vpop.f32.mrb[2].mxu0 }
 0xc29   :  { %v715_v57 = vadd.f32 %v711_v56, %v9022_v28  ;;  %v6778_v58 = vpop.f32.mrb[3].mxu0 }
 0xc2b   :  { %v6215_v59 = vmul.f32 -1.442695, %v715_v57 }
 0xc2d   :  { %8398 = vpow2.f32 %v6215_v59 }
 0xc2e   :  { %8400 = vtanh.f32 %v715_v57 }
 0xc37   :  { %v8399_v60 = vpop.eup %8398 }
 0xc38   :  { %v720_v61 = vadd.f32 1.0, %v8399_v60  ;;  %v8401_v62 = vpop.eup %8400 }
 0xc3a   :  { %8402 = vrcp.f32 %v720_v61 }
 0xc44   :  { %v8403_v63 = vpop.eup %8402 }
 0xc45   :  { %v723_v0 = vsel %vm9033_vm4, %v8401_v62, %v8403_v63 }
 0xc46   :  { %726 = vrot.lane.b32.xlu0 %v723_v0, %s8845_s3  ;;  %v724_v3 = vmul.f32 %v723_v0, %v628_v51 }
 0xcb8   :  { %v727_v1 = vpop.permute.xlu0 %726 }
 0xcb9   :  { %v729_v2 = vmul.f32 %v727_v1, %v723_v0 }
 0xcbb   :  { %731 = vrot.lane.b32.xlu1 %v729_v2, %s8846_s21 }
 0xd2d   :  { %v732_v28 = vpop.permute.xlu1 %731 }
 0xd2e   :  { %v734_v4 = vadd.f32 %v732_v28, %v724_v3  ;;  %v1077_v3 = vld [vmem:[%s10792_s5] sm:$0xff]  ;;  %v1078_v28 = vld [vmem:[%s10792_s5 + $0x8] sm:$0xff] }
 0xd30   :  { %8404 = vtanh.f32 %v734_v4 }
 0xd3a   :  { %v8405_v5 = vpop.eup %8404 }
 0xd3b   :  { %737 = vrot.lane.b32.xlu0 %v8405_v5, %s8845_s3  ;;  %v1079_v5 = vld [vmem:[%s10792_s5 + $0x10] sm:$0xff] }
 0xdad   :  { %v738_v8 = vpop.permute.xlu0 %737 }
 0xdae   :  { %v740_v9 = vmul.f32 %v738_v8, %v723_v0  ;;  %v1080_v8 = vld [vmem:[%s10792_s5 + $0x18] sm:$0xff] }
 0xdb0   :  { %742 = vrot.lane.b32.xlu1 %v740_v9, %s8846_s21  ;;  %v9172_v9 = vpack.c.bf16 %v1080_v8, %v1079_v5 }
 0xe22   :  { %v743_v10 = vpop.permute.xlu1 %742 }
 0xe23   :  { %746 = vst.msk [vmem:[#allocation3 + $0x20] sm:$0xff] %vm218_vm5, %v743_v10  ;;  %6788 = vmatmul.mubr.msk.f32.vlgmr.msra.gmra.mrb[14].mxu1 %vm218_vm5, %v743_v10 }
 0xe24   :  { %7479 = vmatpush3.bf16.msra.mxu1 %v8960_v6  ;;  %6809 = vmatprep.mubr.msk.f32.mxu1 %vm8843_vm1, %v8844_v13 }
 0xe25   :  { %7480 = vmatprep.subr.bf16.mxu1 %v8842_v7 }
 0xe28   :  { %7482 = vmatpush3.bf16.msra.mxu1 %v8976_v11 }
 0xe29   :  { %7491 = vmatprep.subr.bf16.mxu1 %v8842_v7 }
 0xe2a   :  { %v1069_v46 = vld [vmem:[#allocation3 + $0x20] sm:$0xff] }
 0xef6   :  { %v817_v12 = vpop.f32.mrb[14].mxu1 }
 0xef7   :  { %v821_v14 = vadd.f32 %v817_v12, %v9020_v26  ;;  %v6789_v15 = vpop.f32.mrb[15].mxu1 }
 0xef9   :  { %v6217_v16 = vmul.f32 -1.442695, %v821_v14 }
 0xefb   :  { %8406 = vpow2.f32 %v6217_v16 }
 0xefc   :  { %8408 = vtanh.f32 %v821_v14 }
 0xf05   :  { %v8407_v17 = vpop.eup %8406 }
 0xf06   :  { %v826_v18 = vadd.f32 1.0, %v8407_v17  ;;  %v8409_v6 = vpop.eup %8408 }
 0xf08   :  { %8410 = vrcp.f32 %v826_v18 }
 0xf12   :  { %v8411_v19 = vpop.eup %8410 }
 0xf13   :  { %v829_v20 = vsel %vm9033_vm4, %v8409_v6, %v8411_v19  ;;  %v9197_v6 = vld [vmem:[%s10793_s6] ss:$0 sm:$0xff] }
 0xf14   :  { %832 = vrot.lane.b32.xlu0 %v829_v20, %s8845_s3  ;;  %v830_v23 = vmul.f32 %v829_v20, %v734_v4  ;;  %v9162_v4 = vpack.c.bf16 %v1078_v28, %v1077_v3 }
 0xf86   :  { %v833_v11 = vpop.permute.xlu0 %832 }
 0xf87   :  { %v835_v21 = vmul.f32 %v833_v11, %v829_v20 }
 0xf89   :  { %837 = vrot.lane.b32.xlu1 %v835_v21, %s8846_s21 }
 0xffb   :  { %v838_v26 = vpop.permute.xlu1 %837 }
 0xffc   :  { %v840_v25 = vadd.f32 %v838_v26, %v830_v23 }
 0xffe   :  { %8412 = vtanh.f32 %v840_v25 }
0x1008   :  { %v8413_v31 = vpop.eup %8412 }
0x1009   :  { %843 = vrot.lane.b32.xlu0 %v8413_v31, %s8845_s3 }
0x107b   :  { %v844_v33 = vpop.permute.xlu0 %843 }
0x107c   :  { %v846_v34 = vmul.f32 %v844_v33, %v829_v20 }
0x107e   :  { %848 = vrot.lane.b32.xlu1 %v846_v34, %s8846_s21 }
0x10f0   :  { %v849_v38 = vpop.permute.xlu1 %848 }
0x10f1   :  { %852 = vst.msk [vmem:[#allocation3 + $0x28] sm:$0xff] %vm218_vm5, %v849_v38  ;;  %6799 = vmatmul.mubr.msk.f32.vlgmr.msra.gmra.mrb[4].mxu0 %vm218_vm5, %v849_v38 }
0x10f2   :  { %7486 = vmatpush3.bf16.msra.mxu0 %v7483_v29  ;;  %6820 = vmatprep.mubr.msk.f32.mxu0 %vm218_vm5, %v1065_v40 }
0x10f3   :  { %7488 = vmatprep.subr.bf16.mxu0 %v7487_v37 }
0x10f6   :  { %7490 = vmatpush3.bf16.msra.mxu0 %v7487_v37 }
0x10f7   :  { %7503 = vmatprep.subr.bf16.mxu0 %v8842_v7 }
0x10f8   :  { %v1070_v47 = vld [vmem:[#allocation3 + $0x28] sm:$0xff] }
0x10f9   :  { %6821 = vmatmul.mubr.msk.f32.vlgmr.msra.gmra.mrb[6].mxu0 %vm218_vm5, %v1066_v43 }
0x10fa   :  { %6823 = vmatprep.mubr.msk.f32.mxu0 %vm218_vm5, %v1067_v44  ;;  %7505 = vmatpush3.bf16.msra.mxu0 %v9162_v4 }
0x10fb   :  { %7506 = vmatprep.subr.bf16.mxu0 %v8842_v7 }
0x10fd   :  { %6824 = vmatmul.mubr.msk.f32.gmra.mrb[8].mxu0 %vm218_vm5, %v1068_v45 }
0x10fe   :  { %6826 = vmatprep.mubr.msk.f32.mxu0 %vm218_vm5, %v1069_v46  ;;  %7508 = vmatpush3.bf16.msra.mxu0 %v9172_v9 }
0x10ff   :  { %7515 = vmatprep.subr.bf16.mxu0 %v8842_v7 }
0x1101   :  { %6827 = vmatmul.mubr.msk.f32.gmra.mrb[10].mxu0 %vm218_vm5, %v1070_v47 }
0x11c4   :  { %v923_v48 = vpop.f32.mrb[4].mxu0 }
0x11c5   :  { %v927_v49 = vadd.f32 %v923_v48, %v9026_v32  ;;  %v6800_v50 = vpop.f32.mrb[5].mxu0 }
0x11c7   :  { %v6219_v22 = vmul.f32 -1.442695, %v927_v49 }
0x11c9   :  { %8414 = vpow2.f32 %v6219_v22 }
0x11ca   :  { %8416 = vtanh.f32 %v927_v49 }
0x11cc   :  { %v9138_v51 = vpop.f32.mrb[6].mxu0 }
0x11cd   :  { %v1178_v52 = vpop.f32.mrb[7].mxu0 }
0x11ce   :  { %v1179_v19 = vadd.f32 %v9197_v6, %v1178_v52 }
0x11d0   :  { %v9140_v53 = vpop.f32.mrb[8].mxu0 }
0x11d1   :  { %v9142_v54 = vpop.f32.mrb[9].mxu0 }
0x11d3   :  { %v8415_v55 = vpop.eup %8414 }
0x11d4   :  { %v932_v56 = vadd.f32 1.0, %v8415_v55  ;;  %v9144_v57 = vpop.f32.mrb[10].mxu0  ;;  %v8417_v59 = vpop.eup %8416 }
0x11d5   :  { %v9146_v58 = vpop.f32.mrb[11].mxu0 }
0x11d6   :  { %8418 = vrcp.f32 %v932_v56 }
0x11e0   :  { %v8419_v32 = vpop.eup %8418 }
0x11e1   :  { %v935_v60 = vsel %vm9033_vm4, %v8417_v59, %v8419_v32 }
0x11e2   :  { %938 = vrot.lane.b32.xlu0 %v935_v60, %s8845_s3  ;;  %v936_v63 = vmul.f32 %v935_v60, %v840_v25 }
0x1254   :  { %v939_v61 = vpop.permute.xlu0 %938 }
0x1255   :  { %v941_v62 = vmul.f32 %v939_v61, %v935_v60 }
0x1257   :  { %943 = vrot.lane.b32.xlu1 %v941_v62, %s8846_s21 }
0x12c9   :  { %v944_v0 = vpop.permute.xlu1 %943 }
0x12ca   :  { %v9152_v1 = vadd.f32 %v944_v0, %v936_v63 }
0x12cc   :  { %8420 = vtanh.f32 %v9152_v1 }
0x12d6   :  { %v8421_v2 = vpop.eup %8420 }
0x12d7   :  { %949 = vrot.lane.b32.xlu0 %v8421_v2, %s8845_s3 }
0x1349   :  { %v950_v10 = vpop.permute.xlu0 %949 }
0x134a   :  { %v952_v12 = vmul.f32 %v950_v10, %v935_v60  ;;  %v1184_v60 = vadd.f32 %v9138_v51, %v9197_v6 }
0x134c   :  { %954 = vrot.lane.b32.xlu1 %v952_v12, %s8846_s21 }
0x13be   :  { %v955_v14 = vpop.permute.xlu1 %954 }
0x13bf   :  { %958 = vst.msk [vmem:[#allocation3 + $0x30] sm:$0xff] %vm218_vm5, %v955_v14  ;;  %6810 = vmatmul.mubr.msk.f32.vlgmr.msra.gmra.mrb[16].mxu1 %vm218_vm5, %v955_v14 }
0x13c0   :  { %7493 = vmatpush3.bf16.msra.mxu1 %v9162_v4  ;;  %6840 = vmatprep.mubr.msk.f32.mxu1 %vm8843_vm1, %v8844_v13 }
0x13c1   :  { %7494 = vmatprep.subr.bf16.mxu1 %v8842_v7 }
0x13c4   :  { %7496 = vmatpush3.bf16.msra.mxu1 %v9172_v9 }
0x13c5   :  { %7497 = vmatprep.subr.bf16.mxu1 %v8842_v7 }
0x13c6   :  { %v1071_v15 = vld [vmem:[#allocation3 + $0x30] sm:$0xff] }
0x13c7   :  { %6841 = vmatmul.mubr.f32.vlgmr.msra.gmra.mrb[18].mxu1 %v8844_v13  ;;  %6829 = vmatprep.mubr.msk.f32.mxu0 %vm218_vm5, %v1071_v15 }
0x13c8   :  { %7499 = vmatpush3.bf16.msra.mxu1 %v9162_v4  ;;  %6851 = vmatprep.mubr.msk.f32.mxu1 %vm8843_vm1, %v8844_v13 }
0x13c9   :  { %7500 = vmatprep.subr.bf16.mxu1 %v8842_v7 }
0x13cc   :  { %7502 = vmatpush3.bf16.msra.mxu1 %v9172_v9 }
0x13cd   :  { %7509 = vmatprep.subr.bf16.mxu1 %v8842_v7 }
0x1492   :  { %v1029_v16 = vpop.f32.mrb[16].mxu1 }
0x1493   :  { %v1033_v17 = vadd.f32 %v1029_v16, %v9024_v30  ;;  %v6811_v18 = vpop.f32.mrb[17].mxu1 }
0x1495   :  { %v6221_v33 = vmul.f32 -1.442695, %v1033_v17 }
0x149a   :  { %v1292_v20 = vpop.f32.mrb[18].mxu1 }
0x149b   :  { %v1296_v11 = vadd.f32 %v1292_v20, %v1179_v19  ;;  %v6842_v21 = vpop.f32.mrb[19].mxu1 }
0x149d   :  { %v6231_v23 = vmul.f32 -1.442695, %v1296_v11 }
0x149f   :  { %8422 = vpow2.f32 %v6231_v23  ;;  %v1189_v23 = vadd.f32 %v9197_v6, %v9142_v54 }
0x14a0   :  { %8424 = vtanh.f32 %v1296_v11 }
0x14a9   :  { %v8423_v26 = vpop.eup %8422 }
0x14aa   :  { %v1301_v25 = vadd.f32 1.0, %v8423_v26  ;;  %v8425_v27 = vpop.eup %8424 }
0x14ac   :  { %8426 = vrcp.f32 %v1301_v25 }
0x14ad   :  { %8428 = vpow2.f32 %v6221_v33 }
0x14b6   :  { %v8427_v24 = vpop.eup %8426 }
0x14b7   :  { %v1304_v30 = vsel %vm9033_vm4, %v8425_v27, %v8427_v24  ;;  %v8429_v34 = vpop.eup %8428 }
0x14b8   :  { %1307 = vrot.lane.b32.xlu0 %v1304_v30, %s8845_s3  ;;  %v1305_v35 = vmul.f32 0.0, %v1304_v30  ;;  %v1038_v36 = vadd.f32 1.0, %v8429_v34 }
0x152a   :  { %v1308_v29 = vpop.permute.xlu0 %1307 }
0x152b   :  { %v1310_v31 = vmul.f32 %v1308_v29, %v1304_v30 }
0x152d   :  { %1312 = vrot.lane.b32.xlu1 %v1310_v31, %s8846_s21 }
0x159f   :  { %v1313_v37 = vpop.permute.xlu1 %1312 }
0x15a0   :  { %v1315_v38 = vadd.f32 %v1313_v37, %v1305_v35 }
0x15a2   :  { %8430 = vtanh.f32 %v1315_v38 }
0x15a3   :  { %8432 = vrcp.f32 %v1038_v36 }
0x15a4   :  { %8434 = vtanh.f32 %v1033_v17 }
0x15ac   :  { %v8431_v40 = vpop.eup %8430 }
0x15ad   :  { %v8433_v43 = vpop.eup %8432  ;;  %1318 = vrot.lane.b32.xlu0 %v8431_v40, %s8845_s3 }
0x15ae   :  { %v8435_v44 = vpop.eup %8434 }
0x15af   :  { %v1041_v45 = vsel %vm9033_vm4, %v8435_v44, %v8433_v43 }
0x15b0   :  { %v1042_v22 = vmul.f32 %v1041_v45, %v9152_v1 }
0x15b1   :  { %1044 = vrot.lane.b32.xlu0 %v1041_v45, %s8845_s3 }
0x161f   :  { %v1319_v46 = vpop.permute.xlu0 %1318 }
0x1620   :  { %v1321_v47 = vmul.f32 %v1319_v46, %v1304_v30  ;;  %v1194_v46 = vadd.f32 %v9140_v53, %v9197_v6 }
0x1622   :  { %1323 = vrot.lane.b32.xlu1 %v1321_v47, %s8846_s21 }
0x1623   :  { %v1045_v48 = vpop.permute.xlu0 %1044 }
0x1624   :  { %v1047_v49 = vmul.f32 %v1045_v48, %v1041_v45 }
0x1626   :  { %1049 = vrot.lane.b32.xlu0 %v1047_v49, %s8846_s21 }
0x1694   :  { %v1324_v50 = vpop.permute.xlu1 %1323 }
0x1695   :  { %1326 = vst.msk [vmem:[#allocation3] sm:$0xff] %vm218_vm5, %v1324_v50  ;;  %6852 = vmatmul.mubr.msk.f32.vlgmr.msra.gmra.mrb[20].mxu1 %vm218_vm5, %v1324_v50 }
0x1696   :  { %7511 = vmatpush3.bf16.msra.mxu1 %v9162_v4  ;;  %6873 = vmatprep.mubr.msk.f32.mxu1 %vm8843_vm1, %v8844_v13 }
0x1697   :  { %7512 = vmatprep.subr.bf16.mxu1 %v8842_v7 }
0x1698   :  { %v1050_v52 = vpop.permute.xlu0 %1049 }
0x1699   :  { %v1052_v55 = vadd.f32 %v1050_v52, %v1042_v22 }
0x169a   :  { %7514 = vmatpush3.bf16.msra.mxu1 %v9172_v9 }
0x169b   :  { %8436 = vtanh.f32 %v1052_v55  ;;  %7521 = vmatprep.subr.bf16.mxu1 %v8842_v7 }
0x16a5   :  { %v8437_v56 = vpop.eup %8436 }
0x16a6   :  { %1055 = vrot.lane.b32.xlu0 %v8437_v56, %s8845_s3 }
0x1718   :  { %v1056_v59 = vpop.permute.xlu0 %1055 }
0x1719   :  { %v1058_v32 = vmul.f32 %v1056_v59, %v1041_v45 }
0x171b   :  { %1060 = vrot.lane.b32.xlu0 %v1058_v32, %s8846_s21 }
0x1768   :  { %v1396_v61 = vpop.f32.mrb[20].mxu1 }
0x1769   :  { %v1400_v62 = vadd.f32 %v1396_v61, %v1184_v60  ;;  %v6853_v63 = vpop.f32.mrb[21].mxu1 }
0x176b   :  { %v6233_v0 = vmul.f32 -1.442695, %v1400_v62 }
0x176d   :  { %8438 = vpow2.f32 %v6233_v0 }
0x176e   :  { %8440 = vtanh.f32 %v1400_v62 }
0x1777   :  { %v8439_v1 = vpop.eup %8438 }
0x1778   :  { %v1405_v2 = vadd.f32 1.0, %v8439_v1  ;;  %v8441_v3 = vpop.eup %8440 }
0x177a   :  { %8442 = vrcp.f32 %v1405_v2 }
0x1784   :  { %v8443_v28 = vpop.eup %8442 }
0x1785   :  { %v1408_v5 = vsel %vm9033_vm4, %v8441_v3, %v8443_v28  ;;  %v1199_v3 = vadd.f32 %v9197_v6, %v9146_v58 }
0x1786   :  { %1411 = vrot.lane.b32.xlu1 %v1408_v5, %s8845_s3  ;;  %v1409_v16 = vmul.f32 %v1408_v5, %v1315_v38 }
0x178d   :  { %v1061_v8 = vpop.permute.xlu0 %1060 }
0x178e   :  { %1064 = vst.msk [vmem:[#allocation3 + $0x38] sm:$0xff] %vm218_vm5, %v1061_v8 }
0x1795   :  { %v1072_v51 = vld [vmem:[#allocation3 + $0x38] sm:$0xff] }
0x1796   :  { %6830 = vmatmul.mubr.msk.f32.gmra.mrb[12].mxu0 %vm218_vm5, %v1072_v51 }
0x1797   :  { %6862 = vmatprep.mubr.msk.f32.mxu0 %vm8843_vm1, %v8844_v13 }
0x17f8   :  { %v1412_v10 = vpop.permute.xlu1 %1411 }
0x17f9   :  { %v1414_v12 = vmul.f32 %v1412_v10, %v1408_v5 }
0x17fb   :  { %1416 = vrot.lane.b32.xlu1 %v1414_v12, %s8846_s21 }
0x1869   :  { %v9231_v14 = vpop.f32.mrb[12].mxu0 }
0x186a   :  { %v9233_v15 = vpop.f32.mrb[13].mxu0 }
0x186d   :  { %v1417_v17 = vpop.permute.xlu1 %1416 }
0x186e   :  { %v1419_v18 = vadd.f32 %v1417_v17, %v1409_v16 }
0x1870   :  { %8444 = vtanh.f32 %v1419_v18 }
0x187a   :  { %v8445_v19 = vpop.eup %8444 }
0x187b   :  { %1422 = vrot.lane.b32.xlu1 %v8445_v19, %s8845_s3 }
0x18ed   :  { %v1423_v20 = vpop.permute.xlu1 %1422 }
0x18ee   :  { %v1425_v11 = vmul.f32 %v1423_v20, %v1408_v5 }
0x18f0   :  { %1427 = vrot.lane.b32.xlu1 %v1425_v11, %s8846_s21 }
0x1962   :  { %v1428_v21 = vpop.permute.xlu1 %1427 }
0x1963   :  { %1430 = vst.msk [vmem:[#allocation3 + $0x8] sm:$0xff] %vm218_vm5, %v1428_v21  ;;  %6863 = vmatmul.mubr.msk.f32.vlgmr.msra.gmra.mrb[14].mxu0 %vm218_vm5, %v1428_v21 }
0x1964   :  { %7517 = vmatpush3.bf16.msra.mxu0 %v9162_v4  ;;  %6884 = vmatprep.mubr.msk.f32.mxu0 %vm8843_vm1, %v8844_v13 }
0x1965   :  { %7518 = vmatprep.subr.bf16.mxu0 %v8842_v7 }
0x1968   :  { %7520 = vmatpush3.bf16.msra.mxu0 %v9172_v9 }
0x1969   :  { %7527 = vmatprep.subr.bf16.mxu0 %v8842_v7 }
0x1a36   :  { %v1500_v26 = vpop.f32.mrb[14].mxu0 }
0x1a37   :  { %v1504_v25 = vadd.f32 %v1500_v26, %v1189_v23  ;;  %v6864_v27 = vpop.f32.mrb[15].mxu0 }
0x1a39   :  { %v6235_v24 = vmul.f32 -1.442695, %v1504_v25 }
0x1a3b   :  { %8446 = vpow2.f32 %v6235_v24  ;;  %v1204_v24 = vadd.f32 %v9144_v57, %v9197_v6 }
0x1a3c   :  { %8448 = vtanh.f32 %v1504_v25 }
0x1a45   :  { %v8447_v30 = vpop.eup %8446 }
0x1a46   :  { %v1509_v29 = vadd.f32 1.0, %v8447_v30  ;;  %v8449_v31 = vpop.eup %8448 }
0x1a48   :  { %8450 = vrcp.f32 %v1509_v29 }
0x1a52   :  { %v8451_v33 = vpop.eup %8450 }
0x1a53   :  { %v1512_v34 = vsel %vm9033_vm4, %v8449_v31, %v8451_v33 }
0x1a54   :  { %1515 = vrot.lane.b32.xlu0 %v1512_v34, %s8845_s3  ;;  %v1513_v54 = vmul.f32 %v1512_v34, %v1419_v18 }
0x1ac6   :  { %v1516_v35 = vpop.permute.xlu0 %1515 }
0x1ac7   :  { %v1518_v36 = vmul.f32 %v1516_v35, %v1512_v34 }
0x1ac9   :  { %1520 = vrot.lane.b32.xlu1 %v1518_v36, %s8846_s21 }
0x1b3b   :  { %v1521_v37 = vpop.permute.xlu1 %1520 }
0x1b3c   :  { %v1523_v38 = vadd.f32 %v1521_v37, %v1513_v54 }
0x1b3e   :  { %8452 = vtanh.f32 %v1523_v38 }
0x1b48   :  { %v8453_v40 = vpop.eup %8452 }
0x1b49   :  { %1526 = vrot.lane.b32.xlu0 %v8453_v40, %s8845_s3 }
0x1bbb   :  { %v1527_v43 = vpop.permute.xlu0 %1526 }
0x1bbc   :  { %v1529_v44 = vmul.f32 %v1527_v43, %v1512_v34  ;;  %v2064_v43 = vld [vmem:[%s10794_s7 + $0x8] sm:$0xff] }
0x1bbe   :  { %1531 = vrot.lane.b32.xlu1 %v1529_v44, %s8846_s21  ;;  %v2067_v44 = vld [vmem:[%s10794_s7 + $0x20] sm:$0xff] }
0x1c30   :  { %v1532_v45 = vpop.permute.xlu1 %1531 }
0x1c31   :  { %1534 = vst.msk [vmem:[#allocation3 + $0x10] sm:$0xff] %vm218_vm5, %v1532_v45  ;;  %6874 = vmatmul.mubr.msk.f32.vlgmr.msra.gmra.mrb[22].mxu1 %vm218_vm5, %v1532_v45  ;;  %v7539_v45 = vpack.c.bf16 %v2067_v44, %v2064_v43 }
0x1c32   :  { %7523 = vmatpush3.bf16.msra.mxu1 %v9162_v4  ;;  %6895 = vmatprep.mubr.msk.f32.mxu1 %vm8843_vm1, %v8844_v13 }
0x1c33   :  { %7524 = vmatprep.subr.bf16.mxu1 %v8842_v7 }
0x1c36   :  { %7526 = vmatpush3.bf16.msra.mxu1 %v9172_v9 }
0x1c37   :  { %7533 = vmatprep.subr.bf16.mxu1 %v8842_v7 }
0x1d04   :  { %v1604_v47 = vpop.f32.mrb[22].mxu1 }
0x1d05   :  { %v1608_v48 = vadd.f32 %v1604_v47, %v1194_v46  ;;  %v6875_v49 = vpop.f32.mrb[23].mxu1 }
0x1d06   :  { %v2063_v49 = vld [vmem:[%s10794_s7] sm:$0xff] }
0x1d07   :  { %v6237_v50 = vmul.f32 -1.442695, %v1608_v48 }
0x1d09   :  { %8454 = vpow2.f32 %v6237_v50  ;;  %v2066_v50 = vld [vmem:[%s10794_s7 + $0x18] sm:$0xff] }
0x1d0a   :  { %8456 = vtanh.f32 %v1608_v48 }
0x1d13   :  { %v8455_v22 = vpop.eup %8454 }
0x1d14   :  { %v1613_v52 = vadd.f32 1.0, %v8455_v22  ;;  %v8457_v55 = vpop.eup %8456  ;;  %v2070_v22 = vld [vmem:[%s10794_s7 + $0x38] sm:$0xff] }
0x1d16   :  { %8458 = vrcp.f32 %v1613_v52  ;;  %v2073_v52 = vld [vmem:[%s10794_s7 + $0x50] sm:$0xff] }
0x1d20   :  { %v8459_v56 = vpop.eup %8458 }
0x1d21   :  { %v1616_v59 = vsel %vm9033_vm4, %v8457_v55, %v8459_v56  ;;  %v7541_v55 = vpack.c.bf16 %v2066_v50, %v2063_v49  ;;  %v7543_v56 = vpack.c.bf16 %v2073_v52, %v2070_v22 }
0x1d22   :  { %1619 = vrot.lane.b32.xlu0 %v1616_v59, %s8845_s3  ;;  %v1617_v53 = vmul.f32 %v1616_v59, %v1523_v38 }
0x1d94   :  { %v1620_v32 = vpop.permute.xlu0 %1619 }
0x1d95   :  { %v1622_v60 = vmul.f32 %v1620_v32, %v1616_v59  ;;  %v2072_v32 = vld [vmem:[%s10794_s7 + $0x48] sm:$0xff] }
0x1d97   :  { %1624 = vrot.lane.b32.xlu1 %v1622_v60, %s8846_s21 }
0x1e09   :  { %v1625_v61 = vpop.permute.xlu1 %1624 }
0x1e0a   :  { %v1627_v62 = vadd.f32 %v1625_v61, %v1617_v53  ;;  %v2055_v61 = vld [vmem:[#allocation3] sm:$0xff] }
0x1e0c   :  { %8460 = vtanh.f32 %v1627_v62 }
0x1e16   :  { %v8461_v63 = vpop.eup %8460 }
0x1e17   :  { %1630 = vrot.lane.b32.xlu0 %v8461_v63, %s8845_s3  ;;  %v2057_v63 = vld [vmem:[#allocation3 + $0x10] sm:$0xff] }
0x1e89   :  { %v1631_v0 = vpop.permute.xlu0 %1630 }
0x1e8a   :  { %v1633_v1 = vmul.f32 %v1631_v0, %v1616_v59  ;;  %v2069_v59 = vld [vmem:[%s10794_s7 + $0x30] sm:$0xff] }
0x1e8b   :  { %v7545_v53 = vpack.c.bf16 %v2072_v32, %v2069_v59  ;;  %v2078_v32 = vld [vmem:[%s10795_s8 + $0x18] sm:$0xff] }
0x1e8c   :  { %1635 = vrot.lane.b32.xlu1 %v1633_v1, %s8846_s21 }
0x1efe   :  { %v1636_v2 = vpop.permute.xlu1 %1635 }
0x1eff   :  { %1638 = vst.msk [vmem:[#allocation3 + $0x18] sm:$0xff] %vm218_vm5, %v1636_v2  ;;  %6885 = vmatmul.mubr.msk.f32.vlgmr.msra.gmra.mrb[16].mxu0 %vm218_vm5, %v1636_v2 }
0x1f00   :  { %7529 = vmatpush3.bf16.msra.mxu0 %v9162_v4  ;;  %6906 = vmatprep.mubr.msk.f32.mxu0 %vm8843_vm1, %v8844_v13 }
0x1f01   :  { %7530 = vmatprep.subr.bf16.mxu0 %v8842_v7 }
0x1f04   :  { %7532 = vmatpush3.bf16.msra.mxu0 %v9172_v9 }
0x1f05   :  { %7540 = vmatprep.subr.bf16.mxu0 %v7539_v45 }
0x1f06   :  { %v2058_v0 = vld [vmem:[#allocation3 + $0x18] sm:$0xff] }
0x1fd2   :  { %v1708_v28 = vpop.f32.mrb[16].mxu0 }
0x1fd3   :  { %v1712_v5 = vadd.f32 %v1708_v28, %v1199_v3  ;;  %v6886_v8 = vpop.f32.mrb[17].mxu0  ;;  %v1209_v3 = vadd.f32 %v9197_v6, %v9233_v15 }
0x1fd5   :  { %v6239_v51 = vmul.f32 -1.442695, %v1712_v5 }
0x1fd7   :  { %8462 = vpow2.f32 %v6239_v51 }
0x1fd8   :  { %8464 = vtanh.f32 %v1712_v5 }
0x1fe1   :  { %v8463_v10 = vpop.eup %8462 }
0x1fe2   :  { %v1717_v12 = vadd.f32 1.0, %v8463_v10  ;;  %v8465_v16 = vpop.eup %8464 }
0x1fe4   :  { %8466 = vrcp.f32 %v1717_v12 }
0x1fee   :  { %v8467_v17 = vpop.eup %8466 }
0x1fef   :  { %v1720_v18 = vsel %vm9033_vm4, %v8465_v16, %v8467_v17 }
0x1ff0   :  { %1723 = vrot.lane.b32.xlu0 %v1720_v18, %s8845_s3  ;;  %v1721_v58 = vmul.f32 %v1720_v18, %v1627_v62  ;;  %v2056_v62 = vld [vmem:[#allocation3 + $0x8] sm:$0xff] }
0x2062   :  { %v1724_v19 = vpop.permute.xlu0 %1723 }
0x2063   :  { %v1726_v20 = vmul.f32 %v1724_v19, %v1720_v18 }
0x2065   :  { %1728 = vrot.lane.b32.xlu1 %v1726_v20, %s8846_s21 }
0x20d7   :  { %v1729_v11 = vpop.permute.xlu1 %1728 }
0x20d8   :  { %v1731_v21 = vadd.f32 %v1729_v11, %v1721_v58 }
0x20da   :  { %8468 = vtanh.f32 %v1731_v21 }
0x20e4   :  { %v8469_v23 = vpop.eup %8468 }
0x20e5   :  { %1734 = vrot.lane.b32.xlu0 %v8469_v23, %s8845_s3  ;;  %v2068_v23 = vld [vmem:[%s10794_s7 + $0x28] sm:$0xff] }
0x2157   :  { %v1735_v26 = vpop.permute.xlu0 %1734 }
0x2158   :  { %v1737_v25 = vmul.f32 %v1735_v26, %v1720_v18 }
0x215a   :  { %1739 = vrot.lane.b32.xlu1 %v1737_v25, %s8846_s21 }
0x21cc   :  { %v1740_v27 = vpop.permute.xlu1 %1739 }
0x21cd   :  { %1742 = vst.msk [vmem:[#allocation3 + $0x20] sm:$0xff] %vm218_vm5, %v1740_v27  ;;  %6896 = vmatmul.mubr.msk.f32.vlgmr.msra.gmra.mrb[24].mxu1 %vm218_vm5, %v1740_v27 }
0x21ce   :  { %7535 = vmatpush3.bf16.msra.mxu1 %v9162_v4  ;;  %6917 = vmatprep.mubr.msk.f32.mxu1 %vm8843_vm1, %v8844_v13 }
0x21cf   :  { %7536 = vmatprep.subr.bf16.mxu1 %v8842_v7 }
0x21d2   :  { %7538 = vmatpush3.bf16.msra.mxu1 %v9172_v9 }
0x21d4   :  { %v2059_v1 = vld [vmem:[#allocation3 + $0x20] sm:$0xff] }
0x22a0   :  { %v1812_v30 = vpop.f32.mrb[24].mxu1 }
0x22a1   :  { %v1816_v29 = vadd.f32 %v1812_v30, %v1204_v24  ;;  %v6897_v31 = vpop.f32.mrb[25].mxu1  ;;  %v2071_v30 = vld [vmem:[%s10794_s7 + $0x40] sm:$0xff] }
0x22a3   :  { %v6241_v33 = vmul.f32 -1.442695, %v1816_v29 }
0x22a5   :  { %8470 = vpow2.f32 %v6241_v33 }
0x22a6   :  { %8472 = vtanh.f32 %v1816_v29  ;;  %v2074_v29 = vld [vmem:[%s10794_s7 + $0x58] sm:$0xff] }
0x22a7   :  { %v7551_v31 = vpack.c.bf16 %v2074_v29, %v2071_v30  ;;  %v2095_v30 = vld [vmem:[%s10795_s8 + $0xa0] sm:$0xff]  ;;  %v2098_v29 = vld [vmem:[%s10795_s8 + $0xb8] sm:$0xff] }
0x22af   :  { %v8471_v34 = vpop.eup %8470 }
0x22b0   :  { %v1821_v35 = vadd.f32 1.0, %v8471_v34  ;;  %v8473_v4 = vpop.eup %8472 }
0x22b2   :  { %8474 = vrcp.f32 %v1821_v35  ;;  %v1214_v35 = vadd.f32 %v9231_v14, %v9197_v6 }
0x22bc   :  { %v8475_v36 = vpop.eup %8474 }
0x22bd   :  { %v1824_v54 = vsel %vm9033_vm4, %v8473_v4, %v8475_v36 }
0x22be   :  { %1827 = vrot.lane.b32.xlu0 %v1824_v54, %s8845_s3  ;;  %v1825_v57 = vmul.f32 %v1824_v54, %v1731_v21  ;;  %v2065_v21 = vld [vmem:[%s10794_s7 + $0x10] sm:$0xff] }
0x22bf   :  { %v7547_v26 = vpack.c.bf16 %v2068_v23, %v2065_v21  ;;  %v2093_v23 = vld [vmem:[%s10795_s8 + $0x90] sm:$0xff] }
0x22c1   :  { %7548 = vmatprep.subr.bf16.mxu1 %v7547_v26 }
0x2330   :  { %v1828_v9 = vpop.permute.xlu0 %1827 }
0x2331   :  { %v1830_v37 = vmul.f32 %v1828_v9, %v1824_v54 }
0x2333   :  { %1832 = vrot.lane.b32.xlu1 %v1830_v37, %s8846_s21 }
0x23a5   :  { %v1833_v38 = vpop.permute.xlu1 %1832 }
0x23a6   :  { %v1835_v40 = vadd.f32 %v1833_v38, %v1825_v57 }
0x23a8   :  { %8476 = vtanh.f32 %v1835_v40 }
0x23b2   :  { %v8477_v46 = vpop.eup %8476 }
0x23b3   :  { %1838 = vrot.lane.b32.xlu0 %v8477_v46, %s8845_s3 }
0x2425   :  { %v1839_v47 = vpop.permute.xlu0 %1838 }
0x2426   :  { %v1841_v48 = vmul.f32 %v1839_v47, %v1824_v54 }
0x2428   :  { %1843 = vrot.lane.b32.xlu1 %v1841_v48, %s8846_s21 }
0x249a   :  { %v1844_v60 = vpop.permute.xlu1 %1843 }
0x249b   :  { %1846 = vst.msk [vmem:[#allocation3 + $0x28] sm:$0xff] %vm218_vm5, %v1844_v60  ;;  %6907 = vmatmul.mubr.msk.f32.vlgmr.msra.gmra.mrb[18].mxu0 %vm218_vm5, %v1844_v60  ;;  %v2082_v60 = vld [vmem:[%s10795_s8 + $0x38] sm:$0xff] }
0x249c   :  { %7542 = vmatpush1.bf16.msra.mxu0 %v7541_v55  ;;  %2216 = vmatprep.mubr.f32.mxu0 %v8844_v13  ;;  %v2076_v55 = vld [vmem:[%s10795_s8 + $0x8] sm:$0xff] }
0x249d   :  { %7544 = vmatprep.subr.bf16.mxu0 %v7543_v56  ;;  %v2075_v56 = vld [vmem:[%s10795_s8] sm:$0xff]  ;;  %v9402_v59 = vpack.c.bf16 %v2079_v42, %v2076_v55  ;;  %v2110_v55 = vld [vmem:[%s10795_s8 + $0x118] sm:$0xff] }
0x24a0   :  { %7546 = vmatpush1.bf16.msra.mxu0 %v7545_v53  ;;  %v2085_v53 = vld [vmem:[%s10795_s8 + $0x50] sm:$0xff] }
0x24a1   :  { %7556 = vmatprep.subr.bf16.mxu0 %v9402_v59 }
0x24a2   :  { %v2060_v2 = vld [vmem:[#allocation3 + $0x28] sm:$0xff] }
0x24a3   :  { %6246 = vmatmul.mubr.msk.f32.vlgmr.msra.gmra.mrb[20].mxu0 %vm218_vm5, %v2055_v61 }
0x24a4   :  { %2222 = vmatprep.mubr.f32.mxu0 %v8844_v13 }
0x24a7   :  { %6247 = vmatmul.mubr.msk.f32.gmra.mrb[22].mxu0 %vm218_vm5, %v2056_v62 }
0x24a8   :  { %2228 = vmatprep.mubr.f32.mxu0 %v8844_v13 }
0x24ab   :  { %6248 = vmatmul.mubr.msk.f32.gmra.mrb[24].mxu0 %vm218_vm5, %v2057_v63 }
0x24ac   :  { %2234 = vmatprep.mubr.f32.mxu0 %v8844_v13 }
0x24af   :  { %6249 = vmatmul.mubr.msk.f32.gmra.mrb[26].mxu0 %vm218_vm5, %v2058_v0 }
0x24b0   :  { %2240 = vmatprep.mubr.f32.mxu0 %v8844_v13 }
0x24b3   :  { %6250 = vmatmul.mubr.msk.f32.gmra.mrb[28].mxu0 %vm218_vm5, %v2059_v1 }
0x24b4   :  { %2246 = vmatprep.mubr.f32.mxu0 %v8844_v13 }
0x24b7   :  { %6251 = vmatmul.mubr.msk.f32.gmra.mrb[30].mxu0 %vm218_vm5, %v2060_v2 }
0x24b8   :  { %2252 = vmatprep.mubr.f32.mxu0 %v8844_v13 }
0x256e   :  { %v1916_v28 = vpop.f32.mrb[18].mxu0 }
0x256f   :  { %v1920_v5 = vadd.f32 %v1916_v28, %v1209_v3  ;;  %v6908_v8 = vpop.f32.mrb[19].mxu0  ;;  %v2088_v3 = vld [vmem:[%s10795_s8 + $0x68] sm:$0xff]  ;;  %v2091_v28 = vld [vmem:[%s10795_s8 + $0x80] sm:$0xff] }
0x2571   :  { %v6243_v51 = vmul.f32 -1.442695, %v1920_v5 }
0x2573   :  { %8478 = vpow2.f32 %v6243_v51  ;;  %v2083_v51 = vld [vmem:[%s10795_s8 + $0x40] sm:$0xff] }
0x2574   :  { %8480 = vtanh.f32 %v1920_v5 }
0x257d   :  { %v8479_v10 = vpop.eup %8478 }
0x257e   :  { %v1925_v12 = vadd.f32 1.0, %v8479_v10  ;;  %v8481_v16 = vpop.eup %8480  ;;  %v9445_v10 = vpack.c.bf16 %v2091_v28, %v2088_v3 }
0x2580   :  { %8482 = vrcp.f32 %v1925_v12  ;;  %v2087_v12 = vld [vmem:[%s10795_s8 + $0x60] sm:$0xff] }
0x258a   :  { %v8483_v17 = vpop.eup %8482 }
0x258b   :  { %v1928_v18 = vsel %vm9033_vm4, %v8481_v16, %v8483_v17  ;;  %v2090_v16 = vld [vmem:[%s10795_s8 + $0x78] sm:$0xff] }
0x258c   :  { %1931 = vrot.lane.b32.xlu0 %v1928_v18, %s8845_s3  ;;  %v1929_v15 = vmul.f32 %v1928_v18, %v1835_v40  ;;  %v2086_v17 = vld [vmem:[%s10795_s8 + $0x58] sm:$0xff] }
0x25fe   :  { %v1932_v19 = vpop.permute.xlu0 %1931 }
0x25ff   :  { %v1934_v20 = vmul.f32 %v1932_v19, %v1928_v18  ;;  %v2094_v19 = vld [vmem:[%s10795_s8 + $0x98] sm:$0xff] }
0x2601   :  { %1936 = vrot.lane.b32.xlu1 %v1934_v20, %s8846_s21  ;;  %v2097_v20 = vld [vmem:[%s10795_s8 + $0xb0] sm:$0xff] }
0x2602   :  { %v9476_v21 = vpack.c.bf16 %v2097_v20, %v2094_v19 }
0x2673   :  { %v1937_v58 = vpop.permute.xlu1 %1936 }
0x2674   :  { %v1939_v11 = vadd.f32 %v1937_v58, %v1929_v15  ;;  %v2089_v15 = vld [vmem:[%s10795_s8 + $0x70] sm:$0xff]  ;;  %v2092_v58 = vld [vmem:[%s10795_s8 + $0x88] sm:$0xff] }
0x2676   :  { %8484 = vtanh.f32 %v1939_v11 }
0x2680   :  { %v8485_v25 = vpop.eup %8484 }
0x2681   :  { %1942 = vrot.lane.b32.xlu0 %v8485_v25, %s8845_s3 }
0x26f3   :  { %v1943_v27 = vpop.permute.xlu0 %1942 }
0x26f4   :  { %v1945_v24 = vmul.f32 %v1943_v27, %v1928_v18  ;;  %v9457_v18 = vpack.c.bf16 %v2086_v17, %v2083_v51  ;;  %v9485_v27 = vpack.c.bf16 %v2092_v58, %v2089_v15 }
0x26f6   :  { %1947 = vrot.lane.b32.xlu1 %v1945_v24, %s8846_s21 }
0x2768   :  { %v1948_v33 = vpop.permute.xlu1 %1947 }
0x2769   :  { %1950 = vst.msk [vmem:[#allocation3 + $0x30] sm:$0xff] %vm218_vm5, %v1948_v33  ;;  %6918 = vmatmul.mubr.msk.f32.vlgmr.msra.gmra.mrb[26].mxu1 %vm218_vm5, %v1948_v33  ;;  %v2100_v33 = vld [vmem:[%s10795_s8 + $0xc8] sm:$0xff] }
0x276a   :  { %7550 = vmatpush3.bf16.msra.mxu1 %v7547_v26  ;;  %6928 = vmatprep.mubr.msk.f32.mxu1 %vm218_vm5, %v2055_v61  ;;  %v9413_v61 = vpack.c.bf16 %v2078_v32, %v2075_v56  ;;  %v2096_v26 = vld [vmem:[%s10795_s8 + $0xa8] sm:$0xff] }
0x276b   :  { %7552 = vmatprep.subr.bf16.mxu1 %v7551_v31  ;;  %v9490_v24 = vpack.c.bf16 %v2096_v26, %v2093_v23 }
0x276c   :  { %7558 = vmatpush1.bf16.msra.mxu0 %v9413_v61 }
0x276e   :  { %7554 = vmatpush3.bf16.msra.mxu1 %v7551_v31  ;;  %v9502_v31 = vpack.c.bf16 %v2098_v29, %v2095_v30 }
0x276f   :  { %7579 = vmatprep.subr.bf16.mxu1 %v8842_v7 }
0x2770   :  { %v2061_v34 = vld [vmem:[#allocation3 + $0x30] sm:$0xff] }
0x2771   :  { %6929 = vmatmul.mubr.msk.f32.vlgmr.msra.gmra.mrb[28].mxu1 %vm218_vm5, %v2056_v62  ;;  %6252 = vmatmul.mubr.msk.f32.gmra.mrb[32].mxu0 %vm218_vm5, %v2061_v34  ;;  %v9415_v62 = vpack.c.bf16 %v2085_v53, %v2082_v60 }
0x2772   :  { %6931 = vmatprep.mubr.msk.f32.mxu1 %vm218_vm5, %v2057_v63  ;;  %2258 = vmatprep.mubr.f32.mxu0 %v8844_v13  ;;  %v2081_v63 = vld [vmem:[%s10795_s8 + $0x30] sm:$0xff] }
0x2773   :  { %7560 = vmatprep.subr.bf16.mxu0 %v9415_v62 }
0x2775   :  { %6932 = vmatmul.mubr.msk.f32.gmra.mrb[30].mxu1 %vm218_vm5, %v2058_v0  ;;  %v2084_v0 = vld [vmem:[%s10795_s8 + $0x48] sm:$0xff] }
0x2776   :  { %6934 = vmatprep.mubr.msk.f32.mxu1 %vm218_vm5, %v2059_v1  ;;  %v2077_v1 = vld [vmem:[%s10795_s8 + $0x10] sm:$0xff]  ;;  %v9437_v5 = vpack.c.bf16 %v2084_v0, %v2081_v63  ;;  %v2111_v0 = vld [vmem:[%s10796_s9] sm:$0x7]  ;;  %s8847_s9 = smov 96  }
0x2778   :  { %7562 = vmatpush1.bf16.msra.mxu0 %v9437_v5 }
0x2779   :  { %6935 = vmatmul.mubr.msk.f32.gmra.mrb[32].mxu1 %vm218_vm5, %v2060_v2  ;;  %v2080_v2 = vld [vmem:[%s10795_s8 + $0x28] sm:$0xff]  ;;  %7564 = vmatprep.subr.bf16.mxu0 %v9445_v10 }
0x277a   :  { %6937 = vmatprep.mubr.msk.f32.mxu1 %vm218_vm5, %v2061_v34  ;;  %v9439_v8 = vpack.c.bf16 %v2080_v2, %v2077_v1  ;;  %v2103_v34 = vld [vmem:[%s10795_s8 + $0xe0] sm:$0xff] }
0x277c   :  { %7581 = vmatpush3.bf16.msra.mxu1 %v9439_v8 }
0x277d   :  { %7582 = vmatprep.subr.bf16.mxu1 %v8842_v7 }
0x2780   :  { %7584 = vmatpush3.bf16.msra.mxu1 %v9457_v18 }
0x2781   :  { %7585 = vmatprep.subr.bf16.mxu1 %v8842_v7 }
0x2784   :  { %7587 = vmatpush3.bf16.msra.mxu1 %v9485_v27 }
0x2785   :  { %7588 = vmatprep.subr.bf16.mxu1 %v8842_v7 }
0x2788   :  { %7590 = vmatpush3.bf16.msra.mxu1 %v9502_v31 }
0x2789   :  { %7591 = vmatprep.subr.bf16.mxu1 %v8842_v7 }
0x283c   :  { %v2020_v4 = vpop.f32.mrb[26].mxu1 }
0x283d   :  { %v2024_v36 = vadd.f32 %v2020_v4, %v1214_v35  ;;  %v6919_v54 = vpop.f32.mrb[27].mxu1  ;;  %v2099_v35 = vld [vmem:[%s10795_s8 + $0xc0] sm:$0xff]  ;;  %v9513_v4 = vpack.c.bf16 %v2103_v34, %v2100_v33  ;;  %v9627_v33 = vadd.s32 128, %v9029_v41 }
0x283e   :  { %v2101_v54 = vld [vmem:[%s10795_s8 + $0xd0] sm:$0xff] }
0x283f   :  { %v6245_v9 = vmul.f32 -1.442695, %v2024_v36  ;;  %vm2397_vm7 = vcmp.ge.s32.totalorder %v9627_v33, 192 }
0x2841   :  { %8486 = vpow2.f32 %v6245_v9  ;;  %v2104_v9 = vld [vmem:[%s10795_s8 + $0xe8] sm:$0xff] }
0x2842   :  { %8488 = vtanh.f32 %v2024_v36  ;;  %v2102_v36 = vld [vmem:[%s10795_s8 + $0xd8] sm:$0xff] }
0x2844   :  { %v9372_v37 = vpop.f32.mrb[28].mxu1 }
0x2845   :  { %v9374_v57 = vpop.f32.mrb[29].mxu1 }
0x2848   :  { %v9376_v38 = vpop.f32.mrb[30].mxu1 }
0x2849   :  { %v9378_v40 = vpop.f32.mrb[31].mxu1 }
0x284b   :  { %v8487_v43 = vpop.eup %8486 }
0x284c   :  { %v2029_v44 = vadd.f32 1.0, %v8487_v43  ;;  %v9380_v45 = vpop.f32.mrb[32].mxu1  ;;  %v8489_v6 = vpop.eup %8488  ;;  %v9525_v43 = vpack.c.bf16 %v2102_v36, %v2099_v35 }
0x284d   :  { %v9382_v46 = vpop.f32.mrb[33].mxu1 }
0x284e   :  { %8490 = vrcp.f32 %v2029_v44  ;;  %v9527_v44 = vpack.c.bf16 %v2104_v9, %v2101_v54 }
0x2850   :  { %7593 = vmatpush3.bf16.msra.mxu1 %v9527_v44 }
0x2851   :  { %7594 = vmatprep.subr.bf16.mxu1 %v8842_v7 }
0x2858   :  { %v8491_v14 = vpop.eup %8490 }
0x2859   :  { %v9386_v47 = vsel %vm9033_vm4, %v8489_v6, %v8491_v14  ;;  %v2106_v6 = vld [vmem:[%s10795_s8 + $0xf8] sm:$0xff]  ;;  %v2109_v14 = vld [vmem:[%s10795_s8 + $0x110] sm:$0xff] }
0x285a   :  { %2035 = vrot.lane.b32.xlu0 %v9386_v47, %s8845_s3  ;;  %v2033_v50 = vmul.f32 %v9386_v47, %v1939_v11  ;;  %v9473_v11 = vpack.c.bf16 %v2090_v16, %v2087_v12 }
0x285c   :  { %7566 = vmatpush1.bf16.msra.mxu0 %v9473_v11 }
0x285d   :  { %7568 = vmatprep.subr.bf16.mxu0 %v9476_v21 }
0x2860   :  { %7570 = vmatpush1.bf16.msra.mxu0 %v9490_v24 }
0x2861   :  { %7572 = vmatprep.subr.bf16.mxu0 %v9513_v4 }
0x2864   :  { %7574 = vmatpush1.bf16.msra.mxu0 %v9525_v43 }
0x28cc   :  { %v2036_v48 = vpop.permute.xlu0 %2035 }
0x28cd   :  { %v2038_v49 = vmul.f32 %v2036_v48, %v9386_v47  ;;  %v9537_v48 = vpack.c.bf16 %v2109_v14, %v2106_v6 }
0x28cf   :  { %2040 = vrot.lane.b32.xlu1 %v2038_v49, %s8846_s21  ;;  %7576 = vmatprep.subr.bf16.mxu0 %v9537_v48  ;;  %v2105_v49 = vld [vmem:[%s10795_s8 + $0xf0] sm:$0xff] }
0x2941   :  { %v2041_v22 = vpop.permute.xlu1 %2040 }
0x2942   :  { %v2043_v52 = vadd.f32 %v2041_v22, %v2033_v50  ;;  %v2108_v50 = vld [vmem:[%s10795_s8 + $0x108] sm:$0xff]  ;;  %v2107_v22 = vld [vmem:[%s10795_s8 + $0x100] sm:$0xff] }
0x2943   :  { %v9557_v42 = vpack.c.bf16 %v2110_v55, %v2107_v22 }
0x2944   :  { %8492 = vtanh.f32 %v2043_v52  ;;  %v9552_v52 = vpack.c.bf16 %v2108_v50, %v2105_v49 }
0x2945   :  { %7596 = vmatpush3.bf16.msra.mxu1 %v9557_v42 }
0x2946   :  { %7578 = vmatpush1.bf16.msra.mxu0 %v9552_v52  ;;  %7621 = vmatprep.subr.bf16.mxu1 %v8842_v7 }
0x2947   :  { %7598 = vmatprep.subr.bf16.mxu0 %v9402_v59 }
0x294e   :  { %v8493_v25 = vpop.eup %8492 }
0x294f   :  { %2046 = vrot.lane.b32.xlu0 %v8493_v25, %s8845_s3 }
0x29c1   :  { %v2047_v56 = vpop.permute.xlu0 %2046 }
0x29c2   :  { %v2049_v32 = vmul.f32 %v2047_v56, %v9386_v47  ;;  %v9601_v47 = vshrl.u32 %v212_v39, 7 }
0x29c4   :  { %2051 = vrot.lane.b32.xlu1 %v2049_v32, %s8846_s21  ;;  %v2123_v63 = vsub.s32 2, %v9601_v47  ;;  %v2119_v1 = vsub.s32 1, %v9601_v47 }
0x29c6   :  { %v9610_v2 = vrot.slane %v2111_v0, %v2123_v63  ;;  %v9618_v39 = vrot.slane %v2111_v0, %v2119_v1 }
0x29c8   :  { %v2332_v51 = vadd.f32 %v9374_v57, %v9610_v2  ;;  %v9624_v57 = vadd.s32 256, %v9029_v41  ;;  %v2115_v41 = vsub.s32 0, %v9601_v47 }
0x29ca   :  { %vm2401_vm6 = vcmp.lt.s32.totalorder %v9624_v57, 288  ;;  %v9640_v14 = vrot.slane %v2111_v0, %v2115_v41 }
0x2a36   :  { %v2052_v60 = vpop.permute.xlu1 %2051 }
0x2a37   :  { %2054 = vst.msk [vmem:[#allocation3 + $0x38] sm:$0xff] %vm218_vm5, %v2052_v60 }
0x2a3e   :  { %v2062_v53 = vld [vmem:[#allocation3 + $0x38] sm:$0xff] }
0x2a3f   :  { %6253 = vmatmul.mubr.msk.f32.gmra.mrb[34].mxu0 %vm218_vm5, %v2062_v53  ;;  %6938 = vmatmul.mubr.msk.f32.gmra.mrb[34].mxu1 %vm218_vm5, %v2062_v53 }
0x2a40   :  { %2475 = vmatprep.mubr.f32.mxu0 %v8844_v13  ;;  %6964 = vmatprep.mubr.msk.f32.mxu1 %vm8843_vm1, %v8844_v13 }
0x2a43   :  { %2476 = vmatmul.mubr.f32.vlgmr.msra.gmra.mrb[20].mxu0 %v8844_v13  ;;  %6965 = vmatmul.mubr.f32.vlgmr.msra.gmra.mrb[36].mxu1 %v8844_v13 }
0x2a44   :  { %7600 = vmatpush1.bf16.msra.mxu0 %v9413_v61  ;;  %7623 = vmatpush3.bf16.msra.mxu1 %v9439_v8 }
0x2a45   :  { %7602 = vmatprep.subr.bf16.mxu0 %v9415_v62  ;;  %7624 = vmatprep.subr.bf16.mxu1 %v8842_v7 }
0x2a46   :  { %2683 = vmatprep.mubr.f32.mxu0 %v8844_v13  ;;  %6991 = vmatprep.mubr.msk.f32.mxu1 %vm8843_vm1, %v8844_v13 }
0x2a48   :  { %7604 = vmatpush1.bf16.msra.mxu0 %v9437_v5  ;;  %7626 = vmatpush3.bf16.msra.mxu1 %v9457_v18 }
0x2a49   :  { %7606 = vmatprep.subr.bf16.mxu0 %v9445_v10  ;;  %7627 = vmatprep.subr.bf16.mxu1 %v8842_v7 }
0x2a4c   :  { %7608 = vmatpush1.bf16.msra.mxu0 %v9473_v11  ;;  %7629 = vmatpush3.bf16.msra.mxu1 %v9485_v27 }
0x2a4d   :  { %7610 = vmatprep.subr.bf16.mxu0 %v9476_v21  ;;  %7630 = vmatprep.subr.bf16.mxu1 %v8842_v7 }
0x2a50   :  { %7612 = vmatpush1.bf16.msra.mxu0 %v9490_v24  ;;  %7632 = vmatpush3.bf16.msra.mxu1 %v9502_v31 }
0x2a51   :  { %7614 = vmatprep.subr.bf16.mxu0 %v9513_v4  ;;  %7633 = vmatprep.subr.bf16.mxu1 %v8842_v7 }
0x2a54   :  { %7616 = vmatpush1.bf16.msra.mxu0 %v9525_v43  ;;  %7635 = vmatpush3.bf16.msra.mxu1 %v9527_v44 }
0x2a55   :  { %7618 = vmatprep.subr.bf16.mxu0 %v9537_v48  ;;  %7636 = vmatprep.subr.bf16.mxu1 %v8842_v7 }
0x2a58   :  { %7620 = vmatpush1.bf16.msra.mxu0 %v9552_v52  ;;  %7638 = vmatpush3.bf16.msra.mxu1 %v9557_v42 }
0x2a59   :  { %7640 = vmatprep.subr.bf16.mxu0 %v9402_v59  ;;  %7663 = vmatprep.subr.bf16.mxu1 %v8842_v7 }
0x2b12   :  { %v9612_v3 = vpop.f32.mrb[34].mxu1 }
0x2b13   :  { %v9614_v28 = vpop.f32.mrb[35].mxu1 }
0x2b16   :  { %v2477_v12 = vpop.f32.mrb[20].mxu0  ;;  %v2548_v16 = vpop.f32.mrb[36].mxu1 }
0x2b17   :  { %v2554_v17 = vadd.f32 %v2548_v16, %v2332_v51  ;;  %v2479_v19 = vpop.f32.mrb[21].mxu0  ;;  %v6966_v20 = vpop.f32.mrb[37].mxu1  ;;  %v8293_v49 = vadd.f32 %v2477_v12, %v9640_v14 }
0x2b18   :  { %v8294_v15 = vadd.f32 %v2479_v19, %v9618_v39 }
0x2b19   :  { %v6264_v58 = vmul.f32 -1.442695, %v2554_v17  ;;  %v6262_v50 = vmul.f32 -1.442695, %v8293_v49 }
0x2b1a   :  { %v6263_v23 = vmul.f32 -1.442695, %v8294_v15 }
0x2b1b   :  { %8494 = vpow2.f32 %v6264_v58 }
0x2b1c   :  { %8496 = vpow2.f32 %v6263_v23 }
0x2b1d   :  { %8498 = vtanh.f32 %v2554_v17 }
0x2b1e   :  { %8500 = vtanh.f32 %v8294_v15 }
0x2b25   :  { %v8495_v26 = vpop.eup %8494 }
0x2b26   :  { %v8497_v25 = vpop.eup %8496  ;;  %v2569_v30 = vadd.f32 1.0, %v8495_v26 }
0x2b27   :  { %v2568_v29 = vadd.f32 1.0, %v8497_v25  ;;  %v8499_v34 = vpop.eup %8498 }
0x2b28   :  { %8502 = vrcp.f32 %v2569_v30  ;;  %v8501_v35 = vpop.eup %8500 }
0x2b29   :  { %8504 = vrcp.f32 %v2568_v29  ;;  %v2337_v29 = vadd.f32 %v9372_v37, %v9610_v2 }
0x2b2a   :  { %8506 = vpow2.f32 %v6262_v50 }
0x2b32   :  { %v8503_v36 = vpop.eup %8502 }
0x2b33   :  { %v8505_v54 = vpop.eup %8504  ;;  %v2578_v9 = vsel %vm2401_vm6, %v8499_v34, %v8503_v36 }
0x2b34   :  { %2585 = vrot.lane.b32.xlu1 %v2578_v9, %s8845_s3  ;;  %v2577_v6 = vsel %vm2397_vm7, %v8501_v35, %v8505_v54  ;;  %v8507_v22 = vpop.eup %8506 }
0x2b35   :  { %2583 = vrot.lane.b32.xlu0 %v2577_v6, %s8845_s3  ;;  %v2567_v55 = vadd.f32 1.0, %v8507_v22  ;;  %v2580_v16 = vmul.f32 0.0, %v2577_v6 }
0x2b37   :  { %8508 = vrcp.f32 %v2567_v55 }
0x2b41   :  { %v8509_v60 = vpop.eup %8508 }
0x2b42   :  { %v2579_v0 = vmul.f32 0.0, %v8509_v60 }
0x2ba6   :  { %v2586_v56 = vpop.permute.xlu1 %2585 }
0x2ba7   :  { %v2584_v32 = vpop.permute.xlu0 %2583 }
0x2ba8   :  { %v2588_v53 = vsel %vm2587_vm8, %v2584_v32, %v2586_v56 }
0x2ba9   :  { %v2590_v51 = vmul.f32 %v8509_v60, %v2588_v53 }
0x2bab   :  { %2592 = vrot.lane.b32.xlu0 %v2590_v51, %s8847_s9 }
0x2c1d   :  { %v2593_v17 = vpop.permute.xlu0 %2592 }
0x2c1e   :  { %v9645_v19 = vadd.f32 %v2593_v17, %v2579_v0  ;;  %v9647_v12 = vadd.f32 %v2593_v17, %v2580_v16 }
0x2c20   :  { %8510 = vtanh.f32 %v9645_v19 }
0x2c21   :  { %8512 = vtanh.f32 %v9647_v12 }
0x2c2a   :  { %v8511_v20 = vpop.eup %8510 }
0x2c2b   :  { %v8513_v15 = vpop.eup %8512  ;;  %2601 = vrot.lane.b32.xlu1 %v8511_v20, %s8845_s3 }
0x2c2c   :  { %2603 = vrot.lane.b32.xlu0 %v8513_v15, %s8845_s3 }
0x2c9d   :  { %v2602_v58 = vpop.permute.xlu1 %2601 }
0x2c9e   :  { %v2604_v23 = vpop.permute.xlu0 %2603 }
0x2c9f   :  { %v2605_v26 = vsel %vm2587_vm8, %v2602_v58, %v2604_v23 }
0x2ca0   :  { %v2607_v25 = vmul.f32 %v2605_v26, %v2578_v9 }
0x2ca2   :  { %2609 = vrot.lane.b32.xlu1 %v2607_v25, %s8847_s9 }
0x2d14   :  { %v2610_v30 = vpop.permute.xlu1 %2609 }
0x2d15   :  { %2612 = vst.msk [vmem:[#allocation5] sm:$0xff] %vm2408_vm9, %v2610_v30  ;;  %6265 = vmatmul.mubr.msk.f32.vlgmr.msra.gmra.mrb[22].mxu0 %vm2408_vm9, %v2610_v30  ;;  %6992 = vmatmul.mubr.msk.f32.vlgmr.msra.gmra.mrb[38].mxu1 %vm2408_vm9, %v2610_v30 }
0x2d16   :  { %7642 = vmatpush1.bf16.msra.mxu0 %v9413_v61  ;;  %7665 = vmatpush3.bf16.msra.mxu1 %v9439_v8 }
0x2d17   :  { %7644 = vmatprep.subr.bf16.mxu0 %v9415_v62  ;;  %7666 = vmatprep.subr.bf16.mxu1 %v8842_v7 }
0x2d18   :  { %2891 = vmatprep.mubr.f32.mxu0 %v8844_v13  ;;  %7018 = vmatprep.mubr.msk.f32.mxu1 %vm8843_vm1, %v8844_v13 }
0x2d1a   :  { %7646 = vmatpush1.bf16.msra.mxu0 %v9437_v5  ;;  %7668 = vmatpush3.bf16.msra.mxu1 %v9457_v18 }
0x2d1b   :  { %7648 = vmatprep.subr.bf16.mxu0 %v9445_v10  ;;  %7669 = vmatprep.subr.bf16.mxu1 %v8842_v7 }
0x2d1e   :  { %7650 = vmatpush1.bf16.msra.mxu0 %v9473_v11  ;;  %7671 = vmatpush3.bf16.msra.mxu1 %v9485_v27 }
0x2d1f   :  { %7652 = vmatprep.subr.bf16.mxu0 %v9476_v21  ;;  %7672 = vmatprep.subr.bf16.mxu1 %v8842_v7 }
0x2d22   :  { %7654 = vmatpush1.bf16.msra.mxu0 %v9490_v24  ;;  %7674 = vmatpush3.bf16.msra.mxu1 %v9502_v31 }
0x2d23   :  { %7656 = vmatprep.subr.bf16.mxu0 %v9513_v4  ;;  %7675 = vmatprep.subr.bf16.mxu1 %v8842_v7 }
0x2d26   :  { %7658 = vmatpush1.bf16.msra.mxu0 %v9525_v43  ;;  %7677 = vmatpush3.bf16.msra.mxu1 %v9527_v44 }
0x2d27   :  { %7660 = vmatprep.subr.bf16.mxu0 %v9537_v48  ;;  %7678 = vmatprep.subr.bf16.mxu1 %v8842_v7 }
0x2d2a   :  { %7662 = vmatpush1.bf16.msra.mxu0 %v9552_v52  ;;  %7680 = vmatpush3.bf16.msra.mxu1 %v9557_v42 }
0x2d2b   :  { %7682 = vmatprep.subr.bf16.mxu0 %v9402_v59  ;;  %7705 = vmatprep.subr.bf16.mxu1 %v8842_v7 }
0x2de8   :  { %v2685_v34 = vpop.f32.mrb[22].mxu0  ;;  %v2756_v35 = vpop.f32.mrb[38].mxu1 }
0x2de9   :  { %v2762_v36 = vadd.f32 %v2756_v35, %v2337_v29  ;;  %v2687_v54 = vpop.f32.mrb[23].mxu0  ;;  %v6993_v9 = vpop.f32.mrb[39].mxu1  ;;  %v8295_v17 = vadd.f32 %v2685_v34, %v9640_v14 }
0x2dea   :  { %v8296_v6 = vadd.f32 %v2687_v54, %v9618_v39 }
0x2deb   :  { %v6269_v49 = vmul.f32 -1.442695, %v2762_v36  ;;  %v6267_v20 = vmul.f32 -1.442695, %v8295_v17 }
0x2dec   :  { %v6268_v50 = vmul.f32 -1.442695, %v8296_v6 }
0x2ded   :  { %8514 = vpow2.f32 %v6269_v49 }
0x2dee   :  { %8516 = vpow2.f32 %v6268_v50 }
0x2def   :  { %8518 = vtanh.f32 %v2762_v36 }
0x2df0   :  { %8520 = vtanh.f32 %v8296_v6 }
0x2df7   :  { %v8515_v22 = vpop.eup %8514 }
0x2df8   :  { %v8517_v55 = vpop.eup %8516  ;;  %v2777_v56 = vadd.f32 1.0, %v8515_v22 }
0x2df9   :  { %v2776_v32 = vadd.f32 1.0, %v8517_v55  ;;  %v8519_v37 = vpop.eup %8518 }
0x2dfa   :  { %8522 = vrcp.f32 %v2777_v56  ;;  %v8521_v60 = vpop.eup %8520  ;;  %v2342_v56 = vadd.f32 %v9378_v40, %v9610_v2 }
0x2dfb   :  { %8524 = vrcp.f32 %v2776_v32 }
0x2dfc   :  { %8526 = vpow2.f32 %v6267_v20 }
0x2e04   :  { %v8523_v53 = vpop.eup %8522 }
0x2e05   :  { %v8525_v51 = vpop.eup %8524  ;;  %v2786_v16 = vsel %vm2401_vm6, %v8519_v37, %v8523_v53 }
0x2e06   :  { %2793 = vrot.lane.b32.xlu1 %v2786_v16, %s8845_s3  ;;  %v2785_v0 = vsel %vm2397_vm7, %v8521_v60, %v8525_v51  ;;  %v8527_v15 = vpop.eup %8526 }
0x2e07   :  { %2791 = vrot.lane.b32.xlu0 %v2785_v0, %s8845_s3  ;;  %v2775_v58 = vadd.f32 1.0, %v8527_v15  ;;  %v2788_v35 = vmul.f32 %v2785_v0, %v9647_v12 }
0x2e09   :  { %8528 = vrcp.f32 %v2775_v58 }
0x2e13   :  { %v8529_v25 = vpop.eup %8528 }
0x2e14   :  { %v2787_v36 = vmul.f32 %v8529_v25, %v9645_v19 }
0x2e78   :  { %v2794_v23 = vpop.permute.xlu1 %2793 }
0x2e79   :  { %v2792_v26 = vpop.permute.xlu0 %2791 }
0x2e7a   :  { %v2795_v30 = vsel %vm2587_vm8, %v2792_v26, %v2794_v23 }
0x2e7b   :  { %v2797_v29 = vmul.f32 %v8529_v25, %v2795_v30 }
0x2e7d   :  { %2799 = vrot.lane.b32.xlu0 %v2797_v29, %s8847_s9 }
0x2eef   :  { %v2800_v54 = vpop.permute.xlu0 %2799 }
0x2ef0   :  { %v9699_v9 = vadd.f32 %v2800_v54, %v2787_v36  ;;  %v9701_v34 = vadd.f32 %v2800_v54, %v2788_v35 }
0x2ef2   :  { %8530 = vtanh.f32 %v9699_v9 }
0x2ef3   :  { %8532 = vtanh.f32 %v9701_v34 }
0x2efc   :  { %v8531_v6 = vpop.eup %8530 }
0x2efd   :  { %v8533_v49 = vpop.eup %8532  ;;  %2808 = vrot.lane.b32.xlu1 %v8531_v6, %s8845_s3 }
0x2efe   :  { %2810 = vrot.lane.b32.xlu0 %v8533_v49, %s8845_s3 }
0x2f6f   :  { %v2809_v50 = vpop.permute.xlu1 %2808 }
0x2f70   :  { %v2811_v22 = vpop.permute.xlu0 %2810 }
0x2f71   :  { %v2812_v12 = vsel %vm2587_vm8, %v2809_v50, %v2811_v22 }
0x2f72   :  { %v2814_v19 = vmul.f32 %v2812_v12, %v2786_v16 }
0x2f74   :  { %2816 = vrot.lane.b32.xlu1 %v2814_v19, %s8847_s9 }
0x2fe6   :  { %v2817_v55 = vpop.permute.xlu1 %2816 }
0x2fe7   :  { %2820 = vst.msk [vmem:[#allocation5 + $0x8] sm:$0xff] %vm2408_vm9, %v2817_v55  ;;  %6270 = vmatmul.mubr.msk.f32.vlgmr.msra.gmra.mrb[24].mxu0 %vm2408_vm9, %v2817_v55  ;;  %7019 = vmatmul.mubr.msk.f32.vlgmr.msra.gmra.mrb[40].mxu1 %vm2408_vm9, %v2817_v55 }
0x2fe8   :  { %7684 = vmatpush1.bf16.msra.mxu0 %v9413_v61  ;;  %7707 = vmatpush3.bf16.msra.mxu1 %v9439_v8 }
0x2fe9   :  { %7686 = vmatprep.subr.bf16.mxu0 %v9415_v62  ;;  %7708 = vmatprep.subr.bf16.mxu1 %v8842_v7 }
0x2fea   :  { %3099 = vmatprep.mubr.f32.mxu0 %v8844_v13  ;;  %7045 = vmatprep.mubr.msk.f32.mxu1 %vm8843_vm1, %v8844_v13 }
0x2fec   :  { %7688 = vmatpush1.bf16.msra.mxu0 %v9437_v5  ;;  %7710 = vmatpush3.bf16.msra.mxu1 %v9457_v18 }
0x2fed   :  { %7690 = vmatprep.subr.bf16.mxu0 %v9445_v10  ;;  %7711 = vmatprep.subr.bf16.mxu1 %v8842_v7 }
0x2ff0   :  { %7692 = vmatpush1.bf16.msra.mxu0 %v9473_v11  ;;  %7713 = vmatpush3.bf16.msra.mxu1 %v9485_v27 }
0x2ff1   :  { %7694 = vmatprep.subr.bf16.mxu0 %v9476_v21  ;;  %7714 = vmatprep.subr.bf16.mxu1 %v8842_v7 }
0x2ff4   :  { %7696 = vmatpush1.bf16.msra.mxu0 %v9490_v24  ;;  %7716 = vmatpush3.bf16.msra.mxu1 %v9502_v31 }
0x2ff5   :  { %7698 = vmatprep.subr.bf16.mxu0 %v9513_v4  ;;  %7717 = vmatprep.subr.bf16.mxu1 %v8842_v7 }
0x2ff8   :  { %7700 = vmatpush1.bf16.msra.mxu0 %v9525_v43  ;;  %7719 = vmatpush3.bf16.msra.mxu1 %v9527_v44 }
0x2ff9   :  { %7702 = vmatprep.subr.bf16.mxu0 %v9537_v48  ;;  %7720 = vmatprep.subr.bf16.mxu1 %v8842_v7 }
0x2ffc   :  { %7704 = vmatpush1.bf16.msra.mxu0 %v9552_v52  ;;  %7722 = vmatpush3.bf16.msra.mxu1 %v9557_v42 }
0x2ffd   :  { %7724 = vmatprep.subr.bf16.mxu0 %v9402_v59  ;;  %7747 = vmatprep.subr.bf16.mxu1 %v8842_v7 }
0x30ba   :  { %v2893_v32 = vpop.f32.mrb[24].mxu0  ;;  %v2964_v37 = vpop.f32.mrb[40].mxu1 }
0x30bb   :  { %v2970_v60 = vadd.f32 %v2964_v37, %v2342_v56  ;;  %v2895_v53 = vpop.f32.mrb[25].mxu0  ;;  %v7020_v51 = vpop.f32.mrb[41].mxu1  ;;  %v8297_v36 = vadd.f32 %v2893_v32, %v9640_v14 }
0x30bc   :  { %v8298_v16 = vadd.f32 %v2895_v53, %v9618_v39 }
0x30bd   :  { %v6274_v0 = vmul.f32 -1.442695, %v2970_v60  ;;  %v6272_v54 = vmul.f32 -1.442695, %v8297_v36 }
0x30be   :  { %v6273_v17 = vmul.f32 -1.442695, %v8298_v16 }
0x30bf   :  { %8534 = vpow2.f32 %v6274_v0 }
0x30c0   :  { %8536 = vpow2.f32 %v6273_v17 }
0x30c1   :  { %8538 = vtanh.f32 %v2970_v60 }
0x30c2   :  { %8540 = vtanh.f32 %v8298_v16 }
0x30c9   :  { %v8535_v20 = vpop.eup %8534 }
0x30ca   :  { %v8537_v15 = vpop.eup %8536  ;;  %v2985_v58 = vadd.f32 1.0, %v8535_v20 }
0x30cb   :  { %v2984_v23 = vadd.f32 1.0, %v8537_v15  ;;  %v8539_v40 = vpop.eup %8538  ;;  %v2347_v15 = vadd.f32 %v9376_v38, %v9610_v2 }
0x30cc   :  { %8542 = vrcp.f32 %v2985_v58  ;;  %v8541_v26 = vpop.eup %8540 }
0x30cd   :  { %8544 = vrcp.f32 %v2984_v23 }
0x30ce   :  { %8546 = vpow2.f32 %v6272_v54 }
0x30d6   :  { %v8543_v25 = vpop.eup %8542 }
0x30d7   :  { %v8545_v30 = vpop.eup %8544  ;;  %v2994_v29 = vsel %vm2401_vm6, %v8539_v40, %v8543_v25 }
0x30d8   :  { %3001 = vrot.lane.b32.xlu1 %v2994_v29, %s8845_s3  ;;  %v2993_v35 = vsel %vm2397_vm7, %v8541_v26, %v8545_v30  ;;  %v8547_v6 = vpop.eup %8546 }
0x30d9   :  { %2999 = vrot.lane.b32.xlu0 %v2993_v35, %s8845_s3  ;;  %v2983_v49 = vadd.f32 1.0, %v8547_v6  ;;  %v2996_v56 = vmul.f32 %v2993_v35, %v9701_v34 }
0x30db   :  { %8548 = vrcp.f32 %v2983_v49 }
0x30e5   :  { %v8549_v12 = vpop.eup %8548 }
0x30e6   :  { %v2995_v37 = vmul.f32 %v8549_v12, %v9699_v9 }
0x314a   :  { %v3002_v50 = vpop.permute.xlu1 %3001 }
0x314b   :  { %v3000_v22 = vpop.permute.xlu0 %2999 }
0x314c   :  { %v3003_v19 = vsel %vm2587_vm8, %v3000_v22, %v3002_v50 }
0x314d   :  { %v3005_v55 = vmul.f32 %v8549_v12, %v3003_v19 }
0x314f   :  { %3007 = vrot.lane.b32.xlu0 %v3005_v55, %s8847_s9 }
0x31c1   :  { %v3008_v60 = vpop.permute.xlu0 %3007 }
0x31c2   :  { %v9753_v53 = vadd.f32 %v3008_v60, %v2995_v37  ;;  %v9755_v32 = vadd.f32 %v3008_v60, %v2996_v56 }
0x31c4   :  { %8550 = vtanh.f32 %v9753_v53 }
0x31c5   :  { %8552 = vtanh.f32 %v9755_v32 }
0x31ce   :  { %v8551_v51 = vpop.eup %8550 }
0x31cf   :  { %v8553_v16 = vpop.eup %8552  ;;  %3016 = vrot.lane.b32.xlu1 %v8551_v51, %s8845_s3 }
0x31d0   :  { %3018 = vrot.lane.b32.xlu0 %v8553_v16, %s8845_s3 }
0x3241   :  { %v3017_v0 = vpop.permute.xlu1 %3016 }
0x3242   :  { %v3019_v17 = vpop.permute.xlu0 %3018 }
0x3243   :  { %v3020_v34 = vsel %vm2587_vm8, %v3017_v0, %v3019_v17 }
0x3244   :  { %v3022_v9 = vmul.f32 %v3020_v34, %v2994_v29 }
0x3246   :  { %3024 = vrot.lane.b32.xlu1 %v3022_v9, %s8847_s9 }
0x32b8   :  { %v3025_v20 = vpop.permute.xlu1 %3024 }
0x32b9   :  { %3028 = vst.msk [vmem:[#allocation5 + $0x10] sm:$0xff] %vm2408_vm9, %v3025_v20  ;;  %6275 = vmatmul.mubr.msk.f32.vlgmr.msra.gmra.mrb[26].mxu0 %vm2408_vm9, %v3025_v20  ;;  %7046 = vmatmul.mubr.msk.f32.vlgmr.msra.gmra.mrb[42].mxu1 %vm2408_vm9, %v3025_v20 }
0x32ba   :  { %7726 = vmatpush1.bf16.msra.mxu0 %v9413_v61  ;;  %7749 = vmatpush3.bf16.msra.mxu1 %v9439_v8 }
0x32bb   :  { %7728 = vmatprep.subr.bf16.mxu0 %v9415_v62  ;;  %7750 = vmatprep.subr.bf16.mxu1 %v8842_v7 }
0x32bc   :  { %3307 = vmatprep.mubr.f32.mxu0 %v8844_v13  ;;  %7072 = vmatprep.mubr.msk.f32.mxu1 %vm8843_vm1, %v8844_v13 }
0x32be   :  { %7730 = vmatpush1.bf16.msra.mxu0 %v9437_v5  ;;  %7752 = vmatpush3.bf16.msra.mxu1 %v9457_v18 }
0x32bf   :  { %7732 = vmatprep.subr.bf16.mxu0 %v9445_v10  ;;  %7753 = vmatprep.subr.bf16.mxu1 %v8842_v7 }
0x32c2   :  { %7734 = vmatpush1.bf16.msra.mxu0 %v9473_v11  ;;  %7755 = vmatpush3.bf16.msra.mxu1 %v9485_v27 }
0x32c3   :  { %7736 = vmatprep.subr.bf16.mxu0 %v9476_v21  ;;  %7756 = vmatprep.subr.bf16.mxu1 %v8842_v7 }
0x32c6   :  { %7738 = vmatpush1.bf16.msra.mxu0 %v9490_v24  ;;  %7758 = vmatpush3.bf16.msra.mxu1 %v9502_v31 }
0x32c7   :  { %7740 = vmatprep.subr.bf16.mxu0 %v9513_v4  ;;  %7759 = vmatprep.subr.bf16.mxu1 %v8842_v7 }
0x32ca   :  { %7742 = vmatpush1.bf16.msra.mxu0 %v9525_v43  ;;  %7761 = vmatpush3.bf16.msra.mxu1 %v9527_v44 }
0x32cb   :  { %7744 = vmatprep.subr.bf16.mxu0 %v9537_v48  ;;  %7762 = vmatprep.subr.bf16.mxu1 %v8842_v7 }
0x32ce   :  { %7746 = vmatpush1.bf16.msra.mxu0 %v9552_v52  ;;  %7764 = vmatpush3.bf16.msra.mxu1 %v9557_v42 }
0x32cf   :  { %7766 = vmatprep.subr.bf16.mxu0 %v9402_v59  ;;  %7789 = vmatprep.subr.bf16.mxu1 %v8842_v7 }
0x338c   :  { %v3101_v58 = vpop.f32.mrb[26].mxu0  ;;  %v3172_v23 = vpop.f32.mrb[42].mxu1 }
0x338d   :  { %v3178_v40 = vadd.f32 %v3172_v23, %v2347_v15  ;;  %v3103_v26 = vpop.f32.mrb[27].mxu0  ;;  %v7047_v25 = vpop.f32.mrb[43].mxu1  ;;  %v8299_v56 = vadd.f32 %v3101_v58, %v9640_v14 }
0x338e   :  { %v8300_v30 = vadd.f32 %v3103_v26, %v9618_v39 }
0x338f   :  { %v6279_v29 = vmul.f32 -1.442695, %v3178_v40  ;;  %v6277_v37 = vmul.f32 -1.442695, %v8299_v56 }
0x3390   :  { %v6278_v35 = vmul.f32 -1.442695, %v8300_v30 }
0x3391   :  { %8554 = vpow2.f32 %v6279_v29 }
0x3392   :  { %8556 = vpow2.f32 %v6278_v35 }
0x3393   :  { %8558 = vtanh.f32 %v3178_v40 }
0x3394   :  { %8560 = vtanh.f32 %v8300_v30 }
0x339b   :  { %v8555_v36 = vpop.eup %8554 }
0x339c   :  { %v8557_v54 = vpop.eup %8556  ;;  %v3193_v6 = vadd.f32 1.0, %v8555_v36  ;;  %v2352_v36 = vadd.f32 %v9382_v46, %v9610_v2 }
0x339d   :  { %v3192_v49 = vadd.f32 1.0, %v8557_v54  ;;  %v8559_v38 = vpop.eup %8558 }
0x339e   :  { %8562 = vrcp.f32 %v3193_v6  ;;  %v8561_v50 = vpop.eup %8560 }
0x339f   :  { %8564 = vrcp.f32 %v3192_v49 }
0x33a0   :  { %8566 = vpow2.f32 %v6277_v37 }
0x33a8   :  { %v8563_v22 = vpop.eup %8562 }
0x33a9   :  { %v8565_v12 = vpop.eup %8564  ;;  %v3202_v19 = vsel %vm2401_vm6, %v8559_v38, %v8563_v22 }
0x33aa   :  { %3209 = vrot.lane.b32.xlu1 %v3202_v19, %s8845_s3  ;;  %v3201_v55 = vsel %vm2397_vm7, %v8561_v50, %v8565_v12  ;;  %v8567_v60 = vpop.eup %8566 }
0x33ab   :  { %3207 = vrot.lane.b32.xlu0 %v3201_v55, %s8845_s3  ;;  %v3191_v51 = vadd.f32 1.0, %v8567_v60  ;;  %v3204_v20 = vmul.f32 %v3201_v55, %v9755_v32 }
0x33ad   :  { %8568 = vrcp.f32 %v3191_v51 }
0x33b7   :  { %v8569_v17 = vpop.eup %8568 }
0x33b8   :  { %v3203_v15 = vmul.f32 %v8569_v17, %v9753_v53 }
0x341c   :  { %v3210_v16 = vpop.permute.xlu1 %3209 }
0x341d   :  { %v3208_v0 = vpop.permute.xlu0 %3207 }
0x341e   :  { %v3211_v34 = vsel %vm2587_vm8, %v3208_v0, %v3210_v16 }
0x341f   :  { %v3213_v9 = vmul.f32 %v8569_v17, %v3211_v34 }
0x3421   :  { %3215 = vrot.lane.b32.xlu0 %v3213_v9, %s8847_s9 }
0x3493   :  { %v3216_v23 = vpop.permute.xlu0 %3215 }
0x3494   :  { %v9807_v40 = vadd.f32 %v3216_v23, %v3203_v15  ;;  %v9809_v58 = vadd.f32 %v3216_v23, %v3204_v20 }
0x3496   :  { %8570 = vtanh.f32 %v9807_v40 }
0x3497   :  { %8572 = vtanh.f32 %v9809_v58 }
0x34a0   :  { %v8571_v26 = vpop.eup %8570 }
0x34a1   :  { %v8573_v25 = vpop.eup %8572  ;;  %3224 = vrot.lane.b32.xlu1 %v8571_v26, %s8845_s3 }
0x34a2   :  { %3226 = vrot.lane.b32.xlu0 %v8573_v25, %s8845_s3 }
0x3513   :  { %v3225_v30 = vpop.permute.xlu1 %3224 }
0x3514   :  { %v3227_v29 = vpop.permute.xlu0 %3226 }
0x3515   :  { %v3228_v32 = vsel %vm2587_vm8, %v3225_v30, %v3227_v29 }
0x3516   :  { %v3230_v53 = vmul.f32 %v3228_v32, %v3202_v19 }
0x3518   :  { %3232 = vrot.lane.b32.xlu1 %v3230_v53, %s8847_s9 }
0x358a   :  { %v3233_v35 = vpop.permute.xlu1 %3232 }
0x358b   :  { %3236 = vst.msk [vmem:[#allocation5 + $0x18] sm:$0xff] %vm2408_vm9, %v3233_v35  ;;  %6280 = vmatmul.mubr.msk.f32.vlgmr.msra.gmra.mrb[28].mxu0 %vm2408_vm9, %v3233_v35  ;;  %7073 = vmatmul.mubr.msk.f32.vlgmr.msra.gmra.mrb[44].mxu1 %vm2408_vm9, %v3233_v35 }
0x358c   :  { %7768 = vmatpush1.bf16.msra.mxu0 %v9413_v61  ;;  %7791 = vmatpush3.bf16.msra.mxu1 %v9439_v8 }
0x358d   :  { %7770 = vmatprep.subr.bf16.mxu0 %v9415_v62  ;;  %7792 = vmatprep.subr.bf16.mxu1 %v8842_v7 }
0x358e   :  { %3515 = vmatprep.mubr.f32.mxu0 %v8844_v13  ;;  %7099 = vmatprep.mubr.msk.f32.mxu1 %vm8843_vm1, %v8844_v13 }
0x3590   :  { %7772 = vmatpush1.bf16.msra.mxu0 %v9437_v5  ;;  %7794 = vmatpush3.bf16.msra.mxu1 %v9457_v18 }
0x3591   :  { %7774 = vmatprep.subr.bf16.mxu0 %v9445_v10  ;;  %7795 = vmatprep.subr.bf16.mxu1 %v8842_v7 }
0x3594   :  { %7776 = vmatpush1.bf16.msra.mxu0 %v9473_v11  ;;  %7797 = vmatpush3.bf16.msra.mxu1 %v9485_v27 }
0x3595   :  { %7778 = vmatprep.subr.bf16.mxu0 %v9476_v21  ;;  %7798 = vmatprep.subr.bf16.mxu1 %v8842_v7 }
0x3598   :  { %7780 = vmatpush1.bf16.msra.mxu0 %v9490_v24  ;;  %7800 = vmatpush3.bf16.msra.mxu1 %v9502_v31 }
0x3599   :  { %7782 = vmatprep.subr.bf16.mxu0 %v9513_v4  ;;  %7801 = vmatprep.subr.bf16.mxu1 %v8842_v7 }
0x359c   :  { %7784 = vmatpush1.bf16.msra.mxu0 %v9525_v43  ;;  %7803 = vmatpush3.bf16.msra.mxu1 %v9527_v44 }
0x359d   :  { %7786 = vmatprep.subr.bf16.mxu0 %v9537_v48  ;;  %7804 = vmatprep.subr.bf16.mxu1 %v8842_v7 }
0x35a0   :  { %7788 = vmatpush1.bf16.msra.mxu0 %v9552_v52  ;;  %7806 = vmatpush3.bf16.msra.mxu1 %v9557_v42 }
0x35a1   :  { %7808 = vmatprep.subr.bf16.mxu0 %v9402_v59  ;;  %7831 = vmatprep.subr.bf16.mxu1 %v8842_v7 }
0x365e   :  { %v3309_v54 = vpop.f32.mrb[28].mxu0  ;;  %v3380_v6 = vpop.f32.mrb[44].mxu1 }
0x365f   :  { %v3386_v49 = vadd.f32 %v3380_v6, %v2352_v36  ;;  %v3311_v38 = vpop.f32.mrb[29].mxu0  ;;  %v7074_v50 = vpop.f32.mrb[45].mxu1  ;;  %v8301_v9 = vadd.f32 %v3309_v54, %v9640_v14 }
0x3660   :  { %v8302_v22 = vadd.f32 %v3311_v38, %v9618_v39 }
0x3661   :  { %v6284_v12 = vmul.f32 -1.442695, %v3386_v49  ;;  %v6282_v20 = vmul.f32 -1.442695, %v8301_v9 }
0x3662   :  { %v6283_v19 = vmul.f32 -1.442695, %v8302_v22 }
0x3663   :  { %8574 = vpow2.f32 %v6284_v12 }
0x3664   :  { %8576 = vpow2.f32 %v6283_v19  ;;  %v2357_v19 = vadd.f32 %v9380_v45, %v9610_v2 }
0x3665   :  { %8578 = vtanh.f32 %v3386_v49 }
0x3666   :  { %8580 = vtanh.f32 %v8302_v22 }
0x366d   :  { %v8575_v55 = vpop.eup %8574 }
0x366e   :  { %v8577_v56 = vpop.eup %8576  ;;  %v3401_v37 = vadd.f32 1.0, %v8575_v55 }
0x366f   :  { %v3400_v60 = vadd.f32 1.0, %v8577_v56  ;;  %v8579_v46 = vpop.eup %8578 }
0x3670   :  { %8582 = vrcp.f32 %v3401_v37  ;;  %v8581_v51 = vpop.eup %8580 }
0x3671   :  { %8584 = vrcp.f32 %v3400_v60 }
0x3672   :  { %8586 = vpow2.f32 %v6282_v20 }
0x367a   :  { %v8583_v16 = vpop.eup %8582 }
0x367b   :  { %v8585_v0 = vpop.eup %8584  ;;  %v3410_v17 = vsel %vm2401_vm6, %v8579_v46, %v8583_v16 }
0x367c   :  { %3417 = vrot.lane.b32.xlu1 %v3410_v17, %s8845_s3  ;;  %v3409_v34 = vsel %vm2397_vm7, %v8581_v51, %v8585_v0  ;;  %v8587_v15 = vpop.eup %8586 }
0x367d   :  { %3415 = vrot.lane.b32.xlu0 %v3409_v34, %s8845_s3  ;;  %v3399_v23 = vadd.f32 1.0, %v8587_v15  ;;  %v3412_v53 = vmul.f32 %v3409_v34, %v9809_v58 }
0x367f   :  { %8588 = vrcp.f32 %v3399_v23 }
0x3689   :  { %v8589_v30 = vpop.eup %8588 }
0x368a   :  { %v3411_v35 = vmul.f32 %v8589_v30, %v9807_v40 }
0x36ee   :  { %v3418_v26 = vpop.permute.xlu1 %3417 }
0x36ef   :  { %v3416_v25 = vpop.permute.xlu0 %3415 }
0x36f0   :  { %v3419_v29 = vsel %vm2587_vm8, %v3416_v25, %v3418_v26 }
0x36f1   :  { %v3421_v32 = vmul.f32 %v8589_v30, %v3419_v29 }
0x36f3   :  { %3423 = vrot.lane.b32.xlu0 %v3421_v32, %s8847_s9 }
0x3765   :  { %v3424_v36 = vpop.permute.xlu0 %3423 }
0x3766   :  { %v9861_v6 = vadd.f32 %v3424_v36, %v3411_v35  ;;  %v9863_v54 = vadd.f32 %v3424_v36, %v3412_v53 }
0x3768   :  { %8590 = vtanh.f32 %v9861_v6 }
0x3769   :  { %8592 = vtanh.f32 %v9863_v54 }
0x3772   :  { %v8591_v49 = vpop.eup %8590 }
0x3773   :  { %v8593_v38 = vpop.eup %8592  ;;  %3432 = vrot.lane.b32.xlu1 %v8591_v49, %s8845_s3 }
0x3774   :  { %3434 = vrot.lane.b32.xlu0 %v8593_v38, %s8845_s3 }
0x37e5   :  { %v3433_v50 = vpop.permute.xlu1 %3432 }
0x37e6   :  { %v3435_v22 = vpop.permute.xlu0 %3434 }
0x37e7   :  { %v3436_v58 = vsel %vm2587_vm8, %v3433_v50, %v3435_v22 }
0x37e8   :  { %v3438_v40 = vmul.f32 %v3436_v58, %v3410_v17 }
0x37ea   :  { %3440 = vrot.lane.b32.xlu1 %v3438_v40, %s8847_s9 }
0x385c   :  { %v3441_v12 = vpop.permute.xlu1 %3440 }
0x385d   :  { %3444 = vst.msk [vmem:[#allocation5 + $0x20] sm:$0xff] %vm2408_vm9, %v3441_v12  ;;  %6285 = vmatmul.mubr.msk.f32.vlgmr.msra.gmra.mrb[30].mxu0 %vm2408_vm9, %v3441_v12  ;;  %7100 = vmatmul.mubr.msk.f32.vlgmr.msra.gmra.mrb[46].mxu1 %vm2408_vm9, %v3441_v12 }
0x385e   :  { %7810 = vmatpush1.bf16.msra.mxu0 %v9413_v61  ;;  %7833 = vmatpush3.bf16.msra.mxu1 %v9439_v8 }
0x385f   :  { %7812 = vmatprep.subr.bf16.mxu0 %v9415_v62  ;;  %7834 = vmatprep.subr.bf16.mxu1 %v8842_v7 }
0x3860   :  { %3723 = vmatprep.mubr.f32.mxu0 %v8844_v13  ;;  %7126 = vmatprep.mubr.msk.f32.mxu1 %vm8843_vm1, %v8844_v13 }
0x3862   :  { %7814 = vmatpush1.bf16.msra.mxu0 %v9437_v5  ;;  %7836 = vmatpush3.bf16.msra.mxu1 %v9457_v18 }
0x3863   :  { %7816 = vmatprep.subr.bf16.mxu0 %v9445_v10  ;;  %7837 = vmatprep.subr.bf16.mxu1 %v8842_v7 }
0x3866   :  { %7818 = vmatpush1.bf16.msra.mxu0 %v9473_v11  ;;  %7839 = vmatpush3.bf16.msra.mxu1 %v9485_v27 }
0x3867   :  { %7820 = vmatprep.subr.bf16.mxu0 %v9476_v21  ;;  %7840 = vmatprep.subr.bf16.mxu1 %v8842_v7 }
0x386a   :  { %7822 = vmatpush1.bf16.msra.mxu0 %v9490_v24  ;;  %7842 = vmatpush3.bf16.msra.mxu1 %v9502_v31 }
0x386b   :  { %7824 = vmatprep.subr.bf16.mxu0 %v9513_v4  ;;  %7843 = vmatprep.subr.bf16.mxu1 %v8842_v7 }
0x386e   :  { %7826 = vmatpush1.bf16.msra.mxu0 %v9525_v43  ;;  %7845 = vmatpush3.bf16.msra.mxu1 %v9527_v44 }
0x386f   :  { %7828 = vmatprep.subr.bf16.mxu0 %v9537_v48  ;;  %7846 = vmatprep.subr.bf16.mxu1 %v8842_v7 }
0x3872   :  { %7830 = vmatpush1.bf16.msra.mxu0 %v9552_v52  ;;  %7848 = vmatpush3.bf16.msra.mxu1 %v9557_v42 }
0x3873   :  { %7850 = vmatprep.subr.bf16.mxu0 %v9402_v59  ;;  %7873 = vmatprep.subr.bf16.mxu1 %v8842_v7 }
0x3930   :  { %v3517_v55 = vpop.f32.mrb[30].mxu0  ;;  %v3588_v56 = vpop.f32.mrb[46].mxu1 }
0x3931   :  { %v3594_v37 = vadd.f32 %v3588_v56, %v2357_v19  ;;  %v3519_v60 = vpop.f32.mrb[31].mxu0  ;;  %v7101_v46 = vpop.f32.mrb[47].mxu1  ;;  %v8303_v30 = vadd.f32 %v3517_v55, %v9640_v14 }
0x3932   :  { %v8304_v51 = vadd.f32 %v3519_v60, %v9618_v39 }
0x3933   :  { %v6289_v16 = vmul.f32 -1.442695, %v3594_v37  ;;  %v6287_v29 = vmul.f32 -1.442695, %v8303_v30 }
0x3934   :  { %v6288_v0 = vmul.f32 -1.442695, %v8304_v51 }
0x3935   :  { %8594 = vpow2.f32 %v6289_v16 }
0x3936   :  { %8596 = vpow2.f32 %v6288_v0 }
0x3937   :  { %8598 = vtanh.f32 %v3594_v37 }
0x3938   :  { %8600 = vtanh.f32 %v8304_v51 }
0x393f   :  { %v8595_v17 = vpop.eup %8594 }
0x3940   :  { %v8597_v34 = vpop.eup %8596  ;;  %v3609_v59 = vadd.f32 1.0, %v8595_v17 }
0x3941   :  { %v3608_v9 = vadd.f32 1.0, %v8597_v34  ;;  %v8599_v45 = vpop.eup %8598 }
0x3942   :  { %8602 = vrcp.f32 %v3609_v59  ;;  %v8601_v20 = vpop.eup %8600 }
0x3943   :  { %8604 = vrcp.f32 %v3608_v9 }
0x3944   :  { %8606 = vpow2.f32 %v6287_v29 }
0x394c   :  { %v8603_v15 = vpop.eup %8602 }
0x394d   :  { %v8605_v23 = vpop.eup %8604  ;;  %v3618_v26 = vsel %vm2401_vm6, %v8599_v45, %v8603_v15 }
0x394e   :  { %3625 = vrot.lane.b32.xlu1 %v3618_v26, %s8845_s3  ;;  %v3617_v25 = vsel %vm2397_vm7, %v8601_v20, %v8605_v23  ;;  %v8607_v32 = vpop.eup %8606 }
0x394f   :  { %3623 = vrot.lane.b32.xlu0 %v3617_v25, %s8845_s3  ;;  %v3607_v53 = vadd.f32 1.0, %v8607_v32  ;;  %v3620_v22 = vmul.f32 %v3617_v25, %v9863_v54  ;;  %v4078_v32 = vld [vmem:[%s10797_s10 + $0x8] sm:$0xff] }
0x3951   :  { %8608 = vrcp.f32 %v3607_v53  ;;  %v4081_v53 = vld [vmem:[%s10797_s10 + $0x20] sm:$0xff] }
0x395b   :  { %v8609_v49 = vpop.eup %8608 }
0x395c   :  { %v3619_v58 = vmul.f32 %v8609_v49, %v9861_v6 }
0x39c0   :  { %v3626_v35 = vpop.permute.xlu1 %3625 }
0x39c1   :  { %v3624_v36 = vpop.permute.xlu0 %3623 }
0x39c2   :  { %v3627_v38 = vsel %vm2587_vm8, %v3624_v36, %v3626_v35  ;;  %v4079_v35 = vld [vmem:[%s10797_s10 + $0x10] sm:$0xff]  ;;  %v7891_v36 = vpack.c.bf16 %v4081_v53, %v4078_v32  ;;  %v4101_v32 = vld [vmem:[%s10797_s10 + $0xc0] sm:$0xff]  ;;  %v4104_v53 = vld [vmem:[%s10797_s10 + $0xd8] sm:$0xff] }
0x39c3   :  { %v3629_v50 = vmul.f32 %v8609_v49, %v3627_v38  ;;  %v4082_v49 = vld [vmem:[%s10797_s10 + $0x28] sm:$0xff] }
0x39c4   :  { %v7915_v38 = vpack.c.bf16 %v4082_v49, %v4079_v35  ;;  %v4108_v35 = vld [vmem:[%s10797_s10 + $0xf8] sm:$0xff]  ;;  %v4109_v49 = vld [vmem:[%s10797_s10 + $0x100] sm:$0xff] }
0x39c5   :  { %3631 = vrot.lane.b32.xlu0 %v3629_v50, %s8847_s9 }
0x3a37   :  { %v3632_v40 = vpop.permute.xlu0 %3631 }
0x3a38   :  { %v9915_v12 = vadd.f32 %v3632_v40, %v3619_v58  ;;  %v9917_v19 = vadd.f32 %v3632_v40, %v3620_v22 }
0x3a3a   :  { %8610 = vtanh.f32 %v9915_v12 }
0x3a3b   :  { %8612 = vtanh.f32 %v9917_v19 }
0x3a44   :  { %v8611_v55 = vpop.eup %8610 }
0x3a45   :  { %v8613_v56 = vpop.eup %8612  ;;  %3640 = vrot.lane.b32.xlu1 %v8611_v55, %s8845_s3  ;;  %v4077_v55 = vld [vmem:[%s10797_s10] sm:$0xff] }
0x3a46   :  { %3642 = vrot.lane.b32.xlu0 %v8613_v56, %s8845_s3  ;;  %v4080_v56 = vld [vmem:[%s10797_s10 + $0x18] sm:$0xff] }
0x3ab7   :  { %v3641_v37 = vpop.permute.xlu1 %3640 }
0x3ab8   :  { %v3643_v60 = vpop.permute.xlu0 %3642 }
0x3ab9   :  { %v3644_v54 = vsel %vm2587_vm8, %v3641_v37, %v3643_v60  ;;  %v4084_v37 = vld [vmem:[%s10797_s10 + $0x38] sm:$0xff]  ;;  %v4087_v60 = vld [vmem:[%s10797_s10 + $0x50] sm:$0xff] }
0x3aba   :  { %v3646_v6 = vmul.f32 %v3644_v54, %v3618_v26  ;;  %v4085_v54 = vld [vmem:[%s10797_s10 + $0x40] sm:$0xff] }
0x3abc   :  { %3648 = vrot.lane.b32.xlu1 %v3646_v6, %s8847_s9  ;;  %v4088_v6 = vld [vmem:[%s10797_s10 + $0x58] sm:$0xff] }
0x3b2e   :  { %v3649_v46 = vpop.permute.xlu1 %3648 }
0x3b2f   :  { %3652 = vst.msk [vmem:[#allocation5 + $0x28] sm:$0xff] %vm2408_vm9, %v3649_v46  ;;  %6290 = vmatmul.mubr.msk.f32.vlgmr.msra.gmra.mrb[32].mxu0 %vm2408_vm9, %v3649_v46  ;;  %7127 = vmatmul.mubr.msk.f32.vlgmr.msra.gmra.mrb[48].mxu1 %vm2408_vm9, %v3649_v46  ;;  %v7893_v46 = vpack.c.bf16 %v4080_v56, %v4077_v55  ;;  %v4070_v55 = vld [vmem:[#allocation5 + $0x8] sm:$0xff]  ;;  %v4071_v56 = vld [vmem:[#allocation5 + $0x10] sm:$0xff] }
0x3b30   :  { %7852 = vmatpush1.bf16.msra.mxu0 %v9413_v61  ;;  %7875 = vmatpush3.bf16.msra.mxu1 %v9439_v8  ;;  %v2362_v61 = vadd.f32 %v9614_v28, %v9610_v2 }
0x3b31   :  { %7854 = vmatprep.subr.bf16.mxu0 %v9415_v62  ;;  %7876 = vmatprep.subr.bf16.mxu1 %v8842_v7 }
0x3b32   :  { %3931 = vmatprep.mubr.f32.mxu0 %v8844_v13  ;;  %7153 = vmatprep.mubr.msk.f32.mxu1 %vm8843_vm1, %v8844_v13 }
0x3b34   :  { %7856 = vmatpush1.bf16.msra.mxu0 %v9437_v5  ;;  %7878 = vmatpush3.bf16.msra.mxu1 %v9457_v18 }
0x3b35   :  { %7858 = vmatprep.subr.bf16.mxu0 %v9445_v10  ;;  %7879 = vmatprep.subr.bf16.mxu1 %v8842_v7 }
0x3b38   :  { %7860 = vmatpush1.bf16.msra.mxu0 %v9473_v11  ;;  %7881 = vmatpush3.bf16.msra.mxu1 %v9485_v27 }
0x3b39   :  { %7862 = vmatprep.subr.bf16.mxu0 %v9476_v21  ;;  %7882 = vmatprep.subr.bf16.mxu1 %v8842_v7 }
0x3b3c   :  { %7864 = vmatpush1.bf16.msra.mxu0 %v9490_v24  ;;  %7884 = vmatpush3.bf16.msra.mxu1 %v9502_v31 }
0x3b3d   :  { %7866 = vmatprep.subr.bf16.mxu0 %v9513_v4  ;;  %7885 = vmatprep.subr.bf16.mxu1 %v8842_v7 }
0x3b40   :  { %7868 = vmatpush1.bf16.msra.mxu0 %v9525_v43  ;;  %7887 = vmatpush3.bf16.msra.mxu1 %v9527_v44 }
0x3b41   :  { %7870 = vmatprep.subr.bf16.mxu0 %v9537_v48  ;;  %7888 = vmatprep.subr.bf16.mxu1 %v8842_v7 }
0x3b44   :  { %7872 = vmatpush1.bf16.msra.mxu0 %v9552_v52  ;;  %7890 = vmatpush3.bf16.msra.mxu1 %v9557_v42 }
0x3b45   :  { %7892 = vmatprep.subr.bf16.mxu1 %v7891_v36  ;;  %7916 = vmatprep.subr.bf16.mxu0 %v7915_v38  ;;  %v4111_v36 = vld [vmem:[%s10797_s10 + $0x110] sm:$0xff] }
0x3c02   :  { %v3725_v62 = vpop.f32.mrb[32].mxu0  ;;  %v3796_v5 = vpop.f32.mrb[48].mxu1 }
0x3c03   :  { %v3802_v8 = vadd.f32 %v3796_v5, %v2362_v61  ;;  %v3727_v10 = vpop.f32.mrb[33].mxu0  ;;  %v7128_v18 = vpop.f32.mrb[49].mxu1  ;;  %v8305_v16 = vadd.f32 %v3725_v62, %v9640_v14  ;;  %v7895_v61 = vpack.c.bf16 %v4087_v60, %v4084_v37  ;;  %v4083_v62 = vld [vmem:[%s10797_s10 + $0x30] sm:$0xff]  ;;  %v4086_v5 = vld [vmem:[%s10797_s10 + $0x48] sm:$0xff]  ;;  %v4072_v37 = vld [vmem:[#allocation5 + $0x18] sm:$0xff] }
0x3c04   :  { %v8306_v11 = vadd.f32 %v3727_v10, %v9618_v39  ;;  %v7919_v18 = vpack.c.bf16 %v4088_v6, %v4085_v54  ;;  %v4073_v60 = vld [vmem:[#allocation5 + $0x20] sm:$0xff]  ;;  %v4074_v54 = vld [vmem:[#allocation5 + $0x28] sm:$0xff] }
0x3c05   :  { %v6294_v21 = vmul.f32 -1.442695, %v3802_v8  ;;  %v6292_v0 = vmul.f32 -1.442695, %v8305_v16 }
0x3c06   :  { %v6293_v27 = vmul.f32 -1.442695, %v8306_v11 }
0x3c07   :  { %8614 = vpow2.f32 %v6294_v21  ;;  %v4091_v21 = vld [vmem:[%s10797_s10 + $0x70] sm:$0xff] }
0x3c08   :  { %8616 = vpow2.f32 %v6293_v27  ;;  %v4094_v27 = vld [vmem:[%s10797_s10 + $0x88] sm:$0xff] }
0x3c09   :  { %8618 = vtanh.f32 %v3802_v8  ;;  %v4090_v8 = vld [vmem:[%s10797_s10 + $0x68] sm:$0xff] }
0x3c0a   :  { %8620 = vtanh.f32 %v8306_v11  ;;  %v4093_v11 = vld [vmem:[%s10797_s10 + $0x80] sm:$0xff] }
0x3c11   :  { %v8615_v24 = vpop.eup %8614 }
0x3c12   :  { %v8617_v31 = vpop.eup %8616  ;;  %v3817_v4 = vadd.f32 1.0, %v8615_v24  ;;  %v4069_v24 = vld [vmem:[#allocation5] sm:$0xff] }
0x3c13   :  { %v3816_v43 = vadd.f32 1.0, %v8617_v31  ;;  %v8619_v44 = vpop.eup %8618  ;;  %v7897_v31 = vpack.c.bf16 %v4086_v5, %v4083_v62 }
0x3c14   :  { %8622 = vrcp.f32 %v3817_v4  ;;  %v8621_v48 = vpop.eup %8620  ;;  %v7899_v4 = vpack.c.bf16 %v4093_v11, %v4090_v8 }
0x3c15   :  { %8624 = vrcp.f32 %v3816_v43  ;;  %v7923_v43 = vpack.c.bf16 %v4094_v27, %v4091_v21 }
0x3c16   :  { %8626 = vpow2.f32 %v6292_v0 }
0x3c1e   :  { %v8623_v52 = vpop.eup %8622 }
0x3c1f   :  { %v8625_v42 = vpop.eup %8624  ;;  %v3826_v28 = vsel %vm2401_vm6, %v8619_v44, %v8623_v52  ;;  %v4089_v44 = vld [vmem:[%s10797_s10 + $0x60] sm:$0xff]  ;;  %v4096_v52 = vld [vmem:[%s10797_s10 + $0x98] sm:$0xff] }
0x3c20   :  { %3833 = vrot.lane.b32.xlu1 %v3826_v28, %s8845_s3  ;;  %v3825_v51 = vsel %vm2397_vm7, %v8621_v48, %v8625_v42  ;;  %v8627_v17 = vpop.eup %8626  ;;  %v4092_v48 = vld [vmem:[%s10797_s10 + $0x78] sm:$0xff]  ;;  %v4099_v42 = vld [vmem:[%s10797_s10 + $0xb0] sm:$0xff] }
0x3c21   :  { %3831 = vrot.lane.b32.xlu0 %v3825_v51, %s8845_s3  ;;  %v3815_v34 = vadd.f32 1.0, %v8627_v17  ;;  %v3828_v26 = vmul.f32 %v3825_v51, %v9917_v19  ;;  %v4100_v51 = vld [vmem:[%s10797_s10 + $0xb8] sm:$0xff]  ;;  %v7901_v16 = vpack.c.bf16 %v4092_v48, %v4089_v44  ;;  %v7903_v0 = vpack.c.bf16 %v4099_v42, %v4096_v52 }
0x3c23   :  { %8628 = vrcp.f32 %v3815_v34  ;;  %v4095_v34 = vld [vmem:[%s10797_s10 + $0x90] sm:$0xff] }
0x3c2d   :  { %v8629_v45 = vpop.eup %8628 }
0x3c2e   :  { %v3827_v23 = vmul.f32 %v8629_v45, %v9915_v12 }
0x3c92   :  { %v3834_v59 = vpop.permute.xlu1 %3833 }
0x3c93   :  { %v3832_v9 = vpop.permute.xlu0 %3831 }
0x3c94   :  { %v3835_v20 = vsel %vm2587_vm8, %v3832_v9, %v3834_v59  ;;  %v4098_v59 = vld [vmem:[%s10797_s10 + $0xa8] sm:$0xff] }
0x3c95   :  { %v3837_v15 = vmul.f32 %v8629_v45, %v3835_v20  ;;  %v4102_v9 = vld [vmem:[%s10797_s10 + $0xc8] sm:$0xff]  ;;  %v4105_v45 = vld [vmem:[%s10797_s10 + $0xe0] sm:$0xff]  ;;  %v4103_v20 = vld [vmem:[%s10797_s10 + $0xd0] sm:$0xff] }
0x3c97   :  { %3839 = vrot.lane.b32.xlu0 %v3837_v15, %s8847_s9  ;;  %v4106_v15 = vld [vmem:[%s10797_s10 + $0xe8] sm:$0xff] }
0x3d09   :  { %v3840_v25 = vpop.permute.xlu0 %3839 }
0x3d0a   :  { %v9967_v30 = vadd.f32 %v3840_v25, %v3827_v23  ;;  %v9969_v29 = vadd.f32 %v3840_v25, %v3828_v26  ;;  %v7905_v23 = vpack.c.bf16 %v4098_v59, %v4095_v34  ;;  %v7907_v26 = vpack.c.bf16 %v4105_v45, %v4102_v9 }
0x3d0b   :  { %v7931_v25 = vpack.c.bf16 %v4106_v15, %v4103_v20 }
0x3d0c   :  { %8630 = vtanh.f32 %v9967_v30 }
0x3d0d   :  { %8632 = vtanh.f32 %v9969_v29 }
0x3d16   :  { %v8631_v50 = vpop.eup %8630 }
0x3d17   :  { %v8633_v22 = vpop.eup %8632  ;;  %3848 = vrot.lane.b32.xlu1 %v8631_v50, %s8845_s3  ;;  %v7909_v50 = vpack.c.bf16 %v4104_v53, %v4101_v32 }
0x3d18   :  { %3850 = vrot.lane.b32.xlu0 %v8633_v22, %s8845_s3  ;;  %v7911_v22 = vpack.c.bf16 %v4111_v36, %v4108_v35  ;;  %v4114_v36 = vld [vmem:[%s10798_s11 + $0x8] sm:$0xff] }
0x3d89   :  { %v3849_v58 = vpop.permute.xlu1 %3848 }
0x3d8a   :  { %v3851_v40 = vpop.permute.xlu0 %3850 }
0x3d8b   :  { %v3852_v12 = vsel %vm2587_vm8, %v3849_v58, %v3851_v40  ;;  %v4107_v40 = vld [vmem:[%s10797_s10 + $0xf0] sm:$0xff] }
0x3d8c   :  { %v3854_v19 = vmul.f32 %v3852_v12, %v3826_v28  ;;  %v4097_v28 = vld [vmem:[%s10797_s10 + $0xa0] sm:$0xff]  ;;  %v4110_v12 = vld [vmem:[%s10797_s10 + $0x108] sm:$0xff] }
0x3d8d   :  { %v7927_v17 = vpack.c.bf16 %v4100_v51, %v4097_v28 }
0x3d8e   :  { %3856 = vrot.lane.b32.xlu1 %v3854_v19, %s8847_s9  ;;  %v7913_v19 = vpack.c.bf16 %v4110_v12, %v4107_v40  ;;  %v4119_v12 = vld [vmem:[%s10798_s11 + $0x30] sm:$0xff] }
0x3e00   :  { %v3857_v10 = vpop.permute.xlu1 %3856 }
0x3e01   :  { %3860 = vst.msk [vmem:[#allocation5 + $0x30] sm:$0xff] %vm2408_vm9, %v3857_v10  ;;  %6295 = vmatmul.mubr.msk.f32.vlgmr.msra.gmra.mrb[34].mxu0 %vm2408_vm9, %v3857_v10  ;;  %7154 = vmatmul.mubr.msk.f32.vlgmr.msra.gmra.mrb[50].mxu1 %vm2408_vm9, %v3857_v10 }
0x3e02   :  { %7894 = vmatpush1.bf16.msra.mxu1 %v7893_v46  ;;  %7918 = vmatpush3.bf16.msra.mxu0 %v7915_v38  ;;  %v4112_v38 = vld [vmem:[%s10797_s10 + $0x118] sm:$0xff]  ;;  %v2367_v46 = vadd.f32 %v9612_v3, %v9610_v2 }
0x3e03   :  { %7180 = vmatprep.mubr.msk.f32.mxu0 %vm2408_vm9, %v4069_v24  ;;  %7896 = vmatprep.subr.bf16.mxu1 %v7895_v61  ;;  %v7935_v58 = vpack.c.bf16 %v4112_v38, %v4109_v49  ;;  %v4117_v49 = vld [vmem:[%s10798_s11 + $0x20] sm:$0xff] }
0x3e04   :  { %7920 = vmatprep.subr.bf16.mxu0 %v7919_v18  ;;  %4254 = vmatprep.mubr.f32.mxu1 %v8844_v13  ;;  %v4113_v38 = vld [vmem:[%s10798_s11] sm:$0xff] }
0x3e06   :  { %7898 = vmatpush1.bf16.msra.mxu1 %v7897_v31  ;;  %7922 = vmatpush3.bf16.msra.mxu0 %v7919_v18 }
0x3e07   :  { %7900 = vmatprep.subr.bf16.mxu1 %v7899_v4  ;;  %7924 = vmatprep.subr.bf16.mxu0 %v7923_v43 }
0x3e08   :  { %v4075_v6 = vld [vmem:[#allocation5 + $0x30] sm:$0xff] }
0x3e0a   :  { %7902 = vmatpush1.bf16.msra.mxu1 %v7901_v16  ;;  %7926 = vmatpush3.bf16.msra.mxu0 %v7923_v43 }
0x3e0b   :  { %7904 = vmatprep.subr.bf16.mxu1 %v7903_v0  ;;  %7928 = vmatprep.subr.bf16.mxu0 %v7927_v17 }
0x3e0e   :  { %7906 = vmatpush1.bf16.msra.mxu1 %v7905_v23  ;;  %7930 = vmatpush3.bf16.msra.mxu0 %v7927_v17 }
0x3e0f   :  { %7908 = vmatprep.subr.bf16.mxu1 %v7907_v26  ;;  %7932 = vmatprep.subr.bf16.mxu0 %v7931_v25 }
0x3e12   :  { %7910 = vmatpush1.bf16.msra.mxu1 %v7909_v50  ;;  %7934 = vmatpush3.bf16.msra.mxu0 %v7931_v25  ;;  %v4120_v50 = vld [vmem:[%s10798_s11 + $0x38] sm:$0xff] }
0x3e13   :  { %7912 = vmatprep.subr.bf16.mxu1 %v7911_v22  ;;  %7936 = vmatprep.subr.bf16.mxu0 %v7935_v58  ;;  %v4123_v22 = vld [vmem:[%s10798_s11 + $0x50] sm:$0xff] }
0x3e14   :  { %v10162_v40 = vpack.c.bf16 %v4123_v22, %v4120_v50  ;;  %v4148_v22 = vld [vmem:[%s10798_s11 + $0x118] sm:$0xff] }
0x3e16   :  { %7914 = vmatpush1.bf16.msra.mxu1 %v7913_v19  ;;  %7938 = vmatpush3.bf16.msra.mxu0 %v7935_v58  ;;  %v4122_v19 = vld [vmem:[%s10798_s11 + $0x48] sm:$0xff] }
0x3e17   :  { %7963 = vmatprep.subr.bf16.mxu0 %v8842_v7 }
0x3e19   :  { %6300 = vmatmul.mubr.msk.f32.vlgmr.msra.gmra.mrb[52].mxu1 %vm2408_vm9, %v4069_v24  ;;  %7181 = vmatmul.mubr.msk.f32.vlgmr.msra.gmra.mrb[36].mxu0 %vm2408_vm9, %v4070_v55 }
0x3e1a   :  { %7183 = vmatprep.mubr.msk.f32.mxu0 %vm2408_vm9, %v4071_v56  ;;  %4260 = vmatprep.mubr.f32.mxu1 %v8844_v13 }
0x3e1d   :  { %6301 = vmatmul.mubr.msk.f32.gmra.mrb[54].mxu1 %vm2408_vm9, %v4070_v55  ;;  %7184 = vmatmul.mubr.msk.f32.gmra.mrb[38].mxu0 %vm2408_vm9, %v4072_v37  ;;  %v4115_v55 = vld [vmem:[%s10798_s11 + $0x10] sm:$0xff] }
0x3e1e   :  { %7186 = vmatprep.mubr.msk.f32.mxu0 %vm2408_vm9, %v4073_v60  ;;  %4266 = vmatprep.mubr.f32.mxu1 %v8844_v13 }
0x3e21   :  { %6302 = vmatmul.mubr.msk.f32.gmra.mrb[56].mxu1 %vm2408_vm9, %v4071_v56  ;;  %7187 = vmatmul.mubr.msk.f32.gmra.mrb[40].mxu0 %vm2408_vm9, %v4074_v54  ;;  %v4118_v56 = vld [vmem:[%s10798_s11 + $0x28] sm:$0xff] }
0x3e22   :  { %7189 = vmatprep.mubr.msk.f32.mxu0 %vm2408_vm9, %v4075_v6  ;;  %4272 = vmatprep.mubr.f32.mxu1 %v8844_v13 }
0x3e25   :  { %6303 = vmatmul.mubr.msk.f32.gmra.mrb[58].mxu1 %vm2408_vm9, %v4072_v37  ;;  %v4126_v37 = vld [vmem:[%s10798_s11 + $0x68] sm:$0xff] }
0x3e26   :  { %4278 = vmatprep.mubr.f32.mxu1 %v8844_v13 }
0x3e29   :  { %6304 = vmatmul.mubr.msk.f32.gmra.mrb[60].mxu1 %vm2408_vm9, %v4073_v60  ;;  %v4129_v60 = vld [vmem:[%s10798_s11 + $0x80] sm:$0xff] }
0x3e2a   :  { %4284 = vmatprep.mubr.f32.mxu1 %v8844_v13 }
0x3e2d   :  { %6305 = vmatmul.mubr.msk.f32.gmra.mrb[62].mxu1 %vm2408_vm9, %v4074_v54  ;;  %v10184_v54 = vpack.c.bf16 %v4122_v19, %v4119_v12 }
0x3e2e   :  { %4290 = vmatprep.mubr.f32.mxu1 %v8844_v13 }
0x3e31   :  { %6306 = vmatmul.mubr.msk.f32.gmra.mrb[64].mxu1 %vm2408_vm9, %v4075_v6  ;;  %v10186_v6 = vpack.c.bf16 %v4118_v56, %v4115_v55 }
0x3e32   :  { %4296 = vmatprep.mubr.f32.mxu1 %v8844_v13 }
0x3e33   :  { %7965 = vmatpush3.bf16.msra.mxu0 %v10186_v6 }
0x3e34   :  { %7966 = vmatprep.subr.bf16.mxu0 %v8842_v7 }
0x3ed4   :  { %v3933_v61 = vpop.f32.mrb[34].mxu0  ;;  %v4004_v62 = vpop.f32.mrb[50].mxu1 }
0x3ed5   :  { %v4010_v5 = vadd.f32 %v4004_v62, %v2367_v46  ;;  %v3935_v8 = vpop.f32.mrb[35].mxu0  ;;  %v7155_v10 = vpop.f32.mrb[51].mxu1  ;;  %v8307_v17 = vadd.f32 %v3933_v61, %v9640_v14  ;;  %v4121_v46 = vld [vmem:[%s10798_s11 + $0x40] sm:$0xff]  ;;  %v10192_v61 = vpack.c.bf16 %v4129_v60, %v4126_v37 }
0x3ed6   :  { %v8308_v18 = vadd.f32 %v3935_v8, %v9618_v39  ;;  %v4125_v62 = vld [vmem:[%s10798_s11 + $0x60] sm:$0xff]  ;;  %v4124_v8 = vld [vmem:[%s10798_s11 + $0x58] sm:$0xff] }
0x3ed7   :  { %v6299_v11 = vmul.f32 -1.442695, %v4010_v5  ;;  %v6297_v34 = vmul.f32 -1.442695, %v8307_v17  ;;  %v10204_v10 = vpack.c.bf16 %v4124_v8, %v4121_v46  ;;  %v4133_v17 = vld [vmem:[%s10798_s11 + $0xa0] sm:$0xff] }
0x3ed8   :  { %v6298_v21 = vmul.f32 -1.442695, %v8308_v18 }
0x3ed9   :  { %8634 = vpow2.f32 %v6299_v11  ;;  %v4135_v11 = vld [vmem:[%s10798_s11 + $0xb0] sm:$0xff]  ;;  %7968 = vmatpush3.bf16.msra.mxu0 %v10204_v10 }
0x3eda   :  { %8636 = vpow2.f32 %v6298_v21  ;;  %v4127_v21 = vld [vmem:[%s10798_s11 + $0x70] sm:$0xff]  ;;  %7969 = vmatprep.subr.bf16.mxu0 %v8842_v7 }
0x3edb   :  { %8638 = vtanh.f32 %v4010_v5  ;;  %v4128_v5 = vld [vmem:[%s10798_s11 + $0x78] sm:$0xff] }
0x3edc   :  { %8640 = vtanh.f32 %v8308_v18  ;;  %v4132_v18 = vld [vmem:[%s10798_s11 + $0x98] sm:$0xff] }
0x3ee3   :  { %v8635_v27 = vpop.eup %8634 }
0x3ee4   :  { %v8637_v24 = vpop.eup %8636  ;;  %v4025_v31 = vadd.f32 1.0, %v8635_v27  ;;  %v4130_v27 = vld [vmem:[%s10798_s11 + $0x88] sm:$0xff] }
0x3ee5   :  { %v4024_v4 = vadd.f32 1.0, %v8637_v24  ;;  %v8639_v43 = vpop.eup %8638 }
0x3ee6   :  { %8642 = vrcp.f32 %v4025_v31  ;;  %v8641_v44 = vpop.eup %8640  ;;  %v10220_v31 = vpack.c.bf16 %v4128_v5, %v4125_v62 }
0x3ee7   :  { %8644 = vrcp.f32 %v4024_v4 }
0x3ee8   :  { %8646 = vpow2.f32 %v6297_v34  ;;  %v4136_v34 = vld [vmem:[%s10798_s11 + $0xb8] sm:$0xff] }
0x3eec   :  { %v10114_v2 = vpop.f32.mrb[36].mxu0 }
0x3eed   :  { %v10116_v3 = vpop.f32.mrb[37].mxu0 }
0x3ef0   :  { %v10118_v48 = vpop.f32.mrb[38].mxu0  ;;  %v8643_v39 = vpop.eup %8642 }
0x3ef1   :  { %v10120_v52 = vpop.f32.mrb[39].mxu0  ;;  %v8645_v42 = vpop.eup %8644  ;;  %v10124_v28 = vsel %vm2401_vm6, %v8639_v43, %v8643_v39  ;;  %v10224_v43 = vpack.c.bf16 %v4135_v11, %v4132_v18  ;;  %v4134_v39 = vld [vmem:[%s10798_s11 + $0xa8] sm:$0xff] }
0x3ef2   :  { %4041 = vrot.lane.b32.xlu1 %v10124_v28, %s8845_s3  ;;  %v4033_v51 = vsel %vm2397_vm7, %v8641_v44, %v8645_v42  ;;  %v8647_v59 = vpop.eup %8646  ;;  %v4131_v44 = vld [vmem:[%s10798_s11 + $0x90] sm:$0xff]  ;;  %v10234_v42 = vpack.c.bf16 %v4130_v27, %v4127_v21 }
0x3ef3   :  { %4039 = vrot.lane.b32.xlu0 %v4033_v51, %s8845_s3  ;;  %v4023_v9 = vadd.f32 1.0, %v8647_v59  ;;  %v4036_v32 = vmul.f32 %v4033_v51, %v9969_v29  ;;  %v4116_v29 = vld [vmem:[%s10798_s11 + $0x18] sm:$0xff]  ;;  %v10238_v51 = vpack.c.bf16 %v4134_v39, %v4131_v44  ;;  %v10250_v59 = vpack.c.bf16 %v4136_v34, %v4133_v17 }
0x3ef4   :  { %v10131_v16 = vpop.f32.mrb[40].mxu0  ;;  %v10160_v58 = vpack.c.bf16 %v4116_v29, %v4113_v38  ;;  %7971 = vmatpush3.bf16.msra.mxu0 %v10234_v42  ;;  %v4146_v38 = vld [vmem:[%s10798_s11 + $0x108] sm:$0xff]  ;;  %v4145_v29 = vld [vmem:[%s10798_s11 + $0x100] sm:$0xff] }
0x3ef5   :  { %v10133_v0 = vpop.f32.mrb[41].mxu0  ;;  %8648 = vrcp.f32 %v4023_v9  ;;  %7972 = vmatprep.subr.bf16.mxu0 %v8842_v7  ;;  %v4138_v9 = vld [vmem:[%s10798_s11 + $0xc8] sm:$0xff]  ;;  %v10305_v19 = vpack.c.bf16 %v4148_v22, %v4145_v29 }
0x3ef8   :  { %7974 = vmatpush3.bf16.msra.mxu0 %v10250_v59 }
0x3ef9   :  { %7975 = vmatprep.subr.bf16.mxu0 %v8842_v7 }
0x3eff   :  { %v8649_v15 = vpop.eup %8648 }
0x3f00   :  { %v4035_v25 = vmul.f32 %v8649_v15, %v9967_v30  ;;  %v10149_v30 = vpack.c.bf16 %v4117_v49, %v4114_v36  ;;  %v4143_v49 = vld [vmem:[%s10798_s11 + $0xf0] sm:$0xff] }
0x3f01   :  { %v10300_v50 = vpack.c.bf16 %v4146_v38, %v4143_v49 }
0x3f02   :  { %7940 = vmatprep.subr.bf16.mxu1 %v10149_v30 }
0x3f03   :  { %7942 = vmatpush1.bf16.msra.mxu1 %v10160_v58 }
0x3f04   :  { %7944 = vmatprep.subr.bf16.mxu1 %v10162_v40 }
0x3f07   :  { %7946 = vmatpush1.bf16.msra.mxu1 %v10184_v54 }
0x3f08   :  { %7948 = vmatprep.subr.bf16.mxu1 %v10192_v61 }
0x3f0b   :  { %7950 = vmatpush1.bf16.msra.mxu1 %v10220_v31 }
0x3f0c   :  { %7952 = vmatprep.subr.bf16.mxu1 %v10224_v43 }
0x3f0f   :  { %7954 = vmatpush1.bf16.msra.mxu1 %v10238_v51 }
0x3f64   :  { %v4042_v45 = vpop.permute.xlu1 %4041 }
0x3f65   :  { %v4040_v20 = vpop.permute.xlu0 %4039 }
0x3f66   :  { %v4043_v23 = vsel %vm2587_vm8, %v4040_v20, %v4042_v45  ;;  %v4141_v45 = vld [vmem:[%s10798_s11 + $0xe0] sm:$0xff] }
0x3f67   :  { %v4045_v26 = vmul.f32 %v8649_v15, %v4043_v23  ;;  %v4137_v20 = vld [vmem:[%s10798_s11 + $0xc0] sm:$0xff]  ;;  %v10262_v15 = vpack.c.bf16 %v4141_v45, %v4138_v9  ;;  %v4140_v23 = vld [vmem:[%s10798_s11 + $0xd8] sm:$0xff] }
0x3f69   :  { %4047 = vrot.lane.b32.xlu0 %v4045_v26, %s8847_s9  ;;  %v4139_v26 = vld [vmem:[%s10798_s11 + $0xd0] sm:$0xff]  ;;  %7956 = vmatprep.subr.bf16.mxu1 %v10262_v15 }
0x3fdb   :  { %v4048_v53 = vpop.permute.xlu0 %4047 }
0x3fdc   :  { %v4050_v35 = vadd.f32 %v4048_v53, %v4035_v25  ;;  %v4051_v14 = vadd.f32 %v4048_v53, %v4036_v32  ;;  %v4142_v25 = vld [vmem:[%s10798_s11 + $0xe8] sm:$0xff]  ;;  %v10273_v32 = vpack.c.bf16 %v4140_v23, %v4137_v20 }
0x3fdd   :  { %v10276_v53 = vpack.c.bf16 %v4142_v25, %v4139_v26 }
0x3fde   :  { %8650 = vtanh.f32 %v4050_v35  ;;  %v4144_v35 = vld [vmem:[%s10798_s11 + $0xf8] sm:$0xff]  ;;  %7958 = vmatpush1.bf16.msra.mxu1 %v10273_v32 }
0x3fdf   :  { %8652 = vtanh.f32 %v4051_v14  ;;  %v4147_v14 = vld [vmem:[%s10798_s11 + $0x110] sm:$0xff]  ;;  %7977 = vmatpush3.bf16.msra.mxu0 %v10276_v53 }
0x3fe0   :  { %v10285_v36 = vpack.c.bf16 %v4147_v14, %v4144_v35  ;;  %7978 = vmatprep.subr.bf16.mxu0 %v8842_v7 }
0x3fe2   :  { %7960 = vmatprep.subr.bf16.mxu1 %v10285_v36 }
0x3fe3   :  { %7962 = vmatpush1.bf16.msra.mxu1 %v10300_v50  ;;  %7980 = vmatpush3.bf16.msra.mxu0 %v10305_v19 }
0x3fe4   :  { %7982 = vmatprep.subr.bf16.mxu1 %v10149_v30  ;;  %8005 = vmatprep.subr.bf16.mxu0 %v8842_v7 }
0x3fe8   :  { %v8651_v24 = vpop.eup %8650 }
0x3fe9   :  { %v8653_v4 = vpop.eup %8652  ;;  %4056 = vrot.lane.b32.xlu1 %v8651_v24, %s8845_s3 }
0x3fea   :  { %4058 = vrot.lane.b32.xlu0 %v8653_v4, %s8845_s3 }
0x405b   :  { %v4057_v12 = vpop.permute.xlu1 %4056 }
0x405c   :  { %v4059_v55 = vpop.permute.xlu0 %4058 }
0x405d   :  { %v4060_v56 = vsel %vm2587_vm8, %v4057_v12, %v4059_v55 }
0x405e   :  { %v4062_v37 = vmul.f32 %v4060_v56, %v10124_v28  ;;  %v4149_v28 = vld [vmem:[%s10813_s26] sm:$0x7] }
0x405f   :  { %v10354_v62 = vrot.slane %v4149_v28, %v2123_v63  ;;  %v10362_v18 = vrot.slane %v4149_v28, %v2119_v1  ;;  %v10375_v14 = vrot.slane %v4149_v28, %v2115_v41 }
0x4060   :  { %4064 = vrot.lane.b32.xlu1 %v4062_v37, %s8847_s9 }
0x4061   :  { %v4370_v11 = vadd.f32 %v10116_v3, %v10354_v62 }
0x40d2   :  { %v4065_v60 = vpop.permute.xlu1 %4064 }
0x40d3   :  { %4068 = vst.msk [vmem:[#allocation5 + $0x38] sm:$0xff] %vm2408_vm9, %v4065_v60 }
0x40da   :  { %v4076_v46 = vld [vmem:[#allocation5 + $0x38] sm:$0xff] }
0x40db   :  { %6307 = vmatmul.mubr.msk.f32.gmra.mrb[66].mxu1 %vm2408_vm9, %v4076_v46  ;;  %7190 = vmatmul.mubr.msk.f32.gmra.mrb[42].mxu0 %vm2408_vm9, %v4076_v46 }
0x40dc   :  { %4499 = vmatprep.mubr.f32.mxu1 %v8844_v13  ;;  %7216 = vmatprep.mubr.msk.f32.mxu0 %vm8843_vm1, %v8844_v13 }
0x40df   :  { %4500 = vmatmul.mubr.f32.vlgmr.msra.gmra.mrb[52].mxu1 %v8844_v13  ;;  %7217 = vmatmul.mubr.f32.vlgmr.msra.gmra.mrb[44].mxu0 %v8844_v13 }
0x40e0   :  { %7984 = vmatpush1.bf16.msra.mxu1 %v10160_v58  ;;  %8007 = vmatpush3.bf16.msra.mxu0 %v10186_v6 }
0x40e1   :  { %7986 = vmatprep.subr.bf16.mxu1 %v10162_v40  ;;  %8008 = vmatprep.subr.bf16.mxu0 %v8842_v7 }
0x40e2   :  { %4703 = vmatprep.mubr.f32.mxu1 %v8844_v13  ;;  %7243 = vmatprep.mubr.msk.f32.mxu0 %vm8843_vm1, %v8844_v13 }
0x40e4   :  { %7988 = vmatpush1.bf16.msra.mxu1 %v10184_v54  ;;  %8010 = vmatpush3.bf16.msra.mxu0 %v10204_v10 }
0x40e5   :  { %7990 = vmatprep.subr.bf16.mxu1 %v10192_v61  ;;  %8011 = vmatprep.subr.bf16.mxu0 %v8842_v7 }
0x40e8   :  { %7992 = vmatpush1.bf16.msra.mxu1 %v10220_v31  ;;  %8013 = vmatpush3.bf16.msra.mxu0 %v10234_v42 }
0x40e9   :  { %7994 = vmatprep.subr.bf16.mxu1 %v10224_v43  ;;  %8014 = vmatprep.subr.bf16.mxu0 %v8842_v7 }
0x40ec   :  { %7996 = vmatpush1.bf16.msra.mxu1 %v10238_v51  ;;  %8016 = vmatpush3.bf16.msra.mxu0 %v10250_v59 }
0x40ed   :  { %7998 = vmatprep.subr.bf16.mxu1 %v10262_v15  ;;  %8017 = vmatprep.subr.bf16.mxu0 %v8842_v7 }
0x40f0   :  { %8000 = vmatpush1.bf16.msra.mxu1 %v10273_v32  ;;  %8019 = vmatpush3.bf16.msra.mxu0 %v10276_v53 }
0x40f1   :  { %8002 = vmatprep.subr.bf16.mxu1 %v10285_v36  ;;  %8020 = vmatprep.subr.bf16.mxu0 %v8842_v7 }
0x40f4   :  { %8004 = vmatpush1.bf16.msra.mxu1 %v10300_v50  ;;  %8022 = vmatpush3.bf16.msra.mxu0 %v10305_v19 }
0x40f5   :  { %8024 = vmatprep.subr.bf16.mxu1 %v10149_v30  ;;  %8047 = vmatprep.subr.bf16.mxu0 %v8842_v7 }
0x41ae   :  { %v10356_v5 = vpop.f32.mrb[42].mxu0 }
0x41af   :  { %v10358_v8 = vpop.f32.mrb[43].mxu0 }
0x41b2   :  { %v4501_v21 = vpop.f32.mrb[52].mxu1  ;;  %v4572_v27 = vpop.f32.mrb[44].mxu0 }
0x41b3   :  { %v4578_v24 = vadd.f32 %v4572_v27, %v4370_v11  ;;  %v4503_v4 = vpop.f32.mrb[53].mxu1  ;;  %v7218_v44 = vpop.f32.mrb[45].mxu0  ;;  %v8309_v49 = vadd.f32 %v4501_v21, %v10375_v14 }
0x41b4   :  { %v8310_v39 = vadd.f32 %v4503_v4, %v10362_v18 }
0x41b5   :  { %v6318_v63 = vmul.f32 -1.442695, %v4578_v24  ;;  %v6316_v38 = vmul.f32 -1.442695, %v8309_v49 }
0x41b6   :  { %v6317_v17 = vmul.f32 -1.442695, %v8310_v39 }
0x41b7   :  { %8654 = vpow2.f32 %v6318_v63 }
0x41b8   :  { %8656 = vpow2.f32 %v6317_v17  ;;  %v4375_v17 = vadd.f32 %v10114_v2, %v10354_v62 }
0x41b9   :  { %8658 = vtanh.f32 %v4578_v24 }
0x41ba   :  { %8660 = vtanh.f32 %v8310_v39 }
0x41c1   :  { %v8655_v34 = vpop.eup %8654 }
0x41c2   :  { %v8657_v9 = vpop.eup %8656  ;;  %v4593_v45 = vadd.f32 1.0, %v8655_v34 }
0x41c3   :  { %v4592_v1 = vadd.f32 1.0, %v8657_v9  ;;  %v8659_v3 = vpop.eup %8658 }
0x41c4   :  { %8662 = vrcp.f32 %v4593_v45  ;;  %v8661_v20 = vpop.eup %8660 }
0x41c5   :  { %8664 = vrcp.f32 %v4592_v1 }
0x41c6   :  { %8666 = vpow2.f32 %v6316_v38 }
0x41ce   :  { %v8663_v23 = vpop.eup %8662 }
0x41cf   :  { %v8665_v26 = vpop.eup %8664  ;;  %v4602_v25 = vsel %vm2401_vm6, %v8659_v3, %v8663_v23 }
0x41d0   :  { %4609 = vrot.lane.b32.xlu1 %v4602_v25, %s8845_s3  ;;  %v4601_v35 = vsel %vm2397_vm7, %v8661_v20, %v8665_v26  ;;  %v8667_v29 = vpop.eup %8666 }
0x41d1   :  { %4607 = vrot.lane.b32.xlu0 %v4601_v35, %s8845_s3  ;;  %v4591_v22 = vadd.f32 1.0, %v8667_v29  ;;  %v4604_v11 = vmul.f32 0.0, %v4601_v35 }
0x41d3   :  { %8668 = vrcp.f32 %v4591_v22 }
0x41dd   :  { %v8669_v56 = vpop.eup %8668 }
0x41de   :  { %v4603_v46 = vmul.f32 0.0, %v8669_v56 }
0x4242   :  { %v4610_v12 = vpop.permute.xlu1 %4609 }
0x4243   :  { %v4608_v55 = vpop.permute.xlu0 %4607 }
0x4244   :  { %v4611_v37 = vsel %vm2587_vm8, %v4608_v55, %v4610_v12 }
0x4245   :  { %v4613_v60 = vmul.f32 %v8669_v56, %v4611_v37 }
0x4247   :  { %4615 = vrot.lane.b32.xlu0 %v4613_v60, %s8847_s9 }
0x42b9   :  { %v4616_v47 = vpop.permute.xlu0 %4615 }
0x42ba   :  { %v10380_v41 = vadd.f32 %v4616_v47, %v4603_v46  ;;  %v10382_v28 = vadd.f32 %v4616_v47, %v4604_v11 }
0x42bc   :  { %8670 = vtanh.f32 %v10380_v41 }
0x42bd   :  { %8672 = vtanh.f32 %v10382_v28 }
0x42c6   :  { %v8671_v21 = vpop.eup %8670 }
0x42c7   :  { %v8673_v27 = vpop.eup %8672  ;;  %4624 = vrot.lane.b32.xlu1 %v8671_v21, %s8845_s3 }
0x42c8   :  { %4626 = vrot.lane.b32.xlu0 %v8673_v27, %s8845_s3 }
0x4339   :  { %v4625_v24 = vpop.permute.xlu1 %4624 }
0x433a   :  { %v4627_v4 = vpop.permute.xlu0 %4626 }
0x433b   :  { %v4628_v44 = vsel %vm2587_vm8, %v4625_v24, %v4627_v4 }
0x433c   :  { %v4630_v39 = vmul.f32 %v4628_v44, %v4602_v25 }
0x433e   :  { %4635 = vrot.lane.b32.xlu1 %v4630_v39, %s8847_s9 }
0x43b0   :  { %v4636_v63 = vpop.permute.xlu1 %4635 }
0x43b1   :  { %6319 = vmatmul.mubr.msk.f32.vlgmr.msra.gmra.mrb[54].mxu1 %vm2408_vm9, %v4636_v63  ;;  %7244 = vmatmul.mubr.msk.f32.vlgmr.msra.gmra.mrb[46].mxu0 %vm2408_vm9, %v4636_v63 }
0x43b2   :  { %8026 = vmatpush1.bf16.msra.mxu1 %v10160_v58  ;;  %8049 = vmatpush3.bf16.msra.mxu0 %v10186_v6 }
0x43b3   :  { %8028 = vmatprep.subr.bf16.mxu1 %v10162_v40  ;;  %8050 = vmatprep.subr.bf16.mxu0 %v8842_v7 }
0x43b4   :  { %4907 = vmatprep.mubr.f32.mxu1 %v8844_v13  ;;  %7270 = vmatprep.mubr.msk.f32.mxu0 %vm8843_vm1, %v8844_v13 }
0x43b6   :  { %8030 = vmatpush1.bf16.msra.mxu1 %v10184_v54  ;;  %8052 = vmatpush3.bf16.msra.mxu0 %v10204_v10 }
0x43b7   :  { %8032 = vmatprep.subr.bf16.mxu1 %v10192_v61  ;;  %8053 = vmatprep.subr.bf16.mxu0 %v8842_v7 }
0x43ba   :  { %8034 = vmatpush1.bf16.msra.mxu1 %v10220_v31  ;;  %8055 = vmatpush3.bf16.msra.mxu0 %v10234_v42 }
0x43bb   :  { %8036 = vmatprep.subr.bf16.mxu1 %v10224_v43  ;;  %8056 = vmatprep.subr.bf16.mxu0 %v8842_v7 }
0x43be   :  { %8038 = vmatpush1.bf16.msra.mxu1 %v10238_v51  ;;  %8058 = vmatpush3.bf16.msra.mxu0 %v10250_v59 }
0x43bf   :  { %8040 = vmatprep.subr.bf16.mxu1 %v10262_v15  ;;  %8059 = vmatprep.subr.bf16.mxu0 %v8842_v7 }
0x43c2   :  { %8042 = vmatpush1.bf16.msra.mxu1 %v10273_v32  ;;  %8061 = vmatpush3.bf16.msra.mxu0 %v10276_v53 }
0x43c3   :  { %8044 = vmatprep.subr.bf16.mxu1 %v10285_v36  ;;  %8062 = vmatprep.subr.bf16.mxu0 %v8842_v7 }
0x43c6   :  { %8046 = vmatpush1.bf16.msra.mxu1 %v10300_v50  ;;  %8064 = vmatpush3.bf16.msra.mxu0 %v10305_v19 }
0x43c7   :  { %8066 = vmatprep.subr.bf16.mxu1 %v10149_v30  ;;  %8089 = vmatprep.subr.bf16.mxu0 %v8842_v7 }
0x4484   :  { %v4705_v34 = vpop.f32.mrb[54].mxu1  ;;  %v4776_v9 = vpop.f32.mrb[46].mxu0 }
0x4485   :  { %v4782_v45 = vadd.f32 %v4776_v9, %v4375_v17  ;;  %v4707_v1 = vpop.f32.mrb[55].mxu1  ;;  %v7245_v3 = vpop.f32.mrb[47].mxu0  ;;  %v8311_v37 = vadd.f32 %v4705_v34, %v10375_v14 }
0x4486   :  { %v8312_v20 = vadd.f32 %v4707_v1, %v10362_v18 }
0x4487   :  { %v6323_v23 = vmul.f32 -1.442695, %v4782_v45  ;;  %v6321_v60 = vmul.f32 -1.442695, %v8311_v37 }
0x4488   :  { %v6322_v26 = vmul.f32 -1.442695, %v8312_v20 }
0x4489   :  { %8674 = vpow2.f32 %v6323_v23  ;;  %v4380_v23 = vadd.f32 %v10120_v52, %v10354_v62 }
0x448a   :  { %8676 = vpow2.f32 %v6322_v26 }
0x448b   :  { %8678 = vtanh.f32 %v4782_v45 }
0x448c   :  { %8680 = vtanh.f32 %v8312_v20 }
0x4493   :  { %v8675_v25 = vpop.eup %8674 }
0x4494   :  { %v8677_v35 = vpop.eup %8676  ;;  %v4797_v49 = vadd.f32 1.0, %v8675_v25 }
0x4495   :  { %v4796_v38 = vadd.f32 1.0, %v8677_v35  ;;  %v8679_v2 = vpop.eup %8678 }
0x4496   :  { %8682 = vrcp.f32 %v4797_v49  ;;  %v8681_v29 = vpop.eup %8680 }
0x4497   :  { %8684 = vrcp.f32 %v4796_v38 }
0x4498   :  { %8686 = vpow2.f32 %v6321_v60 }
0x44a0   :  { %v8683_v22 = vpop.eup %8682 }
0x44a1   :  { %v8685_v12 = vpop.eup %8684  ;;  %v4806_v55 = vsel %vm2401_vm6, %v8679_v2, %v8683_v22 }
0x44a2   :  { %4813 = vrot.lane.b32.xlu1 %v4806_v55, %s8845_s3  ;;  %v4805_v56 = vsel %vm2397_vm7, %v8681_v29, %v8685_v12  ;;  %v8687_v46 = vpop.eup %8686 }
0x44a3   :  { %4811 = vrot.lane.b32.xlu0 %v4805_v56, %s8845_s3  ;;  %v4795_v11 = vadd.f32 1.0, %v8687_v46  ;;  %v4808_v39 = vmul.f32 %v4805_v56, %v10382_v28 }
0x44a5   :  { %8688 = vrcp.f32 %v4795_v11 }
0x44af   :  { %v8689_v27 = vpop.eup %8688 }
0x44b0   :  { %v4807_v44 = vmul.f32 %v8689_v27, %v10380_v41 }
0x4514   :  { %v4814_v47 = vpop.permute.xlu1 %4813 }
0x4515   :  { %v4812_v21 = vpop.permute.xlu0 %4811 }
0x4516   :  { %v4815_v24 = vsel %vm2587_vm8, %v4812_v21, %v4814_v47 }
0x4517   :  { %v4817_v4 = vmul.f32 %v8689_v27, %v4815_v24 }
0x4519   :  { %4819 = vrot.lane.b32.xlu0 %v4817_v4, %s8847_s9 }
0x458b   :  { %v4820_v63 = vpop.permute.xlu0 %4819 }
0x458c   :  { %v10433_v17 = vadd.f32 %v4820_v63, %v4807_v44  ;;  %v10435_v34 = vadd.f32 %v4820_v63, %v4808_v39 }
0x458e   :  { %8690 = vtanh.f32 %v10433_v17 }
0x458f   :  { %8692 = vtanh.f32 %v10435_v34 }
0x4598   :  { %v8691_v9 = vpop.eup %8690 }
0x4599   :  { %v8693_v45 = vpop.eup %8692  ;;  %4828 = vrot.lane.b32.xlu1 %v8691_v9, %s8845_s3 }
0x459a   :  { %4830 = vrot.lane.b32.xlu0 %v8693_v45, %s8845_s3 }
0x460b   :  { %v4829_v1 = vpop.permute.xlu1 %4828 }
0x460c   :  { %v4831_v3 = vpop.permute.xlu0 %4830 }
0x460d   :  { %v4832_v41 = vsel %vm2587_vm8, %v4829_v1, %v4831_v3 }
0x460e   :  { %v4834_v28 = vmul.f32 %v4832_v41, %v4806_v55 }
0x4610   :  { %4839 = vrot.lane.b32.xlu1 %v4834_v28, %s8847_s9 }
0x4682   :  { %v4840_v20 = vpop.permute.xlu1 %4839 }
0x4683   :  { %6324 = vmatmul.mubr.msk.f32.vlgmr.msra.gmra.mrb[56].mxu1 %vm2408_vm9, %v4840_v20  ;;  %7271 = vmatmul.mubr.msk.f32.vlgmr.msra.gmra.mrb[48].mxu0 %vm2408_vm9, %v4840_v20 }
0x4684   :  { %8068 = vmatpush1.bf16.msra.mxu1 %v10160_v58  ;;  %8091 = vmatpush3.bf16.msra.mxu0 %v10186_v6 }
0x4685   :  { %8070 = vmatprep.subr.bf16.mxu1 %v10162_v40  ;;  %8092 = vmatprep.subr.bf16.mxu0 %v8842_v7 }
0x4686   :  { %5111 = vmatprep.mubr.f32.mxu1 %v8844_v13  ;;  %7297 = vmatprep.mubr.msk.f32.mxu0 %vm8843_vm1, %v8844_v13 }
0x4688   :  { %8072 = vmatpush1.bf16.msra.mxu1 %v10184_v54  ;;  %8094 = vmatpush3.bf16.msra.mxu0 %v10204_v10 }
0x4689   :  { %8074 = vmatprep.subr.bf16.mxu1 %v10192_v61  ;;  %8095 = vmatprep.subr.bf16.mxu0 %v8842_v7 }
0x468c   :  { %8076 = vmatpush1.bf16.msra.mxu1 %v10220_v31  ;;  %8097 = vmatpush3.bf16.msra.mxu0 %v10234_v42 }
0x468d   :  { %8078 = vmatprep.subr.bf16.mxu1 %v10224_v43  ;;  %8098 = vmatprep.subr.bf16.mxu0 %v8842_v7 }
0x4690   :  { %8080 = vmatpush1.bf16.msra.mxu1 %v10238_v51  ;;  %8100 = vmatpush3.bf16.msra.mxu0 %v10250_v59 }
0x4691   :  { %8082 = vmatprep.subr.bf16.mxu1 %v10262_v15  ;;  %8101 = vmatprep.subr.bf16.mxu0 %v8842_v7 }
0x4694   :  { %8084 = vmatpush1.bf16.msra.mxu1 %v10273_v32  ;;  %8103 = vmatpush3.bf16.msra.mxu0 %v10276_v53 }
0x4695   :  { %8086 = vmatprep.subr.bf16.mxu1 %v10285_v36  ;;  %8104 = vmatprep.subr.bf16.mxu0 %v8842_v7 }
0x4698   :  { %8088 = vmatpush1.bf16.msra.mxu1 %v10300_v50  ;;  %8106 = vmatpush3.bf16.msra.mxu0 %v10305_v19 }
0x4699   :  { %8108 = vmatprep.subr.bf16.mxu1 %v10149_v30  ;;  %8131 = vmatprep.subr.bf16.mxu0 %v8842_v7 }
0x4756   :  { %v4909_v26 = vpop.f32.mrb[56].mxu1  ;;  %v4980_v25 = vpop.f32.mrb[48].mxu0 }
0x4757   :  { %v4986_v35 = vadd.f32 %v4980_v25, %v4380_v23  ;;  %v4911_v49 = vpop.f32.mrb[57].mxu1  ;;  %v7272_v38 = vpop.f32.mrb[49].mxu0  ;;  %v8313_v27 = vadd.f32 %v4909_v26, %v10375_v14 }
0x4758   :  { %v8314_v2 = vadd.f32 %v4911_v49, %v10362_v18 }
0x4759   :  { %v6328_v29 = vmul.f32 -1.442695, %v4986_v35  ;;  %v6326_v24 = vmul.f32 -1.442695, %v8313_v27 }
0x475a   :  { %v6327_v22 = vmul.f32 -1.442695, %v8314_v2 }
0x475b   :  { %8694 = vpow2.f32 %v6328_v29 }
0x475c   :  { %8696 = vpow2.f32 %v6327_v22 }
0x475d   :  { %8698 = vtanh.f32 %v4986_v35 }
0x475e   :  { %8700 = vtanh.f32 %v8314_v2  ;;  %v4385_v2 = vadd.f32 %v10118_v48, %v10354_v62 }
0x4765   :  { %v8695_v12 = vpop.eup %8694 }
0x4766   :  { %v8697_v55 = vpop.eup %8696  ;;  %v5001_v56 = vadd.f32 1.0, %v8695_v12 }
0x4767   :  { %v5000_v37 = vadd.f32 1.0, %v8697_v55  ;;  %v8699_v52 = vpop.eup %8698 }
0x4768   :  { %8702 = vrcp.f32 %v5001_v56  ;;  %v8701_v60 = vpop.eup %8700 }
0x4769   :  { %8704 = vrcp.f32 %v5000_v37 }
0x476a   :  { %8706 = vpow2.f32 %v6326_v24 }
0x4772   :  { %v8703_v46 = vpop.eup %8702 }
0x4773   :  { %v8705_v11 = vpop.eup %8704  ;;  %v5010_v47 = vsel %vm2401_vm6, %v8699_v52, %v8703_v46 }
0x4774   :  { %5017 = vrot.lane.b32.xlu1 %v5010_v47, %s8845_s3  ;;  %v5009_v21 = vsel %vm2397_vm7, %v8701_v60, %v8705_v11  ;;  %v8707_v4 = vpop.eup %8706 }
0x4775   :  { %5015 = vrot.lane.b32.xlu0 %v5009_v21, %s8845_s3  ;;  %v4999_v44 = vadd.f32 1.0, %v8707_v4  ;;  %v5012_v41 = vmul.f32 %v5009_v21, %v10435_v34 }
0x4777   :  { %8708 = vrcp.f32 %v4999_v44 }
0x4781   :  { %v8709_v9 = vpop.eup %8708 }
0x4782   :  { %v5011_v3 = vmul.f32 %v8709_v9, %v10433_v17 }
0x47e6   :  { %v5018_v39 = vpop.permute.xlu1 %5017 }
0x47e7   :  { %v5016_v63 = vpop.permute.xlu0 %5015 }
0x47e8   :  { %v5019_v45 = vsel %vm2587_vm8, %v5016_v63, %v5018_v39 }
0x47e9   :  { %v5021_v1 = vmul.f32 %v8709_v9, %v5019_v45 }
0x47eb   :  { %5023 = vrot.lane.b32.xlu0 %v5021_v1, %s8847_s9 }
0x485d   :  { %v5024_v28 = vpop.permute.xlu0 %5023 }
0x485e   :  { %v10486_v20 = vadd.f32 %v5024_v28, %v5011_v3  ;;  %v10488_v23 = vadd.f32 %v5024_v28, %v5012_v41 }
0x4860   :  { %8710 = vtanh.f32 %v10486_v20 }
0x4861   :  { %8712 = vtanh.f32 %v10488_v23 }
0x486a   :  { %v8711_v26 = vpop.eup %8710 }
0x486b   :  { %v8713_v25 = vpop.eup %8712  ;;  %5032 = vrot.lane.b32.xlu1 %v8711_v26, %s8845_s3 }
0x486c   :  { %5034 = vrot.lane.b32.xlu0 %v8713_v25, %s8845_s3 }
0x48dd   :  { %v5033_v35 = vpop.permute.xlu1 %5032 }
0x48de   :  { %v5035_v49 = vpop.permute.xlu0 %5034 }
0x48df   :  { %v5036_v17 = vsel %vm2587_vm8, %v5033_v35, %v5035_v49 }
0x48e0   :  { %v5038_v34 = vmul.f32 %v5036_v17, %v5010_v47 }
0x48e2   :  { %5043 = vrot.lane.b32.xlu1 %v5038_v34, %s8847_s9 }
0x4954   :  { %v5044_v38 = vpop.permute.xlu1 %5043 }
0x4955   :  { %6329 = vmatmul.mubr.msk.f32.vlgmr.msra.gmra.mrb[58].mxu1 %vm2408_vm9, %v5044_v38  ;;  %7298 = vmatmul.mubr.msk.f32.vlgmr.msra.gmra.mrb[50].mxu0 %vm2408_vm9, %v5044_v38 }
0x4956   :  { %8110 = vmatpush1.bf16.msra.mxu1 %v10160_v58  ;;  %8133 = vmatpush3.bf16.msra.mxu0 %v10186_v6 }
0x4957   :  { %8112 = vmatprep.subr.bf16.mxu1 %v10162_v40  ;;  %8134 = vmatprep.subr.bf16.mxu0 %v8842_v7 }
0x4958   :  { %5315 = vmatprep.mubr.f32.mxu1 %v8844_v13  ;;  %7324 = vmatprep.mubr.msk.f32.mxu0 %vm8843_vm1, %v8844_v13 }
0x495a   :  { %8114 = vmatpush1.bf16.msra.mxu1 %v10184_v54  ;;  %8136 = vmatpush3.bf16.msra.mxu0 %v10204_v10 }
0x495b   :  { %8116 = vmatprep.subr.bf16.mxu1 %v10192_v61  ;;  %8137 = vmatprep.subr.bf16.mxu0 %v8842_v7 }
0x495e   :  { %8118 = vmatpush1.bf16.msra.mxu1 %v10220_v31  ;;  %8139 = vmatpush3.bf16.msra.mxu0 %v10234_v42 }
0x495f   :  { %8120 = vmatprep.subr.bf16.mxu1 %v10224_v43  ;;  %8140 = vmatprep.subr.bf16.mxu0 %v8842_v7 }
0x4962   :  { %8122 = vmatpush1.bf16.msra.mxu1 %v10238_v51  ;;  %8142 = vmatpush3.bf16.msra.mxu0 %v10250_v59 }
0x4963   :  { %8124 = vmatprep.subr.bf16.mxu1 %v10262_v15  ;;  %8143 = vmatprep.subr.bf16.mxu0 %v8842_v7 }
0x4966   :  { %8126 = vmatpush1.bf16.msra.mxu1 %v10273_v32  ;;  %8145 = vmatpush3.bf16.msra.mxu0 %v10276_v53 }
0x4967   :  { %8128 = vmatprep.subr.bf16.mxu1 %v10285_v36  ;;  %8146 = vmatprep.subr.bf16.mxu0 %v8842_v7 }
0x496a   :  { %8130 = vmatpush1.bf16.msra.mxu1 %v10300_v50  ;;  %8148 = vmatpush3.bf16.msra.mxu0 %v10305_v19 }
0x496b   :  { %8150 = vmatprep.subr.bf16.mxu1 %v10149_v30  ;;  %8173 = vmatprep.subr.bf16.mxu0 %v8842_v7 }
0x4a28   :  { %v5113_v29 = vpop.f32.mrb[58].mxu1  ;;  %v5184_v22 = vpop.f32.mrb[50].mxu0 }
0x4a29   :  { %v5190_v12 = vadd.f32 %v5184_v22, %v4385_v2  ;;  %v5115_v55 = vpop.f32.mrb[59].mxu1  ;;  %v7299_v56 = vpop.f32.mrb[51].mxu0  ;;  %v8315_v63 = vadd.f32 %v5113_v29, %v10375_v14 }
0x4a2a   :  { %v8316_v37 = vadd.f32 %v5115_v55, %v10362_v18  ;;  %v4390_v56 = vadd.f32 %v10133_v0, %v10354_v62 }
0x4a2b   :  { %v6333_v52 = vmul.f32 -1.442695, %v5190_v12  ;;  %v6331_v9 = vmul.f32 -1.442695, %v8315_v63 }
0x4a2c   :  { %v6332_v60 = vmul.f32 -1.442695, %v8316_v37 }
0x4a2d   :  { %8714 = vpow2.f32 %v6333_v52 }
0x4a2e   :  { %8716 = vpow2.f32 %v6332_v60 }
0x4a2f   :  { %8718 = vtanh.f32 %v5190_v12 }
0x4a30   :  { %8720 = vtanh.f32 %v8316_v37 }
0x4a37   :  { %v8715_v46 = vpop.eup %8714 }
0x4a38   :  { %v8717_v11 = vpop.eup %8716  ;;  %v5205_v47 = vadd.f32 1.0, %v8715_v46 }
0x4a39   :  { %v5204_v21 = vadd.f32 1.0, %v8717_v11  ;;  %v8719_v48 = vpop.eup %8718 }
0x4a3a   :  { %8722 = vrcp.f32 %v5205_v47  ;;  %v8721_v27 = vpop.eup %8720 }
0x4a3b   :  { %8724 = vrcp.f32 %v5204_v21 }
0x4a3c   :  { %8726 = vpow2.f32 %v6331_v9 }
0x4a44   :  { %v8723_v24 = vpop.eup %8722 }
0x4a45   :  { %v8725_v4 = vpop.eup %8724  ;;  %v5214_v44 = vsel %vm2401_vm6, %v8719_v48, %v8723_v24 }
0x4a46   :  { %5221 = vrot.lane.b32.xlu1 %v5214_v44, %s8845_s3  ;;  %v5213_v39 = vsel %vm2397_vm7, %v8721_v27, %v8725_v4  ;;  %v8727_v45 = vpop.eup %8726 }
0x4a47   :  { %5219 = vrot.lane.b32.xlu0 %v5213_v39, %s8845_s3  ;;  %v5203_v1 = vadd.f32 1.0, %v8727_v45  ;;  %v5216_v49 = vmul.f32 %v5213_v39, %v10488_v23 }
0x4a49   :  { %8728 = vrcp.f32 %v5203_v1 }
0x4a53   :  { %v8729_v28 = vpop.eup %8728 }
0x4a54   :  { %v5215_v35 = vmul.f32 %v8729_v28, %v10486_v20 }
0x4ab8   :  { %v5222_v3 = vpop.permute.xlu1 %5221 }
0x4ab9   :  { %v5220_v41 = vpop.permute.xlu0 %5219 }
0x4aba   :  { %v5223_v26 = vsel %vm2587_vm8, %v5220_v41, %v5222_v3 }
0x4abb   :  { %v5225_v25 = vmul.f32 %v8729_v28, %v5223_v26 }
0x4abd   :  { %5227 = vrot.lane.b32.xlu0 %v5225_v25, %s8847_s9 }
0x4b2f   :  { %v5228_v17 = vpop.permute.xlu0 %5227 }
0x4b30   :  { %v10539_v34 = vadd.f32 %v5228_v17, %v5215_v35  ;;  %v10541_v38 = vadd.f32 %v5228_v17, %v5216_v49 }
0x4b32   :  { %8730 = vtanh.f32 %v10539_v34 }
0x4b33   :  { %8732 = vtanh.f32 %v10541_v38 }
0x4b3c   :  { %v8731_v2 = vpop.eup %8730 }
0x4b3d   :  { %v8733_v29 = vpop.eup %8732  ;;  %5236 = vrot.lane.b32.xlu1 %v8731_v2, %s8845_s3 }
0x4b3e   :  { %5238 = vrot.lane.b32.xlu0 %v8733_v29, %s8845_s3 }
0x4baf   :  { %v5237_v22 = vpop.permute.xlu1 %5236 }
0x4bb0   :  { %v5239_v12 = vpop.permute.xlu0 %5238 }
0x4bb1   :  { %v5240_v20 = vsel %vm2587_vm8, %v5237_v22, %v5239_v12 }
0x4bb2   :  { %v5242_v23 = vmul.f32 %v5240_v20, %v5214_v44 }
0x4bb4   :  { %5247 = vrot.lane.b32.xlu1 %v5242_v23, %s8847_s9 }
0x4c26   :  { %v5248_v55 = vpop.permute.xlu1 %5247 }
0x4c27   :  { %6334 = vmatmul.mubr.msk.f32.vlgmr.msra.gmra.mrb[60].mxu1 %vm2408_vm9, %v5248_v55  ;;  %7325 = vmatmul.mubr.msk.f32.vlgmr.msra.gmra.mrb[52].mxu0 %vm2408_vm9, %v5248_v55 }
0x4c28   :  { %8152 = vmatpush1.bf16.msra.mxu1 %v10160_v58  ;;  %8175 = vmatpush3.bf16.msra.mxu0 %v10186_v6 }
0x4c29   :  { %8154 = vmatprep.subr.bf16.mxu1 %v10162_v40  ;;  %8176 = vmatprep.subr.bf16.mxu0 %v8842_v7 }
0x4c2a   :  { %5519 = vmatprep.mubr.f32.mxu1 %v8844_v13  ;;  %7351 = vmatprep.mubr.msk.f32.mxu0 %vm8843_vm1, %v8844_v13 }
0x4c2c   :  { %8156 = vmatpush1.bf16.msra.mxu1 %v10184_v54  ;;  %8178 = vmatpush3.bf16.msra.mxu0 %v10204_v10 }
0x4c2d   :  { %8158 = vmatprep.subr.bf16.mxu1 %v10192_v61  ;;  %8179 = vmatprep.subr.bf16.mxu0 %v8842_v7 }
0x4c30   :  { %8160 = vmatpush1.bf16.msra.mxu1 %v10220_v31  ;;  %8181 = vmatpush3.bf16.msra.mxu0 %v10234_v42 }
0x4c31   :  { %8162 = vmatprep.subr.bf16.mxu1 %v10224_v43  ;;  %8182 = vmatprep.subr.bf16.mxu0 %v8842_v7 }
0x4c34   :  { %8164 = vmatpush1.bf16.msra.mxu1 %v10238_v51  ;;  %8184 = vmatpush3.bf16.msra.mxu0 %v10250_v59 }
0x4c35   :  { %8166 = vmatprep.subr.bf16.mxu1 %v10262_v15  ;;  %8185 = vmatprep.subr.bf16.mxu0 %v8842_v7 }
0x4c38   :  { %8168 = vmatpush1.bf16.msra.mxu1 %v10273_v32  ;;  %8187 = vmatpush3.bf16.msra.mxu0 %v10276_v53 }
0x4c39   :  { %8170 = vmatprep.subr.bf16.mxu1 %v10285_v36  ;;  %8188 = vmatprep.subr.bf16.mxu0 %v8842_v7 }
0x4c3c   :  { %8172 = vmatpush1.bf16.msra.mxu1 %v10300_v50  ;;  %8190 = vmatpush3.bf16.msra.mxu0 %v10305_v19 }
0x4c3d   :  { %8192 = vmatprep.subr.bf16.mxu1 %v10149_v30  ;;  %8215 = vmatprep.subr.bf16.mxu0 %v8842_v7 }
0x4cfa   :  { %v5317_v37 = vpop.f32.mrb[60].mxu1  ;;  %v5388_v52 = vpop.f32.mrb[52].mxu0 }
0x4cfb   :  { %v5394_v60 = vadd.f32 %v5388_v52, %v4390_v56  ;;  %v5319_v46 = vpop.f32.mrb[61].mxu1  ;;  %v7326_v11 = vpop.f32.mrb[53].mxu0  ;;  %v8317_v3 = vadd.f32 %v5317_v37, %v10375_v14 }
0x4cfc   :  { %v8318_v47 = vadd.f32 %v5319_v46, %v10362_v18  ;;  %v4395_v46 = vadd.f32 %v10131_v16, %v10354_v62 }
0x4cfd   :  { %v6338_v21 = vmul.f32 -1.442695, %v5394_v60  ;;  %v6336_v41 = vmul.f32 -1.442695, %v8317_v3 }
0x4cfe   :  { %v6337_v48 = vmul.f32 -1.442695, %v8318_v47 }
0x4cff   :  { %8734 = vpow2.f32 %v6338_v21 }
0x4d00   :  { %8736 = vpow2.f32 %v6337_v48 }
0x4d01   :  { %8738 = vtanh.f32 %v5394_v60 }
0x4d02   :  { %8740 = vtanh.f32 %v8318_v47 }
0x4d09   :  { %v8735_v27 = vpop.eup %8734 }
0x4d0a   :  { %v8737_v24 = vpop.eup %8736  ;;  %v5409_v4 = vadd.f32 1.0, %v8735_v27 }
0x4d0b   :  { %v5408_v44 = vadd.f32 1.0, %v8737_v24  ;;  %v8739_v0 = vpop.eup %8738 }
0x4d0c   :  { %8742 = vrcp.f32 %v5409_v4  ;;  %v8741_v39 = vpop.eup %8740 }
0x4d0d   :  { %8744 = vrcp.f32 %v5408_v44 }
0x4d0e   :  { %8746 = vpow2.f32 %v6336_v41 }
0x4d16   :  { %v8743_v63 = vpop.eup %8742 }
0x4d17   :  { %v8745_v9 = vpop.eup %8744  ;;  %v5418_v45 = vsel %vm2401_vm6, %v8739_v0, %v8743_v63 }
0x4d18   :  { %5425 = vrot.lane.b32.xlu1 %v5418_v45, %s8845_s3  ;;  %v5417_v1 = vsel %vm2397_vm7, %v8741_v39, %v8745_v9  ;;  %v8747_v28 = vpop.eup %8746 }
0x4d19   :  { %5423 = vrot.lane.b32.xlu0 %v5417_v1, %s8845_s3  ;;  %v5407_v26 = vadd.f32 1.0, %v8747_v28  ;;  %v5420_v22 = vmul.f32 %v5417_v1, %v10541_v38 }
0x4d1b   :  { %8748 = vrcp.f32 %v5407_v26 }
0x4d25   :  { %v8749_v49 = vpop.eup %8748 }
0x4d26   :  { %v5419_v29 = vmul.f32 %v8749_v49, %v10539_v34 }
0x4d8a   :  { %v5426_v25 = vpop.permute.xlu1 %5425 }
0x4d8b   :  { %v5424_v35 = vpop.permute.xlu0 %5423 }
0x4d8c   :  { %v5427_v17 = vsel %vm2587_vm8, %v5424_v35, %v5426_v25 }
0x4d8d   :  { %v5429_v2 = vmul.f32 %v8749_v49, %v5427_v17 }
0x4d8f   :  { %5431 = vrot.lane.b32.xlu0 %v5429_v2, %s8847_s9 }
0x4e01   :  { %v5432_v12 = vpop.permute.xlu0 %5431 }
0x4e02   :  { %v10592_v20 = vadd.f32 %v5432_v12, %v5419_v29  ;;  %v10594_v23 = vadd.f32 %v5432_v12, %v5420_v22 }
0x4e04   :  { %8750 = vtanh.f32 %v10592_v20 }
0x4e05   :  { %8752 = vtanh.f32 %v10594_v23 }
0x4e0e   :  { %v8751_v55 = vpop.eup %8750 }
0x4e0f   :  { %v8753_v56 = vpop.eup %8752  ;;  %5440 = vrot.lane.b32.xlu1 %v8751_v55, %s8845_s3 }
0x4e10   :  { %5442 = vrot.lane.b32.xlu0 %v8753_v56, %s8845_s3 }
0x4e81   :  { %v5441_v37 = vpop.permute.xlu1 %5440 }
0x4e82   :  { %v5443_v52 = vpop.permute.xlu0 %5442 }
0x4e83   :  { %v5444_v34 = vsel %vm2587_vm8, %v5441_v37, %v5443_v52 }
0x4e84   :  { %v5446_v38 = vmul.f32 %v5444_v34, %v5418_v45 }
0x4e86   :  { %5451 = vrot.lane.b32.xlu1 %v5446_v38, %s8847_s9 }
0x4ef8   :  { %v5452_v60 = vpop.permute.xlu1 %5451 }
0x4ef9   :  { %6339 = vmatmul.mubr.msk.f32.vlgmr.msra.gmra.mrb[62].mxu1 %vm2408_vm9, %v5452_v60  ;;  %7352 = vmatmul.mubr.msk.f32.vlgmr.msra.gmra.mrb[54].mxu0 %vm2408_vm9, %v5452_v60 }
0x4efa   :  { %8194 = vmatpush1.bf16.msra.mxu1 %v10160_v58  ;;  %8217 = vmatpush3.bf16.msra.mxu0 %v10186_v6 }
0x4efb   :  { %8196 = vmatprep.subr.bf16.mxu1 %v10162_v40  ;;  %8218 = vmatprep.subr.bf16.mxu0 %v8842_v7 }
0x4efc   :  { %5723 = vmatprep.mubr.f32.mxu1 %v8844_v13  ;;  %7378 = vmatprep.mubr.msk.f32.mxu0 %vm8843_vm1, %v8844_v13 }
0x4efe   :  { %8198 = vmatpush1.bf16.msra.mxu1 %v10184_v54  ;;  %8220 = vmatpush3.bf16.msra.mxu0 %v10204_v10 }
0x4eff   :  { %8200 = vmatprep.subr.bf16.mxu1 %v10192_v61  ;;  %8221 = vmatprep.subr.bf16.mxu0 %v8842_v7 }
0x4f02   :  { %8202 = vmatpush1.bf16.msra.mxu1 %v10220_v31  ;;  %8223 = vmatpush3.bf16.msra.mxu0 %v10234_v42 }
0x4f03   :  { %8204 = vmatprep.subr.bf16.mxu1 %v10224_v43  ;;  %8224 = vmatprep.subr.bf16.mxu0 %v8842_v7 }
0x4f06   :  { %8206 = vmatpush1.bf16.msra.mxu1 %v10238_v51  ;;  %8226 = vmatpush3.bf16.msra.mxu0 %v10250_v59 }
0x4f07   :  { %8208 = vmatprep.subr.bf16.mxu1 %v10262_v15  ;;  %8227 = vmatprep.subr.bf16.mxu0 %v8842_v7 }
0x4f0a   :  { %8210 = vmatpush1.bf16.msra.mxu1 %v10273_v32  ;;  %8229 = vmatpush3.bf16.msra.mxu0 %v10276_v53 }
0x4f0b   :  { %8212 = vmatprep.subr.bf16.mxu1 %v10285_v36  ;;  %8230 = vmatprep.subr.bf16.mxu0 %v8842_v7 }
0x4f0e   :  { %8214 = vmatpush1.bf16.msra.mxu1 %v10300_v50  ;;  %8232 = vmatpush3.bf16.msra.mxu0 %v10305_v19 }
0x4f0f   :  { %8234 = vmatprep.subr.bf16.mxu1 %v10149_v30  ;;  %8257 = vmatprep.subr.bf16.mxu0 %v8842_v7 }
0x4fcc   :  { %v5521_v11 = vpop.f32.mrb[62].mxu1  ;;  %v5592_v47 = vpop.f32.mrb[54].mxu0 }
0x4fcd   :  { %v5598_v21 = vadd.f32 %v5592_v47, %v4395_v46  ;;  %v5523_v48 = vpop.f32.mrb[63].mxu1  ;;  %v7353_v27 = vpop.f32.mrb[55].mxu0  ;;  %v8319_v28 = vadd.f32 %v5521_v11, %v10375_v14 }
0x4fce   :  { %v8320_v24 = vadd.f32 %v5523_v48, %v10362_v18 }
0x4fcf   :  { %v6343_v4 = vmul.f32 -1.442695, %v5598_v21  ;;  %v6341_v26 = vmul.f32 -1.442695, %v8319_v28 }
0x4fd0   :  { %v6342_v44 = vmul.f32 -1.442695, %v8320_v24 }
0x4fd1   :  { %8754 = vpow2.f32 %v6343_v4 }
0x4fd2   :  { %8756 = vpow2.f32 %v6342_v44 }
0x4fd3   :  { %8758 = vtanh.f32 %v5598_v21 }
0x4fd4   :  { %8760 = vtanh.f32 %v8320_v24 }
0x4fdb   :  { %v8755_v0 = vpop.eup %8754 }
0x4fdc   :  { %v8757_v39 = vpop.eup %8756  ;;  %v5613_v30 = vadd.f32 1.0, %v8755_v0 }
0x4fdd   :  { %v5612_v63 = vadd.f32 1.0, %v8757_v39  ;;  %v8759_v16 = vpop.eup %8758 }
0x4fde   :  { %8762 = vrcp.f32 %v5613_v30  ;;  %v8761_v9 = vpop.eup %8760 }
0x4fdf   :  { %8764 = vrcp.f32 %v5612_v63 }
0x4fe0   :  { %8766 = vpow2.f32 %v6341_v26 }
0x4fe8   :  { %v8763_v45 = vpop.eup %8762 }
0x4fe9   :  { %v8765_v1 = vpop.eup %8764  ;;  %v5622_v3 = vsel %vm2401_vm6, %v8759_v16, %v8763_v45 }
0x4fea   :  { %5629 = vrot.lane.b32.xlu1 %v5622_v3, %s8845_s3  ;;  %v5621_v41 = vsel %vm2397_vm7, %v8761_v9, %v8765_v1  ;;  %v8767_v25 = vpop.eup %8766 }
0x4feb   :  { %5627 = vrot.lane.b32.xlu0 %v5621_v41, %s8845_s3  ;;  %v5611_v35 = vadd.f32 1.0, %v8767_v25  ;;  %v5624_v55 = vmul.f32 %v5621_v41, %v10594_v23 }
0x4fed   :  { %8768 = vrcp.f32 %v5611_v35 }
0x4ff7   :  { %v8769_v2 = vpop.eup %8768 }
0x4ff8   :  { %v5623_v12 = vmul.f32 %v8769_v2, %v10592_v20 }
0x505c   :  { %v5630_v49 = vpop.permute.xlu1 %5629 }
0x505d   :  { %v5628_v17 = vpop.permute.xlu0 %5627 }
0x505e   :  { %v5631_v29 = vsel %vm2587_vm8, %v5628_v17, %v5630_v49  ;;  %v4405_v17 = vadd.f32 %v10356_v5, %v10354_v62 }
0x505f   :  { %v5633_v22 = vmul.f32 %v8769_v2, %v5631_v29 }
0x5061   :  { %5635 = vrot.lane.b32.xlu0 %v5633_v22, %s8847_s9 }
0x50d3   :  { %v5636_v56 = vpop.permute.xlu0 %5635 }
0x50d4   :  { %v10645_v37 = vadd.f32 %v5636_v56, %v5623_v12  ;;  %v10647_v52 = vadd.f32 %v5636_v56, %v5624_v55 }
0x50d6   :  { %8770 = vtanh.f32 %v10645_v37 }
0x50d7   :  { %8772 = vtanh.f32 %v10647_v52 }
0x50e0   :  { %v8771_v34 = vpop.eup %8770 }
0x50e1   :  { %v8773_v38 = vpop.eup %8772  ;;  %5644 = vrot.lane.b32.xlu1 %v8771_v34, %s8845_s3 }
0x50e2   :  { %5646 = vrot.lane.b32.xlu0 %v8773_v38, %s8845_s3 }
0x5153   :  { %v5645_v60 = vpop.permute.xlu1 %5644 }
0x5154   :  { %v5647_v46 = vpop.permute.xlu0 %5646 }
0x5155   :  { %v5648_v20 = vsel %vm2587_vm8, %v5645_v60, %v5647_v46 }
0x5156   :  { %v5650_v23 = vmul.f32 %v5648_v20, %v5622_v3 }
0x5158   :  { %5655 = vrot.lane.b32.xlu1 %v5650_v23, %s8847_s9 }
0x51ca   :  { %v5656_v11 = vpop.permute.xlu1 %5655 }
0x51cb   :  { %6344 = vmatmul.mubr.msk.f32.vlgmr.msra.gmra.mrb[64].mxu1 %vm2408_vm9, %v5656_v11  ;;  %7379 = vmatmul.mubr.msk.f32.vlgmr.msra.gmra.mrb[56].mxu0 %vm2408_vm9, %v5656_v11 }
0x51cc   :  { %8236 = vmatpush1.bf16.msra.mxu1 %v10160_v58  ;;  %8259 = vmatpush3.bf16.msra.mxu0 %v10186_v6  ;;  %v4400_v58 = vadd.f32 %v10358_v8, %v10354_v62 }
0x51cd   :  { %8238 = vmatprep.subr.bf16.mxu1 %v10162_v40  ;;  %8260 = vmatprep.subr.bf16.mxu0 %v8842_v7 }
0x51ce   :  { %5927 = vmatprep.mubr.f32.mxu1 %v8844_v13  ;;  %7405 = vmatprep.mubr.msk.f32.mxu0 %vm8843_vm1, %v8844_v13 }
0x51d0   :  { %8240 = vmatpush1.bf16.msra.mxu1 %v10184_v54  ;;  %8262 = vmatpush3.bf16.msra.mxu0 %v10204_v10 }
0x51d1   :  { %8242 = vmatprep.subr.bf16.mxu1 %v10192_v61  ;;  %8263 = vmatprep.subr.bf16.mxu0 %v8842_v7 }
0x51d4   :  { %8244 = vmatpush1.bf16.msra.mxu1 %v10220_v31  ;;  %8265 = vmatpush3.bf16.msra.mxu0 %v10234_v42 }
0x51d5   :  { %8246 = vmatprep.subr.bf16.mxu1 %v10224_v43  ;;  %8266 = vmatprep.subr.bf16.mxu0 %v8842_v7 }
0x51d8   :  { %8248 = vmatpush1.bf16.msra.mxu1 %v10238_v51  ;;  %8268 = vmatpush3.bf16.msra.mxu0 %v10250_v59 }
0x51d9   :  { %8250 = vmatprep.subr.bf16.mxu1 %v10262_v15  ;;  %8269 = vmatprep.subr.bf16.mxu0 %v8842_v7 }
0x51dc   :  { %8252 = vmatpush1.bf16.msra.mxu1 %v10273_v32  ;;  %8271 = vmatpush3.bf16.msra.mxu0 %v10276_v53 }
0x51dd   :  { %8254 = vmatprep.subr.bf16.mxu1 %v10285_v36  ;;  %8272 = vmatprep.subr.bf16.mxu0 %v8842_v7 }
0x51e0   :  { %8256 = vmatpush1.bf16.msra.mxu1 %v10300_v50  ;;  %8274 = vmatpush3.bf16.msra.mxu0 %v10305_v19 }
0x51e1   :  { %8275 = vmatprep.subr.bf16.mxu0 %v8842_v7 }
0x529e   :  { %v5725_v40 = vpop.f32.mrb[64].mxu1  ;;  %v5796_v54 = vpop.f32.mrb[56].mxu0 }
0x529f   :  { %v5802_v6 = vadd.f32 %v5796_v54, %v4400_v58  ;;  %v5727_v61 = vpop.f32.mrb[65].mxu1  ;;  %v7380_v10 = vpop.f32.mrb[57].mxu0  ;;  %v8321_v21 = vadd.f32 %v5725_v40, %v10375_v14 }
0x52a0   :  { %v8322_v31 = vadd.f32 %v5727_v61, %v10362_v18 }
0x52a1   :  { %v6348_v43 = vmul.f32 -1.442695, %v5802_v6  ;;  %v6346_v48 = vmul.f32 -1.442695, %v8321_v21 }
0x52a2   :  { %v6347_v42 = vmul.f32 -1.442695, %v8322_v31 }
0x52a3   :  { %8774 = vpow2.f32 %v6348_v43 }
0x52a4   :  { %8776 = vpow2.f32 %v6347_v42 }
0x52a5   :  { %8778 = vtanh.f32 %v5802_v6 }
0x52a6   :  { %8780 = vtanh.f32 %v8322_v31 }
0x52ad   :  { %v8775_v51 = vpop.eup %8774 }
0x52ae   :  { %v8777_v59 = vpop.eup %8776  ;;  %v5817_v15 = vadd.f32 1.0, %v8775_v51 }
0x52af   :  { %v5816_v32 = vadd.f32 1.0, %v8777_v59  ;;  %v8779_v53 = vpop.eup %8778 }
0x52b0   :  { %8782 = vrcp.f32 %v5817_v15  ;;  %v8781_v36 = vpop.eup %8780  ;;  %v6060_v15 = vld [vmem:[%s10800_s13 + $0x8] sm:$0xff] }
0x52b1   :  { %8784 = vrcp.f32 %v5816_v32  ;;  %v6061_v32 = vld [vmem:[%s10800_s13 + $0x10] sm:$0xff] }
0x52b2   :  { %8786 = vpow2.f32 %v6346_v48  ;;  %v6065_v48 = vld [vmem:[%s10800_s13 + $0x30] sm:$0xff] }
0x52ba   :  { %v8783_v50 = vpop.eup %8782 }
0x52bb   :  { %v8785_v19 = vpop.eup %8784  ;;  %v5826_v8 = vsel %vm2401_vm6, %v8779_v53, %v8783_v50 }
0x52bc   :  { %5833 = vrot.lane.b32.xlu1 %v5826_v8, %s8845_s3  ;;  %v5825_v47 = vsel %vm2397_vm7, %v8781_v36, %v8785_v19  ;;  %v8787_v27 = vpop.eup %8786  ;;  %v6062_v36 = vld [vmem:[%s10800_s13 + $0x18] sm:$0xff]  ;;  %v6063_v19 = vld [vmem:[%s10800_s13 + $0x20] sm:$0xff] }
0x52bd   :  { %5831 = vrot.lane.b32.xlu0 %v5825_v47, %s8845_s3  ;;  %v5815_v24 = vadd.f32 1.0, %v8787_v27  ;;  %v5828_v16 = vmul.f32 %v5825_v47, %v10647_v52  ;;  %v8279_v50 = vpack.c.bf16 %v6062_v36, %v6061_v32  ;;  %v6066_v27 = vld [vmem:[%s10800_s13 + $0x38] sm:$0xff] }
0x52bf   :  { %8788 = vrcp.f32 %v5815_v24 }
0x52c9   :  { %v8789_v0 = vpop.eup %8788 }
0x52ca   :  { %v5827_v63 = vmul.f32 %v8789_v0, %v10645_v37 }
0x532e   :  { %v5834_v4 = vpop.permute.xlu1 %5833 }
0x532f   :  { %v5832_v44 = vpop.permute.xlu0 %5831 }
0x5330   :  { %v5835_v39 = vsel %vm2587_vm8, %v5832_v44, %v5834_v4  ;;  %v8285_v4 = vpack.c.bf16 %v6066_v27, %v6065_v48  ;;  %v6067_v44 = vld [vmem:[%s10800_s13 + $0x40] sm:$0xff] }
0x5331   :  { %v5837_v30 = vmul.f32 %v8789_v0, %v5835_v39  ;;  %v6068_v0 = vld [vmem:[%s10800_s13 + $0x48] sm:$0xff] }
0x5332   :  { %v8288_v39 = vpack.c.bf16 %v6068_v0, %v6067_v44 }
0x5333   :  { %5839 = vrot.lane.b32.xlu0 %v5837_v30, %s8847_s9  ;;  %v6069_v30 = vld [vmem:[%s10800_s13 + $0x50] sm:$0xff] }
0x53a5   :  { %v5840_v9 = vpop.permute.xlu0 %5839 }
0x53a6   :  { %v5842_v45 = vadd.f32 %v5840_v9, %v5827_v63  ;;  %v5843_v1 = vadd.f32 %v5840_v9, %v5828_v16  ;;  %v6070_v63 = vld [vmem:[%s10800_s13 + $0x58] sm:$0xff] }
0x53a7   :  { %v8291_v16 = vpack.c.bf16 %v6070_v63, %v6069_v30 }
0x53a8   :  { %8790 = vtanh.f32 %v5842_v45 }
0x53a9   :  { %8792 = vtanh.f32 %v5843_v1 }
0x53b2   :  { %v8791_v3 = vpop.eup %8790 }
0x53b3   :  { %v8793_v41 = vpop.eup %8792  ;;  %5848 = vrot.lane.b32.xlu1 %v8791_v3, %s8845_s3 }
0x53b4   :  { %5850 = vrot.lane.b32.xlu0 %v8793_v41, %s8845_s3 }
0x5425   :  { %v5849_v28 = vpop.permute.xlu1 %5848 }
0x5426   :  { %v5851_v26 = vpop.permute.xlu0 %5850 }
0x5427   :  { %v5852_v25 = vsel %vm2587_vm8, %v5849_v28, %v5851_v26  ;;  %v6354_v28 = vld [vmem:[%s10801_s14] ss:$0 sm:$0xff]  ;;  %s8849_s14 = smov 117  }
0x5428   :  { %v5854_v35 = vmul.f32 %v5852_v25, %v5826_v8  ;;  %v6064_v8 = vld [vmem:[%s10800_s13 + $0x28] sm:$0xff] }
0x5429   :  { %v8282_v47 = vpack.c.bf16 %v6064_v8, %v6063_v19 }
0x542a   :  { %5859 = vrot.lane.b32.xlu1 %v5854_v35, %s8847_s9 }
0x549c   :  { %v5860_v49 = vpop.permute.xlu1 %5859 }
0x549d   :  { %6349 = vmatmul.mubr.msk.f32.vlgmr.msra.gmra.mrb[66].mxu1 %vm2408_vm9, %v5860_v49  ;;  %7406 = vmatmul.mubr.msk.f32.vlgmr.msra.gmra.mrb[58].mxu0 %vm2408_vm9, %v5860_v49 }
0x549e   :  { %7432 = vmatprep.mubr.msk.f32.mxu0 %vm8843_vm1, %v8844_v13 }
0x5570   :  { %v5929_v2 = vpop.f32.mrb[66].mxu1  ;;  %v6000_v29 = vpop.f32.mrb[58].mxu0 }
0x5571   :  { %v6006_v22 = vadd.f32 %v6000_v29, %v4405_v17  ;;  %v5931_v12 = vpop.f32.mrb[67].mxu1  ;;  %v7407_v55 = vpop.f32.mrb[59].mxu0  ;;  %v8323_v11 = vadd.f32 %v5929_v2, %v10375_v14  ;;  %v6059_v14 = vld [vmem:[%s10800_s13] sm:$0xff]  ;;  %s8848_s13 = smov 118  }
0x5572   :  { %v8324_v56 = vadd.f32 %v5931_v12, %v10362_v18  ;;  %v8276_v53 = vpack.c.bf16 %v6060_v15, %v6059_v14 }
0x5573   :  { %v6353_v37 = vmul.f32 -1.442695, %v6006_v22  ;;  %v6351_v58 = vmul.f32 -1.442695, %v8323_v11 }
0x5574   :  { %v6352_v52 = vmul.f32 -1.442695, %v8324_v56  ;;  %8277 = vmatpush3.bf16.msra.mxu0 %v8276_v53 }
0x5575   :  { %8794 = vpow2.f32 %v6353_v37  ;;  %8278 = vmatprep.subr.bf16.mxu0 %v8842_v7 }
0x5576   :  { %8796 = vpow2.f32 %v6352_v52 }
0x5577   :  { %8798 = vtanh.f32 %v6006_v22 }
0x5578   :  { %8800 = vtanh.f32 %v8324_v56  ;;  %8280 = vmatpush3.bf16.msra.mxu0 %v8279_v50 }
0x5579   :  { %8281 = vmatprep.subr.bf16.mxu0 %v8842_v7 }
0x557c   :  { %8283 = vmatpush3.bf16.msra.mxu0 %v8282_v47 }
0x557d   :  { %8284 = vmatprep.subr.bf16.mxu0 %v8842_v7 }
0x557f   :  { %v8795_v34 = vpop.eup %8794 }
0x5580   :  { %v8797_v38 = vpop.eup %8796  ;;  %v6021_v60 = vadd.f32 1.0, %v8795_v34  ;;  %8286 = vmatpush3.bf16.msra.mxu0 %v8285_v4 }
0x5581   :  { %v6020_v13 = vadd.f32 1.0, %v8797_v38  ;;  %v8799_v62 = vpop.eup %8798  ;;  %8287 = vmatprep.subr.bf16.mxu0 %v8842_v7 }
0x5582   :  { %8802 = vrcp.f32 %v6021_v60  ;;  %v8801_v5 = vpop.eup %8800 }
0x5583   :  { %8804 = vrcp.f32 %v6020_v13 }
0x5584   :  { %8806 = vpow2.f32 %v6351_v58  ;;  %8289 = vmatpush3.bf16.msra.mxu0 %v8288_v39 }
0x5585   :  { %8290 = vmatprep.subr.bf16.mxu0 %v8842_v7 }
0x5588   :  { %8292 = vmatpush3.bf16.msra.mxu0 %v8291_v16 }
0x558c   :  { %v8803_v46 = vpop.eup %8802 }
0x558d   :  { %v8805_v20 = vpop.eup %8804  ;;  %v6030_v23 = vsel %vm2401_vm6, %v8799_v62, %v8803_v46 }
0x558e   :  { %6037 = vrot.lane.b32.xlu1 %v6030_v23, %s8845_s3  ;;  %v6029_v18 = vsel %vm2397_vm7, %v8801_v5, %v8805_v20  ;;  %v8807_v40 = vpop.eup %8806 }
0x558f   :  { %6035 = vrot.lane.b32.xlu0 %v6029_v18, %s8845_s3  ;;  %v6019_v54 = vadd.f32 1.0, %v8807_v40  ;;  %v6032_v33 = vmul.f32 %v6029_v18, %v5843_v1 }
0x5591   :  { %8808 = vrcp.f32 %v6019_v54 }
0x559b   :  { %v8809_v10 = vpop.eup %8808 }
0x559c   :  { %v6031_v43 = vmul.f32 %v8809_v10, %v5842_v45 }
0x5600   :  { %v6038_v6 = vpop.permute.xlu1 %6037 }
0x5601   :  { %v6036_v61 = vpop.permute.xlu0 %6035 }
0x5602   :  { %v6039_v57 = vsel %vm2587_vm8, %v6036_v61, %v6038_v6 }
0x5603   :  { %v6041_v31 = vmul.f32 %v8809_v10, %v6039_v57 }
0x5605   :  { %6043 = vrot.lane.b32.xlu0 %v6041_v31, %s8847_s9 }
0x5677   :  { %v6044_v42 = vpop.permute.xlu0 %6043 }
0x5678   :  { %v6046_v51 = vadd.f32 %v6044_v42, %v6031_v43  ;;  %v6047_v59 = vadd.f32 %v6044_v42, %v6032_v33 }
0x567a   :  { %8810 = vtanh.f32 %v6046_v51 }
0x567b   :  { %8812 = vtanh.f32 %v6047_v59 }
0x5684   :  { %v8811_v21 = vpop.eup %8810 }
0x5685   :  { %v8813_v24 = vpop.eup %8812  ;;  %6052 = vrot.lane.b32.xlu1 %v8811_v21, %s8845_s3 }
0x5686   :  { %6054 = vrot.lane.b32.xlu0 %v8813_v24, %s8845_s3 }
0x56f7   :  { %v6053_v9 = vpop.permute.xlu1 %6052 }
0x56f8   :  { %v6055_v45 = vpop.permute.xlu0 %6054 }
0x56f9   :  { %v6056_v1 = vsel %vm2587_vm8, %v6053_v9, %v6055_v45 }
0x56fa   :  { %v6058_v3 = vmul.f32 %v6056_v1, %v6030_v23 }
0x56fc   :  { %6079 = vrot.lane.b32.xlu1 %v6058_v3, %s8847_s9 }
0x576e   :  { %v6080_v41 = vpop.permute.xlu1 %6079 }
0x576f   :  { %7433 = vmatmul.mubr.msk.f32.vlgmr.msra.gmra.mrb[60].mxu0 %vm2408_vm9, %v6080_v41 }
0x5842   :  { %v6149_v26 = vpop.f32.mrb[60].mxu0 }
0x5843   :  { %v6150_v25 = vadd.f32 %v6354_v28, %v6149_v26  ;;  %v7434_v35 = vpop.f32.mrb[61].mxu0 }
0x5845   :  { %v6154_v7 = vsel %vm6153_vm10, %v6150_v25, -inf }
0x5846   :  { %6155 = vmax.xlane.f32.xlu0 %v6154_v7 }
0x585c   :  { %6167 = vrot.lane.b32.xlu0 %v6150_v25, %s8848_s13 }
0x58d3   :  { %v6156_v49 = vpop.xlane.xlu0 %6155 }
0x58d4   :  { %v6157_v17 = vsub.f32 %v6150_v25, %v6156_v49 }
0x58d6   :  { %v6158_v2 = vmul.f32 1.442695, %v6157_v17 }
0x58d7   :  { %v6168_v29 = vpop.permute.xlu0 %6167 }
0x58d8   :  { %8814 = vpow2.f32 %v6158_v2  ;;  %6171 = vst.msk [vmem:[%s10803_s16] sm:$0xff] %vm6170_vm11, %v6168_v29  ;;  %s8818_s16 = scalar_lea.vmem %s6183_s0, 128 }
0x58d9   :  { %p8819_p0 = scmp.ne.s32.totalorder %s6183_s0, %s8818_s16  ;;  %p8824_p2 = scmp.lt.s32.totalorder %s8818_s16, %s8818_s16 }
0x58db   :  { %p8825_p3 = por %p8824_p2, %p8823_p1 }
0x58dd   :  { %p8826_p4 = pnand %p8825_p3, %p8819_p0 }
0x58e2   :  { %v8815_v22 = vpop.eup %8814 }
0x58e3   :  { %v6160_v12 = vsel %vm6153_vm10, %v8815_v22, 0.0 }
0x58e4   :  { %6161 = vadd.xlane.f32.xlu1 %v6160_v12 }
0x58f5   :  { %6172 = vrot.lane.b32.xlu1 %v6150_v25, %s8849_s14 }
0x5971   :  { %v6162_v55 = vpop.xlane.xlu1 %6161 }
0x5972   :  { %8816 = vrcp.f32 %v6162_v55 }
0x5975   :  { %v6173_v56 = vpop.permute.xlu1 %6172 }
0x5976   :  { %6175 = vst.msk [vmem:[%s10804_s17] sm:$0xff] %vm6170_vm11, %v6173_v56 }
0x597c   :  { %v8817_v37 = vpop.eup %8816 }
0x597d   :  { %v6164_v52 = vmul.f32 %v8817_v37, %v8815_v22 }
0x597f   :  { %6165 = vst.msk [vmem:[#allocation6] sm:$0xff] %vm6153_vm10, %v6164_v52 }
0x5980   :  { %8829 = shalt.err (!%p8826_p4)
}
0x5981   :  { %s8830_s19 = scalar_lea.hbm %s10802_s15, 128 }
0x5982   :  { %p8831_p5 = scmp.ne.s32.totalorder %s10802_s15, %s8830_s19  ;;  %p8834_p6 = scmp.lt.u32.totalorder %s8830_s19, %s10802_s15 }
0x5984   :  { %p8836_p7 = pnand %p8834_p6, %p8831_p5 }
0x5986   :  { %8839 = shalt.err (!%p8836_p7)
}
0x5987   :  { %6185 = dma.vmem_to_hbm [thread:$0]  %s6183_s0, 128, %s10802_s15, [#allocation7]  }
0x5988   :  { %8840 = dma.done.wait [#allocation7], 128  }
0x5989   :  { %8841 = vsyncadd [#allocation7], 4294967168 }
0x598a   :  { %6197 = vsyncpa [#allocation7], 1 }

</bundles_post_ra>
